<compile_context>
chip_gen: v7x
topology: tpu7x:2x2x1
jax: 0.10.0
libtpu: 0.0.40
codegen_flags: <defaults>
</compile_context>

<pallas_src>
import functools

import jax
import jax.numpy as jnp
from jax import lax
from jax.experimental import pallas as pl
from jax.experimental.pallas import tpu as pltpu


def _ceil_to(x, m):
    return ((x + m - 1) // m) * m


def _device_kind():
    try:
        return jax.devices()[0].device_kind.lower()
    except Exception:
        return ""


def _default_dw_dtype():
    # bf16 VALUs exist on v6e/v7x; keep f32 elementwise on v5e (and unknown).
    k = _device_kind()
    if "v6" in k or "v7" in k or "7x" in k:
        return jnp.bfloat16
    return jnp.float32


def _default_vmem_limit():
    k = _device_kind()
    if "v5" in k:
        return 56 * 1024 * 1024
    if "v6" in k:
        return 96 * 1024 * 1024
    return 48 * 1024 * 1024        # v7x (64 MiB physical) and unknown: be safe


def _pick_row_block(H, W, hid_p, dw_itemsize, budget_bytes=10 << 20):
    """Largest divisor R of H whose per-block hidden intermediates fit budget.
    Prefers sublane-aligned blocks (R*W % 8 == 0)."""
    def fits(R):
        return 6 * (R + 2) * W * hid_p * dw_itemsize <= budget_bytes
    for aligned_only in (True, False):
        for R in range(H, 0, -1):
            if H % R:
                continue
            if aligned_only and (R * W) % 8 != 0:
                continue
            if fits(R):
                return R
    return 1


def _mbconv_kernel(x_ref, w1_ref, b1_ref, wd_ref, b2_ref, w3_ref, b3_ref,
                   wse1_ref, wse2_ref, out_ref, *,
                   H, W, R, use_res_connect, dw_dtype):
    """One image per grid step.

    x_ref  : ((H+2)*W, Cin_p)  bf16  -- image with a 1-row zero halo top+bottom
    out_ref: (H*W,     Cout_p) f32
    """
    HW = H * W
    RW = R * W
    RW2 = (R + 2) * W
    n_blocks = H // R
    cout_p = out_ref.shape[-1]

    # Hoisted once per grid step.
    wd = wd_ref[...].astype(dw_dtype)               # (9, hid_p), BN2 folded
    b2 = b2_ref[...].astype(dw_dtype)               # (1, hid_p)
    jrow = lax.broadcasted_iota(jnp.int32, (RW2, 1), 0)
    col = (jrow & (W - 1)) if (W & (W - 1)) == 0 else (jrow % W)
    not_c0 = col != 0                               # keep-mask: sources for dx=+1
    not_cW = col != (W - 1)                         # keep-mask: sources for dx=-1

    def block_fn(r, psum):
        start = r * RW
        if not isinstance(start, int) and RW % 8 == 0:
            start = pl.multiple_of(start, 8)

        # ---- expand 1x1 (BN1 scale folded into w1) + shift + ReLU6 --------
        xb = x_ref[pl.ds(start, RW2), :]                       # (RW2, Cin_p) bf16
        h = jnp.dot(xb, w1_ref[...], preferred_element_type=jnp.float32)
        h = jnp.clip(h + b1_ref[...], 0.0, 6.0).astype(dw_dtype)

        # Zero halo rows that fall in the zero-padded image border (top/bot):
        # padding=1 semantics of the depthwise conv (one select, not 8).
        gflat = jrow + start
        row_ok = (gflat >= W) & (gflat < (H + 1) * W)
        h = jnp.where(row_ok, h, 0.0)

        # ---- depthwise 3x3, stride 1, pad 1 (BN2 scale folded into wd) ----
        # dx=+/-1 taps: pre-zero the wrap-around source column once, then one
        # sublane roll each; dy taps are static W-aligned slices into the
        # halo'd block.  Wrap-around rolled rows land on zeroed columns, so
        # they contribute exactly 0 (correct out-of-image behaviour).
        h_r = jnp.where(not_c0, h, 0.0)
        h_l = jnp.where(not_cW, h, 0.0)
        h_p1 = pltpu.roll(h_r, shift=RW2 - 1, axis=0)          # [i] = h_r[i+1]
        h_m1 = pltpu.roll(h_l, shift=1, axis=0)                # [i] = h_l[i-1]

        def tap(a, dy, k):
            s = (1 + dy) * W
            return a[s:s + RW, :] * wd[k:k + 1, :]

        acc = tap(h, 0, 4)
        acc = acc + tap(h_m1, -1, 0) + tap(h, -1, 1) + tap(h_p1, -1, 2)
        acc = acc + tap(h_m1, 0, 3) + tap(h_p1, 0, 5)
        acc = acc + tap(h_m1, 1, 6) + tap(h, 1, 7) + tap(h_p1, 1, 8)
        d = jnp.clip(acc + b2, 0.0, 6.0)

        # ---- project 1x1 (BN3 scale folded into w3) + shift ---------------
        p = jnp.dot(d.astype(jnp.bfloat16), w3_ref[...],
                    preferred_element_type=jnp.float32)
        p = p + b3_ref[...]
        out_ref[pl.ds(start, RW), :] = p
        return psum + jnp.sum(p, axis=0, keepdims=True)

    psum0 = jnp.zeros((1, cout_p), jnp.float32)
    if n_blocks == 1:
        psum = block_fn(0, psum0)
    else:
        psum = lax.fori_loop(0, n_blocks, block_fn, psum0,
                             unroll=(n_blocks <= 4))

    # ---- SE: global avg pool -> fc -> ReLU -> fc -> sigmoid -> scale -------
    # (Matches the PyTorch module: SE is applied to conv(x), i.e. after the
    # project conv + BN3, on out_channels.)  Gate math stays f32.
    mean = psum * (1.0 / HW)                                    # (1, Cout_p)
    z = jnp.maximum(
        jnp.dot(mean, wse1_ref[...], preferred_element_type=jnp.float32), 0.0)
    g = jnp.dot(z, wse2_ref[...], preferred_element_type=jnp.float32)
    gate = 1.0 / (1.0 + jnp.exp(-g))                            # exact sigmoid

    # ---- final pass: apply gate (+ residual, bf16-x promoted to f32) -------
    if use_res_connect:
        xr = x_ref[pl.ds(W, HW), :].astype(jnp.float32)         # drop row halo
        out_ref[...] = out_ref[...] * gate + xr
    else:
        out_ref[...] = out_ref[...] * gate


def make_params(key, in_channels, out_channels, expand_ratio=6, reduction=4):
    """PyTorch-like raw parameters (eval-mode BatchNorm running stats)."""
    hidden = in_channels * expand_ratio
    c_red = max(1, out_channels // reduction)
    ks = jax.random.split(key, 5)
    eps = 1e-5

    w1 = 0.1 * jax.random.normal(ks[0], (in_channels, hidden), jnp.float32)
    wd = 0.1 * jax.random.normal(ks[1], (3, 3, hidden), jnp.float32)
    w3 = 0.1 * jax.random.normal(ks[2], (hidden, out_channels), jnp.float32)
    wse1 = 0.1 * jax.random.normal(ks[3], (out_channels, c_red), jnp.float32)
    wse2 = 0.1 * jax.random.normal(ks[4], (c_red, out_channels), jnp.float32)

    def bn(c):  # gamma=1, beta=0, running_mean=0, running_var=1 (eval mode)
        scale = jnp.full((c,), (1.0 + eps) ** -0.5, jnp.float32)
        shift = jnp.zeros((c,), jnp.float32)
        return scale, shift

    s1, b1 = bn(hidden)
    s2, b2 = bn(hidden)
    s3, b3 = bn(out_channels)
    return (w1, s1, b1, wd, s2, b2, w3, s3, b3, wse1, wse2)


def prepare_params(raw, lane=128):
    """Fold BN scales into the conv weights, zero-pad every channel dim to a
    multiple of `lane`, and cast the 1x1-matmul weights to bf16."""
    (w1, s1, b1, wd, s2, b2, w3, s3, b3, wse1, wse2) = raw
    cin, hidden = w1.shape
    cout = w3.shape[1]
    cred = wse1.shape[1]
    cin_p, hid_p = _ceil_to(cin, lane), _ceil_to(hidden, lane)
    cout_p, cred_p = _ceil_to(cout, lane), _ceil_to(cred, lane)

    def pad2(a, r, c):
        return jnp.pad(a, ((0, r - a.shape[0]), (0, c - a.shape[1])))

    w1f = pad2(w1 * s1[None, :], cin_p, hid_p).astype(jnp.bfloat16)
    w3f = pad2(w3 * s3[None, :], hid_p, cout_p).astype(jnp.bfloat16)
    wdf = pad2((wd * s2[None, None, :]).reshape(9, hidden), 9, hid_p)
    b1f = jnp.pad(b1, (0, hid_p - hidden)).reshape(1, hid_p)
    b2f = jnp.pad(b2, (0, hid_p - hidden)).reshape(1, hid_p)
    b3f = jnp.pad(b3, (0, cout_p - cout)).reshape(1, cout_p)
    wse1f = pad2(wse1, cout_p, cred_p)
    wse2f = pad2(wse2, cred_p, cout_p)
    return (w1f, b1f, wdf, b2f, w3f, b3f, wse1f, wse2f)


def mbconv_block_nhwc(x_nhwc, prepared, *, in_channels, out_channels, stride=1,
                      dw_dtype=None, row_block=None, vmem_limit_bytes=None):
    if stride != 1:
        # TODO(synk): stride>1 depthwise conv not implemented.
        raise NotImplementedError("stride > 1 not implemented")
    use_res_connect = (stride == 1) and (in_channels == out_channels)

    N, H, W, C = x_nhwc.shape
    assert C == in_channels
    w1, b1, wd, b2, w3, b3, wse1, wse2 = prepared
    cin_p, _ = w1.shape
    cout_p = w3.shape[1]
    hid_p = w3.shape[0]
    HW = H * W
    if use_res_connect:
        assert cin_p == cout_p

    if dw_dtype is None:
        dw_dtype = _default_dw_dtype()
    if vmem_limit_bytes is None:
        vmem_limit_bytes = _default_vmem_limit()
    if row_block is None:
        row_block = _pick_row_block(H, W, hid_p, jnp.dtype(dw_dtype).itemsize)
    R = row_block
    assert H % R == 0, "row_block must divide H"

    # Pad channels to the lane width, add the 1-row zero halo top+bottom, cast
    # to bf16 and flatten -- one fused pad/convert, channels on lanes.
    x_p = jnp.pad(x_nhwc.astype(jnp.bfloat16),
                  ((0, 0), (1, 1), (0, 0), (0, cin_p - C)))
    x_p = x_p.reshape(N * (H + 2) * W, cin_p)

    kernel = functools.partial(_mbconv_kernel, H=H, W=W, R=R,
                               use_res_connect=use_res_connect,
                               dw_dtype=dw_dtype)

    def rep(shape):  # weight replicated across the grid
        zeros = (0,) * len(shape)
        return pl.BlockSpec(shape, lambda b, _z=zeros: _z)

    out_flat = pl.pallas_call(
        kernel,
        out_shape=jax.ShapeDtypeStruct((N * HW, cout_p), jnp.float32),
        grid_spec=pltpu.PrefetchScalarGridSpec(
            num_scalar_prefetch=0,
            grid=(N,),
            in_specs=[
                pl.BlockSpec(((H + 2) * W, cin_p), lambda b: (b, 0)),  # x slab
                rep(w1.shape),     # expand weight (BN1 folded, bf16)
                rep(b1.shape),     # BN1 shift
                rep(wd.shape),     # depthwise weight (BN2 folded)
                rep(b2.shape),     # BN2 shift
                rep(w3.shape),     # project weight (BN3 folded, bf16)
                rep(b3.shape),     # BN3 shift
                rep(wse1.shape),   # SE fc1
                rep(wse2.shape),   # SE fc2
            ],
            out_specs=pl.BlockSpec((HW, cout_p), lambda b: (b, 0)),
        ),
        compiler_params=pltpu.CompilerParams(
            dimension_semantics=("parallel",),
            vmem_limit_bytes=vmem_limit_bytes),
    )(x_p, w1, b1, wd, b2, w3, b3, wse1, wse2)

    return out_flat.reshape(N, H, W, cout_p)[..., :out_channels]


def mbconv_block(x_nchw, prepared, *, in_channels, out_channels, stride=1, **kw):
    """NCHW wrapper matching the PyTorch module signature.
    TODO(synk): keep the surrounding graph NHWC and call mbconv_block_nhwc
    directly to avoid these two relayout round-trips through HBM."""
    x_nhwc = jnp.transpose(x_nchw, (0, 2, 3, 1))
    out = mbconv_block_nhwc(x_nhwc, prepared, in_channels=in_channels,
                            out_channels=out_channels, stride=stride, **kw)
    return jnp.transpose(out, (0, 3, 1, 2))


def mbconv_reference(x_nchw, raw, *, in_channels, out_channels):
    """Pure-JAX f32 reference of the PyTorch module (eval-mode BN)."""
    (w1, s1, b1, wd, s2, b2, w3, s3, b3, wse1, wse2) = raw
    N, C, H, W = x_nchw.shape
    hp = lax.Precision.HIGHEST
    x = jnp.transpose(x_nchw, (0, 2, 3, 1))
    h = jnp.clip(jnp.einsum("nhwc,ck->nhwk", x, w1, precision=hp) * s1 + b1,
                 0.0, 6.0)
    hpad = jnp.pad(h, ((0, 0), (1, 1), (1, 1), (0, 0)))
    d = jnp.zeros_like(h)
    for dy in range(3):
        for dx in range(3):
            d = d + hpad[:, dy:dy + H, dx:dx + W, :] * wd[dy, dx, :]
    d = jnp.clip(d * s2 + b2, 0.0, 6.0)
    p = jnp.einsum("nhwk,ko->nhwo", d, w3, precision=hp) * s3 + b3
    y = jnp.mean(p, axis=(1, 2))
    z = jnp.maximum(jnp.einsum("no,or->nr", y, wse1, precision=hp), 0.0)
    g = jnp.einsum("nr,ro->no", z, wse2, precision=hp)
    out = p * jax.nn.sigmoid(g)[:, None, None, :]
    if in_channels == out_channels:
        out = out + x
    return jnp.transpose(out, (0, 3, 1, 2))


if __name__ == "__main__":
    key = jax.random.PRNGKey(0)
    kx, kp = jax.random.split(key)

    N, C, Hh, Ww = 2, 4, 16, 16            # small NCHW input, in == out channels
    x = jax.random.normal(kx, (N, C, Hh, Ww), jnp.float32)

    raw = make_params(kp, in_channels=C, out_channels=C)
    prepared = prepare_params(raw)

    out = mbconv_block(x, prepared, in_channels=C, out_channels=C, stride=1)
    jax.block_until_ready(out)
    assert out.shape == (N, C, Hh, Ww)

    ref = mbconv_reference(x, raw, in_channels=C, out_channels=C)
    err = float(jnp.max(jnp.abs(out - ref)))
    assert err < 8e-2, f"max abs error vs f32 reference: {err}"
    print("KERNEL_OK")
</pallas_src>

<mosaic_0001>
module attributes {stable_mosaic.version = 11 : i64} {
  func.func @_mbconv_kernel(%arg0: i32, %arg1: memref<288x128xbf16, #tpu.memory_space<vmem>>, %arg2: memref<128x128xbf16, #tpu.memory_space<vmem>>, %arg3: memref<1x128xf32, #tpu.memory_space<vmem>>, %arg4: memref<9x128xf32, #tpu.memory_space<vmem>>, %arg5: memref<1x128xf32, #tpu.memory_space<vmem>>, %arg6: memref<128x128xbf16, #tpu.memory_space<vmem>>, %arg7: memref<1x128xf32, #tpu.memory_space<vmem>>, %arg8: memref<128x128xf32, #tpu.memory_space<vmem>>, %arg9: memref<128x128xf32, #tpu.memory_space<vmem>>, %arg10: memref<256x128xf32, #tpu.memory_space<vmem>>) attributes {dimension_semantics = [#tpu.dimension_semantics<parallel>], iteration_bounds = array<i64: 2>, scalar_prefetch = 0 : i64, scratch_operands = 0 : i64, tpu.core_type = #tpu.core_type<tc>, window_params = [{transform_indices = @transform_0, window_bounds = array<i64: 288, 128>}, {pipeline_mode = #tpu.pipeline_mode<synchronous>, transform_indices = @transform_1, window_bounds = array<i64: 128, 128>}, {pipeline_mode = #tpu.pipeline_mode<synchronous>, transform_indices = @transform_2, window_bounds = array<i64: 1, 128>}, {pipeline_mode = #tpu.pipeline_mode<synchronous>, transform_indices = @transform_3, window_bounds = array<i64: 9, 128>}, {pipeline_mode = #tpu.pipeline_mode<synchronous>, transform_indices = @transform_4, window_bounds = array<i64: 1, 128>}, {pipeline_mode = #tpu.pipeline_mode<synchronous>, transform_indices = @transform_5, window_bounds = array<i64: 128, 128>}, {pipeline_mode = #tpu.pipeline_mode<synchronous>, transform_indices = @transform_6, window_bounds = array<i64: 1, 128>}, {pipeline_mode = #tpu.pipeline_mode<synchronous>, transform_indices = @transform_7, window_bounds = array<i64: 128, 128>}, {pipeline_mode = #tpu.pipeline_mode<synchronous>, transform_indices = @transform_8, window_bounds = array<i64: 128, 128>}, {transform_indices = @transform_9, window_bounds = array<i64: 256, 128>}]} {
    %c0 = arith.constant 0 : index
    %c0_0 = arith.constant 0 : index
    %0 = vector.load %arg4[%c0, %c0_0] : memref<9x128xf32, #tpu.memory_space<vmem>>, vector<9x128xf32>
    %c0_1 = arith.constant 0 : index
    %c0_2 = arith.constant 0 : index
    %1 = vector.load %arg5[%c0_1, %c0_2] : memref<1x128xf32, #tpu.memory_space<vmem>>, vector<1x128xf32>
    %2 = tpu.iota {dimensions = array<i32: 0>} : vector<288x1xi32>
    %c15_i32 = arith.constant 15 : i32
    %3 = vector.broadcast %c15_i32 : i32 to vector<288x1xi32>
    %4 = arith.andi %2, %3 : vector<288x1xi32>
    %c0_i32 = arith.constant 0 : i32
    %5 = vector.broadcast %c0_i32 : i32 to vector<288x1xi32>
    %6 = arith.cmpi ne, %4, %5 : vector<288x1xi32>
    %c15_i32_3 = arith.constant 15 : i32
    %7 = vector.broadcast %c15_i32_3 : i32 to vector<288x1xi32>
    %8 = arith.cmpi ne, %4, %7 : vector<288x1xi32>
    %cst = arith.constant 0.000000e+00 : f32
    %9 = vector.broadcast %cst : f32 to vector<1x128xf32>
    %c0_4 = arith.constant 0 : index
    %c0_5 = arith.constant 0 : index
    %10 = vector.load %arg1[%c0_4, %c0_5] : memref<288x128xbf16, #tpu.memory_space<vmem>>, vector<288x128xbf16>
    %c0_6 = arith.constant 0 : index
    %c0_7 = arith.constant 0 : index
    %11 = vector.load %arg2[%c0_6, %c0_7] : memref<128x128xbf16, #tpu.memory_space<vmem>>, vector<128x128xbf16>
    %cst_8 = arith.constant dense<0.000000e+00> : vector<288x128xf32>
    %12 = tpu.matmul %10, %11, %cst_8 {dimension_numbers = #tpu.dot_dimension_numbers<[1], [0], [0], [1], [0, 0, 1, 1], [], []>} : vector<288x128xbf16>, vector<128x128xbf16>, vector<288x128xf32> -> vector<288x128xf32>
    %c0_9 = arith.constant 0 : index
    %c0_10 = arith.constant 0 : index
    %13 = vector.load %arg3[%c0_9, %c0_10] : memref<1x128xf32, #tpu.memory_space<vmem>>, vector<1x128xf32>
    %14 = vector.broadcast %13 : vector<1x128xf32> to vector<288x128xf32>
    %15 = arith.addf %12, %14 : vector<288x128xf32>
    %cst_11 = arith.constant 0.000000e+00 : f32
    %cst_12 = arith.constant 6.000000e+00 : f32
    %16 = vector.broadcast %cst_11 : f32 to vector<288x128xf32>
    %17 = arith.maximumf %16, %15 : vector<288x128xf32>
    %18 = vector.broadcast %cst_12 : f32 to vector<288x128xf32>
    %19 = arith.minimumf %18, %17 : vector<288x128xf32>
    %c0_i32_13 = arith.constant 0 : i32
    %20 = vector.broadcast %c0_i32_13 : i32 to vector<288x1xi32>
    %21 = arith.addi %2, %20 : vector<288x1xi32>
    %c16_i32 = arith.constant 16 : i32
    %22 = vector.broadcast %c16_i32 : i32 to vector<288x1xi32>
    %23 = arith.cmpi sge, %21, %22 : vector<288x1xi32>
    %c272_i32 = arith.constant 272 : i32
    %24 = vector.broadcast %c272_i32 : i32 to vector<288x1xi32>
    %25 = arith.cmpi slt, %21, %24 : vector<288x1xi32>
    %26 = arith.andi %23, %25 : vector<288x1xi1>
    %cst_14 = arith.constant 0.000000e+00 : f32
    %27 = vector.shape_cast %26 : vector<288x1xi1> to vector<288x1xi1>
    %28 = vector.broadcast %27 : vector<288x1xi1> to vector<288x128xi1>
    %29 = vector.broadcast %cst_14 : f32 to vector<288x128xf32>
    %30 = arith.select %28, %19, %29 : vector<288x128xi1>, vector<288x128xf32>
    %cst_15 = arith.constant 0.000000e+00 : f32
    %31 = vector.shape_cast %6 : vector<288x1xi1> to vector<288x1xi1>
    %32 = vector.broadcast %31 : vector<288x1xi1> to vector<288x128xi1>
    %33 = vector.broadcast %cst_15 : f32 to vector<288x128xf32>
    %34 = arith.select %32, %30, %33 : vector<288x128xi1>, vector<288x128xf32>
    %cst_16 = arith.constant 0.000000e+00 : f32
    %35 = vector.shape_cast %8 : vector<288x1xi1> to vector<288x1xi1>
    %36 = vector.broadcast %35 : vector<288x1xi1> to vector<288x128xi1>
    %37 = vector.broadcast %cst_16 : f32 to vector<288x128xf32>
    %38 = arith.select %36, %30, %37 : vector<288x128xi1>, vector<288x128xf32>
    %c287_i32 = arith.constant 287 : i32
    %39 = tpu.dynamic_rotate %34 by %c287_i32 dim 0 : vector<288x128xf32>, i32 -> vector<288x128xf32>
    %c1_i32 = arith.constant 1 : i32
    %40 = tpu.dynamic_rotate %38 by %c1_i32 dim 0 : vector<288x128xf32>, i32 -> vector<288x128xf32>
    %41 = vector.extract_strided_slice %30 {offsets = [16, 0], sizes = [256, 128], strides = [1, 1]} : vector<288x128xf32> to vector<256x128xf32>
    %42 = vector.extract_strided_slice %0 {offsets = [4, 0], sizes = [1, 128], strides = [1, 1]} : vector<9x128xf32> to vector<1x128xf32>
    %43 = vector.broadcast %42 : vector<1x128xf32> to vector<256x128xf32>
    %44 = arith.mulf %41, %43 : vector<256x128xf32>
    %45 = vector.extract_strided_slice %40 {offsets = [0, 0], sizes = [256, 128], strides = [1, 1]} : vector<288x128xf32> to vector<256x128xf32>
    %46 = vector.extract_strided_slice %0 {offsets = [0, 0], sizes = [1, 128], strides = [1, 1]} : vector<9x128xf32> to vector<1x128xf32>
    %47 = vector.broadcast %46 : vector<1x128xf32> to vector<256x128xf32>
    %48 = arith.mulf %45, %47 : vector<256x128xf32>
    %49 = arith.addf %44, %48 : vector<256x128xf32>
    %50 = vector.extract_strided_slice %30 {offsets = [0, 0], sizes = [256, 128], strides = [1, 1]} : vector<288x128xf32> to vector<256x128xf32>
    %51 = vector.extract_strided_slice %0 {offsets = [1, 0], sizes = [1, 128], strides = [1, 1]} : vector<9x128xf32> to vector<1x128xf32>
    %52 = vector.broadcast %51 : vector<1x128xf32> to vector<256x128xf32>
    %53 = arith.mulf %50, %52 : vector<256x128xf32>
    %54 = arith.addf %49, %53 : vector<256x128xf32>
    %55 = vector.extract_strided_slice %39 {offsets = [0, 0], sizes = [256, 128], strides = [1, 1]} : vector<288x128xf32> to vector<256x128xf32>
    %56 = vector.extract_strided_slice %0 {offsets = [2, 0], sizes = [1, 128], strides = [1, 1]} : vector<9x128xf32> to vector<1x128xf32>
    %57 = vector.broadcast %56 : vector<1x128xf32> to vector<256x128xf32>
    %58 = arith.mulf %55, %57 : vector<256x128xf32>
    %59 = arith.addf %54, %58 : vector<256x128xf32>
    %60 = vector.extract_strided_slice %40 {offsets = [16, 0], sizes = [256, 128], strides = [1, 1]} : vector<288x128xf32> to vector<256x128xf32>
    %61 = vector.extract_strided_slice %0 {offsets = [3, 0], sizes = [1, 128], strides = [1, 1]} : vector<9x128xf32> to vector<1x128xf32>
    %62 = vector.broadcast %61 : vector<1x128xf32> to vector<256x128xf32>
    %63 = arith.mulf %60, %62 : vector<256x128xf32>
    %64 = arith.addf %59, %63 : vector<256x128xf32>
    %65 = vector.extract_strided_slice %39 {offsets = [16, 0], sizes = [256, 128], strides = [1, 1]} : vector<288x128xf32> to vector<256x128xf32>
    %66 = vector.extract_strided_slice %0 {offsets = [5, 0], sizes = [1, 128], strides = [1, 1]} : vector<9x128xf32> to vector<1x128xf32>
    %67 = vector.broadcast %66 : vector<1x128xf32> to vector<256x128xf32>
    %68 = arith.mulf %65, %67 : vector<256x128xf32>
    %69 = arith.addf %64, %68 : vector<256x128xf32>
    %70 = vector.extract_strided_slice %40 {offsets = [32, 0], sizes = [256, 128], strides = [1, 1]} : vector<288x128xf32> to vector<256x128xf32>
    %71 = vector.extract_strided_slice %0 {offsets = [6, 0], sizes = [1, 128], strides = [1, 1]} : vector<9x128xf32> to vector<1x128xf32>
    %72 = vector.broadcast %71 : vector<1x128xf32> to vector<256x128xf32>
    %73 = arith.mulf %70, %72 : vector<256x128xf32>
    %74 = arith.addf %69, %73 : vector<256x128xf32>
    %75 = vector.extract_strided_slice %30 {offsets = [32, 0], sizes = [256, 128], strides = [1, 1]} : vector<288x128xf32> to vector<256x128xf32>
    %76 = vector.extract_strided_slice %0 {offsets = [7, 0], sizes = [1, 128], strides = [1, 1]} : vector<9x128xf32> to vector<1x128xf32>
    %77 = vector.broadcast %76 : vector<1x128xf32> to vector<256x128xf32>
    %78 = arith.mulf %75, %77 : vector<256x128xf32>
    %79 = arith.addf %74, %78 : vector<256x128xf32>
    %80 = vector.extract_strided_slice %39 {offsets = [32, 0], sizes = [256, 128], strides = [1, 1]} : vector<288x128xf32> to vector<256x128xf32>
    %81 = vector.extract_strided_slice %0 {offsets = [8, 0], sizes = [1, 128], strides = [1, 1]} : vector<9x128xf32> to vector<1x128xf32>
    %82 = vector.broadcast %81 : vector<1x128xf32> to vector<256x128xf32>
    %83 = arith.mulf %80, %82 : vector<256x128xf32>
    %84 = arith.addf %79, %83 : vector<256x128xf32>
    %85 = vector.broadcast %1 : vector<1x128xf32> to vector<256x128xf32>
    %86 = arith.addf %84, %85 : vector<256x128xf32>
    %cst_17 = arith.constant 0.000000e+00 : f32
    %cst_18 = arith.constant 6.000000e+00 : f32
    %87 = vector.broadcast %cst_17 : f32 to vector<256x128xf32>
    %88 = arith.maximumf %87, %86 : vector<256x128xf32>
    %89 = vector.broadcast %cst_18 : f32 to vector<256x128xf32>
    %90 = arith.minimumf %89, %88 : vector<256x128xf32>
    %91 = arith.truncf %90 : vector<256x128xf32> to vector<256x128xbf16>
    %c0_19 = arith.constant 0 : index
    %c0_20 = arith.constant 0 : index
    %92 = vector.load %arg6[%c0_19, %c0_20] : memref<128x128xbf16, #tpu.memory_space<vmem>>, vector<128x128xbf16>
    %cst_21 = arith.constant dense<0.000000e+00> : vector<256x128xf32>
    %93 = tpu.matmul %91, %92, %cst_21 {dimension_numbers = #tpu.dot_dimension_numbers<[1], [0], [0], [1], [0, 0, 1, 1], [], []>} : vector<256x128xbf16>, vector<128x128xbf16>, vector<256x128xf32> -> vector<256x128xf32>
    %c0_22 = arith.constant 0 : index
    %c0_23 = arith.constant 0 : index
    %94 = vector.load %arg7[%c0_22, %c0_23] : memref<1x128xf32, #tpu.memory_space<vmem>>, vector<1x128xf32>
    %95 = vector.broadcast %94 : vector<1x128xf32> to vector<256x128xf32>
    %96 = arith.addf %93, %95 : vector<256x128xf32>
    %c0_24 = arith.constant 0 : index
    %c0_25 = arith.constant 0 : index
    %97 = vector.load %arg10[%c0_24, %c0_25] : memref<256x128xf32, #tpu.memory_space<vmem>>, vector<256x128xf32>
    tpu.vector_store %arg10[%c0_24, %c0_25], %96 {strides = array<i32>} : memref<256x128xf32, #tpu.memory_space<vmem>>, vector<256x128xf32>,
    %cst_26 = arith.constant dense<0.000000e+00> : vector<128xf32>
    %98 = vector.multi_reduction <add>, %96, %cst_26 [0] : vector<256x128xf32> to vector<128xf32>
    %99 = vector.shape_cast %98 : vector<128xf32> to vector<1x128xf32>
    %100 = arith.addf %9, %99 : vector<1x128xf32>
    %cst_27 = arith.constant 3.906250e-03 : f32
    %101 = vector.broadcast %cst_27 : f32 to vector<1x128xf32>
    %102 = arith.mulf %100, %101 : vector<1x128xf32>
    %c0_28 = arith.constant 0 : index
    %c0_29 = arith.constant 0 : index
    %103 = vector.load %arg8[%c0_28, %c0_29] : memref<128x128xf32, #tpu.memory_space<vmem>>, vector<128x128xf32>
    %cst_30 = arith.constant dense<0.000000e+00> : vector<1x128xf32>
    %104 = tpu.matmul %102, %103, %cst_30 {dimension_numbers = #tpu.dot_dimension_numbers<[1], [0], [0], [1], [0, 0, 1, 1], [], []>} : vector<1x128xf32>, vector<128x128xf32>, vector<1x128xf32> -> vector<1x128xf32>
    %cst_31 = arith.constant 0.000000e+00 : f32
    %105 = vector.broadcast %cst_31 : f32 to vector<1x128xf32>
    %106 = arith.maximumf %104, %105 : vector<1x128xf32>
    %c0_32 = arith.constant 0 : index
    %c0_33 = arith.constant 0 : index
    %107 = vector.load %arg9[%c0_32, %c0_33] : memref<128x128xf32, #tpu.memory_space<vmem>>, vector<128x128xf32>
    %cst_34 = arith.constant dense<0.000000e+00> : vector<1x128xf32>
    %108 = tpu.matmul %106, %107, %cst_34 {dimension_numbers = #tpu.dot_dimension_numbers<[1], [0], [0], [1], [0, 0, 1, 1], [], []>} : vector<1x128xf32>, vector<128x128xf32>, vector<1x128xf32> -> vector<1x128xf32>
    %cst_35 = arith.constant 0.000000e+00 : f32
    %109 = vector.broadcast %cst_35 : f32 to vector<1x128xf32>
    %110 = arith.subf %109, %108 : vector<1x128xf32>
    %111 = math.exp %110 : vector<1x128xf32>
    %cst_36 = arith.constant 1.000000e+00 : f32
    %112 = vector.broadcast %cst_36 : f32 to vector<1x128xf32>
    %113 = arith.addf %112, %111 : vector<1x128xf32>
    %cst_37 = arith.constant 1.000000e+00 : f32
    %114 = vector.broadcast %cst_37 : f32 to vector<1x128xf32>
    %115 = arith.divf %114, %113 : vector<1x128xf32>
    %c16 = arith.constant 16 : index
    %c0_38 = arith.constant 0 : index
    %116 = vector.load %arg1[%c16, %c0_38] : memref<288x128xbf16, #tpu.memory_space<vmem>>, vector<256x128xbf16>
    %117 = arith.extf %116 : vector<256x128xbf16> to vector<256x128xf32>
    %c0_39 = arith.constant 0 : index
    %c0_40 = arith.constant 0 : index
    %118 = vector.load %arg10[%c0_39, %c0_40] : memref<256x128xf32, #tpu.memory_space<vmem>>, vector<256x128xf32>
    %119 = vector.broadcast %115 : vector<1x128xf32> to vector<256x128xf32>
    %120 = arith.mulf %118, %119 : vector<256x128xf32>
    %121 = arith.addf %120, %117 : vector<256x128xf32>
    %c0_41 = arith.constant 0 : index
    %c0_42 = arith.constant 0 : index
    %122 = vector.load %arg10[%c0_41, %c0_42] : memref<256x128xf32, #tpu.memory_space<vmem>>, vector<256x128xf32>
    tpu.vector_store %arg10[%c0_41, %c0_42], %121 {strides = array<i32>} : memref<256x128xf32, #tpu.memory_space<vmem>>, vector<256x128xf32>,
    return
  }
  func.func @transform_0(%arg0: i32) -> (i32, i32) {
    %c0_i32 = arith.constant 0 : i32
    %c0_i32_0 = arith.constant 0 : i32
    return %arg0, %c0_i32 : i32, i32
  }
  func.func @transform_1(%arg0: i32) -> (i32, i32) {
    %c0_i32 = arith.constant 0 : i32
    %c0_i32_0 = arith.constant 0 : i32
    %c0_i32_1 = arith.constant 0 : i32
    return %c0_i32, %c0_i32_0 : i32, i32
  }
  func.func @transform_2(%arg0: i32) -> (i32, i32) {
    %c0_i32 = arith.constant 0 : i32
    %c0_i32_0 = arith.constant 0 : i32
    %c0_i32_1 = arith.constant 0 : i32
    return %c0_i32, %c0_i32_0 : i32, i32
  }
  func.func @transform_3(%arg0: i32) -> (i32, i32) {
    %c0_i32 = arith.constant 0 : i32
    %c0_i32_0 = arith.constant 0 : i32
    %c0_i32_1 = arith.constant 0 : i32
    return %c0_i32, %c0_i32_0 : i32, i32
  }
  func.func @transform_4(%arg0: i32) -> (i32, i32) {
    %c0_i32 = arith.constant 0 : i32
    %c0_i32_0 = arith.constant 0 : i32
    %c0_i32_1 = arith.constant 0 : i32
    return %c0_i32, %c0_i32_0 : i32, i32
  }
  func.func @transform_5(%arg0: i32) -> (i32, i32) {
    %c0_i32 = arith.constant 0 : i32
    %c0_i32_0 = arith.constant 0 : i32
    %c0_i32_1 = arith.constant 0 : i32
    return %c0_i32, %c0_i32_0 : i32, i32
  }
  func.func @transform_6(%arg0: i32) -> (i32, i32) {
    %c0_i32 = arith.constant 0 : i32
    %c0_i32_0 = arith.constant 0 : i32
    %c0_i32_1 = arith.constant 0 : i32
    return %c0_i32, %c0_i32_0 : i32, i32
  }
  func.func @transform_7(%arg0: i32) -> (i32, i32) {
    %c0_i32 = arith.constant 0 : i32
    %c0_i32_0 = arith.constant 0 : i32
    %c0_i32_1 = arith.constant 0 : i32
    return %c0_i32, %c0_i32_0 : i32, i32
  }
  func.func @transform_8(%arg0: i32) -> (i32, i32) {
    %c0_i32 = arith.constant 0 : i32
    %c0_i32_0 = arith.constant 0 : i32
    %c0_i32_1 = arith.constant 0 : i32
    return %c0_i32, %c0_i32_0 : i32, i32
  }
  func.func @transform_9(%arg0: i32) -> (i32, i32) {
    %c0_i32 = arith.constant 0 : i32
    %c0_i32_0 = arith.constant 0 : i32
    return %arg0, %c0_i32 : i32, i32
  }
}

</mosaic_0001>

<bundles_post_ra>
// kernel: tpu_custom_call.1
= control target key start
LH: loop header
LB: loop body
LE: loop exit
PB: predicated region body
PF: predicated region fallthrough
CT: control target
= control target key end

     0   :  { %s6473_s0 = inlined_call_operand.hbm [shape: bf16[576,128], index: 0, kind: input, shape index: {}]   ;;  %s6474_s1 = inlined_call_operand.hbm [shape: bf16[128,128], index: 1, kind: input, shape index: {}]   ;;  %s6475_s2 = inlined_call_operand.vmem [shape: f32[1,128], index: 2, kind: input, shape index: {}]   ;;  %s6476_s3 = inlined_call_operand.hbm [shape: f32[9,128], index: 3, kind: input, shape index: {}]   ;;  %s6477_s4 = inlined_call_operand.vmem [shape: f32[1,128], index: 4, kind: input, shape index: {}]   ;;  %s6478_s5 = inlined_call_operand.hbm [shape: bf16[128,128], index: 5, kind: input, shape index: {}]   ;;  %s6479_s6 = inlined_call_operand.vmem [shape: f32[1,128], index: 6, kind: input, shape index: {}]   ;;  %s6480_s7 = inlined_call_operand.hbm [shape: f32[128,128], index: 7, kind: input, shape index: {}]   ;;  %s6481_s8 = inlined_call_operand.hbm [shape: f32[128,128], index: 8, kind: input, shape index: {}]   ;;  %s6482_s9 = inlined_call_operand.hbm [shape: f32[512,128], index: 9, kind: output, shape index: {}]  }
   0x1   :  { %6590 = sst [smem:[#allocation77_spill]] %s6474_s1 }
   0x2   :  { %6591 = sst [smem:[#allocation78_spill]] %s6478_s5 }
   0x3   :  { %6592 = sst [smem:[#allocation79_spill]] %s6482_s9 }
   0x4   :  { %14 = vsyncpa [#allocation3], 0 }
   0x5   :  { %16 = vsyncpa [#allocation3 + $0x1], 0 }
   0x6   :  { %17 = vsyncpa [#allocation6], 0 }
   0x7   :  { %18 = vsyncpa [#allocation9], 0 }
   0x8   :  { %19 = vsyncpa [#allocation12], 0 }
   0x9   :  { %20 = vsyncpa [#allocation4], 0 }
   0xa   :  { %22 = vsyncpa [#allocation4 + $0x1], 0  ;;  %s4036_s30 = smov 0   ;;  %s4038_s10 = smov 0  }
   0xb   :  { %s4040_s11 = smov 0   ;;  %s4042_s12 = smov 0  }
   0xc LB: > { %s3970_s13 = smov [#allocation5]   ;;  %s4057_s15 = sadd.s32 4294967295, %s3968_s12   ;;  %s3968_s12 = sphi %s4042_s12, %s6949_s12   ;;  %s3964_s11 = sphi %s4040_s11, %s6948_s11   ;;  %s3960_s10 = sphi %s4038_s10, %s6947_s10   ;;  %s3956_s30 = sphi %s4036_s30, %s6946_s30  }
   0xd   : > { %s265_s14 = sshll.u32 %s3970_s13, 4  ;;  %p3129_p0 = scmp.ge.s32.totalorder %s3968_s12, 1  ;;  %s4062_s14 = int_to_ptr.vmem [resolvable:$true] %s265_s14 }
   0xe   : > { %p6486_p1 = scmp.eq.s32.totalorder %s4057_s15, 0  ;;  %p253_p2 = scmp.lt.s32.totalorder %s3968_s12, 3 }
   0xf   : > { %s3971_s17 = smov [#allocation8]   ;;  %s3972_s20 = smov [#allocation7]  }
  0x10   : > { %p4064_p3 = pnand %p3129_p0, %p253_p2  ;;  %s297_s18 = sshll.u32 %s3971_s17, 4  ;;  %s4077_s18 = int_to_ptr.vmem [resolvable:$true] %s297_s18 }
  0x11   : > { %s281_s21 = sshll.u32 %s3972_s20, 4  ;;  %s6595_s1 = sld [smem:[#allocation77_spill]]  ;;  %s4079_s21 = int_to_ptr.vmem [resolvable:$true] %s281_s21 }
  0x12   : > { %s6593_s16 = scalar_select %p4064_p3, 1, 0 }
  0x13   : > { %p3597_p5 = pneg %p4064_p3 }
  0x15   : > { %p4073_p6 = pnand %p3597_p5, %p6486_p1 }
  0x17   : > { %s3720_s24 = scalar_lea.hbm %s6595_s1, 1024  ;;  %p4089_p8 = pneg %p4073_p6 }
  0x18   : > { %p3721_p7 = scmp.ne.s32.totalorder %s6595_s1, %s3720_s24  ;;  %p3727_p11 = scmp.lt.u32.totalorder %s3720_s24, %s6595_s1 }
  0x1a   : > { %p3723_p9 = pnand %p4089_p8, %p3721_p7 }
  0x1c   : > { %p3724_p10 = pneg %p3723_p9 }
  0x1e   : > { %p3729_p12 = pnand %p3727_p11, %p3724_p10 }
  0x20   : > { %3732 = shalt.err (!%p3729_p12)
}
  0x21   : > { %s3733_s13 = scalar_lea.vmem %s4062_s14, 1024  ;;  %p3741_p5 = scmp.lt.s32.totalorder %s4062_s14, %s4062_s14 }
  0x22   : > { %p3734_p13 = scmp.ne.s32.totalorder %s4062_s14, %s3733_s13  ;;  %p3742_p4 = scmp.lt.s32.totalorder %s3733_s13, %s3733_s13 }
  0x24   : > { %p3736_p0 = pnand %p3734_p13, %p4089_p8  ;;  %p3743_p7 = por %p3742_p4, %p3741_p5 }
  0x26   : > { %p3737_p2 = pneg %p3736_p0 }
  0x28   : > { %p3744_p9 = pnand %p3743_p7, %p3737_p2 }
  0x2a   : > { %3747 = shalt.err (!%p3744_p9)
}
  0x2b   : > { %s6484_s17 = smov 64   ;;  %s6485_s20 = smov 4  }
  0x2c   : > { %3600 = dma.hbm_to_vmem [thread:$0]  (!%p4073_p6), %s6595_s1, 1024, %s4062_s14, [#allocation6], %s6484_s17, %s6484_s17, %s6485_s20  }
  0x2d   : > { %s6597_s5 = sld [smem:[#allocation78_spill]] }
  0x33   : > { %s3748_s26 = scalar_lea.hbm %s6597_s5, 1024 }
  0x34   : > { %p3749_p4 = scmp.ne.s32.totalorder %s6597_s5, %s3748_s26  ;;  %p3755_p12 = scmp.lt.u32.totalorder %s3748_s26, %s6597_s5 }
  0x36   : > { %p3751_p10 = pnand %p3749_p4, %p4089_p8 }
  0x38   : > { %p3752_p11 = pneg %p3751_p10 }
  0x3a   : > { %p3757_p13 = pnand %p3755_p12, %p3752_p11 }
  0x3c   : > { %3760 = shalt.err (!%p3757_p13)
}
  0x3d   : > { %s3761_s14 = scalar_lea.vmem %s4077_s18, 1024  ;;  %p3769_p7 = scmp.lt.s32.totalorder %s4077_s18, %s4077_s18 }
  0x3e   : > { %p3762_p0 = scmp.ne.s32.totalorder %s4077_s18, %s3761_s14  ;;  %p3770_p9 = scmp.lt.s32.totalorder %s3761_s14, %s3761_s14 }
  0x40   : > { %p3764_p2 = pnand %p3762_p0, %p4089_p8  ;;  %p3771_p4 = por %p3770_p9, %p3769_p7 }
  0x42   : > { %p3765_p5 = pneg %p3764_p2 }
  0x44   : > { %p3772_p10 = pnand %p3771_p4, %p3765_p5 }
  0x46   : > { %3775 = shalt.err (!%p3772_p10)
}
  0x47   : > { %3606 = dma.hbm_to_vmem [thread:$0]  (!%p4073_p6), %s6597_s5, 1024, %s4077_s18, [#allocation9], %s6484_s17, %s6484_s17, %s6485_s20  }
  0x48   : > { %s3776_s25 = scalar_lea.hbm %s6476_s3, 256 }
  0x49   : > { %p3777_p11 = scmp.ne.s32.totalorder %s6476_s3, %s3776_s25  ;;  %p3783_p0 = scmp.lt.u32.totalorder %s3776_s25, %s6476_s3 }
  0x4b   : > { %p3779_p12 = pnand %p3777_p11, %p4089_p8 }
  0x4d   : > { %p3780_p13 = pneg %p3779_p12 }
  0x4f   : > { %p3785_p2 = pnand %p3783_p0, %p3780_p13 }
  0x51   : > { %3788 = shalt.err (!%p3785_p2)
}
  0x52   : > { %s3789_s18 = scalar_lea.vmem %s4079_s21, 256  ;;  %p3797_p4 = scmp.lt.s32.totalorder %s4079_s21, %s4079_s21 }
  0x53   : > { %p3790_p5 = scmp.ne.s32.totalorder %s4079_s21, %s3789_s18  ;;  %p3798_p10 = scmp.lt.s32.totalorder %s3789_s18, %s3789_s18 }
  0x55   : > { %p3792_p7 = pnand %p3790_p5, %p4089_p8  ;;  %p3799_p11 = por %p3798_p10, %p3797_p4 }
  0x57   : > { %p3793_p9 = pneg %p3792_p7 }
  0x59   : > { %p3800_p12 = pnand %p3799_p11, %p3793_p9 }
  0x5b   : > { %3803 = shalt.err (!%p3800_p12)
}
  0x5c   : > { %s3975_s14 = smov 128   ;;  %s3976_s9 = smov 8  }
  0x5d   : > { %3603 = dma.hbm_to_vmem [thread:$0]  (!%p4073_p6), %s6476_s3, 256, %s4079_s21, [#allocation6], %s3975_s14, %s3975_s14, %s3976_s9  }
  0x5e   : > { %s3977_s24 = smov [#allocation10]   ;;  %s3978_s26 = smov [#allocation11]  }
  0x5f   : > { %s313_s25 = sshll.u32 %s3977_s24, 4  ;;  %s326_s28 = sshll.u32 %s3978_s26, 4  ;;  %s314_s25 = int_to_ptr.vmem [resolvable:$true] %s313_s25  ;;  %s327_s28 = int_to_ptr.vmem [resolvable:$true] %s326_s28 }
  0x60   : > { %s3804_s18 = scalar_lea.hbm %s6480_s7, 2048 }
  0x61   : > { %p3805_p13 = scmp.ne.s32.totalorder %s6480_s7, %s3804_s18  ;;  %p3811_p5 = scmp.lt.u32.totalorder %s3804_s18, %s6480_s7 }
  0x63   : > { %p3807_p0 = pnand %p3805_p13, %p4089_p8 }
  0x65   : > { %p3808_p2 = pneg %p3807_p0 }
  0x67   : > { %p3813_p7 = pnand %p3811_p5, %p3808_p2 }
  0x69   : > { %3816 = shalt.err (!%p3813_p7)
}
  0x6a   : > { %s3817_s21 = scalar_lea.vmem %s314_s25, 2048  ;;  %p3825_p11 = scmp.lt.s32.totalorder %s314_s25, %s314_s25 }
  0x6b   : > { %p3818_p9 = scmp.ne.s32.totalorder %s314_s25, %s3817_s21  ;;  %p3826_p12 = scmp.lt.s32.totalorder %s3817_s21, %s3817_s21 }
  0x6d   : > { %p3820_p4 = pnand %p3818_p9, %p4089_p8  ;;  %p3827_p1 = por %p3826_p12, %p3825_p11 }
  0x6f   : > { %p3821_p10 = pneg %p3820_p4 }
  0x71   : > { %p3828_p3 = pnand %p3827_p1, %p3821_p10 }
  0x73   : > { %3831 = shalt.err (!%p3828_p3)
}
  0x74   : > { %3609 = dma.hbm_to_vmem [thread:$0]  (!%p4073_p6), %s6480_s7, 2048, %s314_s25, [#allocation9], %s3975_s14, %s3975_s14, %s3976_s9  }
  0x75   : > { %s3832_s22 = scalar_lea.hbm %s6481_s8, 2048 }
  0x76   : > { %p3833_p1 = scmp.ne.s32.totalorder %s6481_s8, %s3832_s22  ;;  %p3839_p0 = scmp.lt.u32.totalorder %s3832_s22, %s6481_s8 }
  0x78   : > { %p3835_p3 = pnand %p3833_p1, %p4089_p8 }
  0x7a   : > { %p3836_p13 = pneg %p3835_p3 }
  0x7c   : > { %p3841_p2 = pnand %p3839_p0, %p3836_p13 }
  0x7e   : > { %3844 = shalt.err (!%p3841_p2)
}
  0x7f   : > { %s3845_s13 = scalar_lea.vmem %s327_s28, 2048  ;;  %p3853_p4 = scmp.lt.s32.totalorder %s327_s28, %s327_s28 }
  0x80   : > { %p3846_p5 = scmp.ne.s32.totalorder %s327_s28, %s3845_s13  ;;  %p3854_p10 = scmp.lt.s32.totalorder %s3845_s13, %s3845_s13 }
  0x82   : > { %p3848_p7 = pnand %p3846_p5, %p4089_p8  ;;  %p3855_p11 = por %p3854_p10, %p3853_p4 }
  0x84   : > { %p3849_p9 = pneg %p3848_p7 }
  0x86   : > { %p3856_p12 = pnand %p3855_p11, %p3849_p9 }
  0x88   : > { %3859 = shalt.err (!%p3856_p12)
}
  0x89   : > { %3612 = dma.hbm_to_vmem [thread:$0]  (!%p4073_p6), %s6481_s8, 2048, %s327_s28, [#allocation12], %s3975_s14, %s3975_s14, %s3976_s9  }
  0x8a   : > { %s3128_s19 = sadd.s32 4294967294, %s3968_s12   ;;  %s4209_s27 = sadd.s32 1, %s3968_s12  }
  0x8b   : > { %s35_s21 = sadd.s32 1, %s3964_s11  ;;  %s32_s1 = ssub.s32 %s3968_s12, %s4209_s27 }
  0x8c   : > { %p42_p8 = scmp.ne.s32.totalorder %s3964_s11, %s3960_s10  ;;  %p33_p1 = scmp.eq.s32.totalorder %s32_s1, 0 }
  0x8d   : > { %p43_p3 = scmp.eq.s32.totalorder %s3968_s12, 0  ;;  %p48_p13 = scmp.ne.s32.totalorder %s3960_s10, %s3956_s30 }
  0x8e   : > { %p240_p0 = scmp.eq.s32.totalorder %s4057_s15, 1  ;;  %p6598_p5 = scmp.eq.s32.totalorder %s4057_s15, 0 }
  0x8f   : > { %s4221_s5 = scalar_select %p33_p1, %s3964_s11, %s35_s21  }
  0x90   : > { %p44_p2 = por %p43_p3, %p42_p8  ;;  %p4225_p7 = por %p6598_p5, %p48_p13 }
  0x91   : > { %p4229_p6 = por %p240_p0, %p42_p8  ;;  %p246_p9 = scmp.eq.s32.totalorder %s3128_s19, 1 }
  0x92   : > { %p3626_p4 = scmp.lt.s32.totalorder %s3968_s12, 2  ;;  %s340_s9 = sand.u32 1, %s3964_s11  }
  0x93   : > { %s6600_s14 = scalar_select %p4229_p6, 1, 0 }
  0x94   : > { %p4235_p10 = por %p246_p9, %p48_p13  ;;  %s3571_s20 = smul.u32 144, %s340_s9 }
  0x95   : > { %p4239_p11 = pnand %p3626_p4, %p44_p2  ;;  %s3187_s23 = smul.u32 2304, %s3968_s12 }
  0x96   : > { %s6601_s28 = scalar_select %p4235_p10, 1, 0 }
  0x97   : > { %s4247_s29 = scalar_lea.hbm %s6473_s0, %s3187_s23  ;;  %s344_s13 = scalar_lea.vmem [#allocation2], %s3571_s20 }
  0x98   : > { %s351_s25 = sshll.u32 %s344_s13, 4  ;;  %s4251_s18 = scalar_lea.sflag [#allocation3], %s340_s9  ;;  %s4249_s25 = int_to_ptr.vmem [resolvable:$true] %s351_s25 }
  0x99   : > { %s3860_s19 = scalar_lea.hbm %s4247_s29, 2304  ;;  %p3862_p8 = pneg %p4239_p11 }
  0x9a   : > { %p3861_p12 = scmp.ne.s32.totalorder %s4247_s29, %s3860_s19  ;;  %s3865_s23 = scalar_lea.hbm %s6473_s0, 4608 }
  0x9b   : > { %p3866_p13 = scmp.lt.u32.totalorder %s4247_s29, %s6473_s0  ;;  %p3867_p0 = scmp.lt.u32.totalorder %s3865_s23, %s3860_s19 }
  0x9c   : > { %p3863_p1 = pnand %p3862_p8, %p3861_p12  ;;  %p3869_p5 = scmp.lt.u32.totalorder %s3860_s19, %s4247_s29 }
  0x9d   : > { %p3868_p2 = por %p3867_p0, %p3866_p13 }
  0x9e   : > { %p3864_p3 = pneg %p3863_p1 }
  0x9f   : > { %p3870_p9 = por %p3869_p5, %p3868_p2 }
  0xa1   : > { %p3871_p4 = pnand %p3870_p9, %p3864_p3 }
  0xa3   : > { %3874 = shalt.err (!%p3871_p4)
}
  0xa4   : > { %s3875_s9 = scalar_lea.vmem %s4249_s25, 2304  ;;  %s3979_s20 = smov [#allocation2]  }
  0xa5   : > { %p3876_p12 = scmp.ne.s32.totalorder %s4249_s25, %s3875_s9  ;;  %s3880_s13 = sshll.u32 %s3979_s20, 4  ;;  %s3881_s13 = int_to_ptr.vmem [resolvable:$false] %s3880_s13 }
  0xa6   : > { %s3882_s21 = scalar_lea.vmem %s3881_s13, 4608  ;;  %p3883_p6 = scmp.lt.s32.totalorder %s4249_s25, %s3881_s13 }
  0xa7   : > { %p3878_p1 = pnand %p3876_p12, %p3862_p8  ;;  %p3884_p13 = scmp.lt.s32.totalorder %s3882_s21, %s3875_s9 }
  0xa9   : > { %p3879_p10 = pneg %p3878_p1  ;;  %p3885_p0 = por %p3884_p13, %p3883_p6 }
  0xab   : > { %p3886_p2 = pnand %p3885_p0, %p3879_p10 }
  0xad   : > { %3889 = shalt.err (!%p3886_p2)
}
  0xae   : > { %s6603_s19 = smov 4   ;;  %s6604_s1 = smov 64  }
  0xaf   : > { %3616 = dma.hbm_to_vmem [thread:$0]  (!%p4239_p11), %s4247_s29, 2304, %s4249_s25, %s4251_s18, %s6604_s1, %s6604_s1, %s6603_s19  }
  0xb0   : > { %p6605_p8 = scmp.ne.s32.totalorder %s6593_s16, 0 }
  0xb2   : > { %363 = sbr.rel (%p6605_p8) target bundleno = 1442 (0x5a2), region = 56 }
  0xb9   : > { %s4285_s23 = sand.u32 1, %s3960_s10  }
  0xba   : > { %s3572_s24 = smul.u32 144, %s4285_s23  ;;  %s366_s26 = scalar_lea.sflag [#allocation3], %s4285_s23 }
  0xbc   : > { %s4289_s9 = scalar_lea.vmem [#allocation2], %s3572_s24 }
  0xbd   : > { %3935 = dma.done.wait (%p4225_p7), %s366_s26, 2304  }
  0xbe   : > { %3937 = vsyncadd (%p4225_p7), %s366_s26, 4294964992  ;;  %p6606_p6 = scmp.eq.s32.totalorder %s4057_s15, 0 }
  0xc0   : > { %3939 = dma.done.wait (%p6606_p6), [#allocation6], 1280   ;;  %p6607_p10 = pmov %p6606_p6 }
  0xc1   : > { %p6608_p11 = pmov %p6606_p6 }
  0xc2   : > { %3941 = vsyncadd (%p6607_p10), [#allocation6], 4294966016 }
  0xc3   : > { %3943 = dma.done.wait (%p6608_p11), [#allocation9], 3072   ;;  %p6609_p3 = pmov %p6606_p6 }
  0xc5   : > { %3945 = vsyncadd (%p6609_p3), [#allocation9], 4294964224  ;;  %p6610_p5 = pmov %p6609_p3 }
  0xc6   : > { %p6611_p9 = pmov %p6609_p3 }
  0xc7   : > { %3947 = dma.done.wait (%p6610_p5), [#allocation12], 2048  }
  0xc8   : > { %3949 = vsyncadd (%p6611_p9), [#allocation12], 4294965248  ;;  %v3679_v0 = vld [vmem:[#allocation5] sm:$0xff]   ;;  %v3680_v1 = vld [vmem:[#allocation5 + $0x8] sm:$0xff]   ;;  %v430_v34 = vlaneseq  ;;  %v6490_v42 = vmov 0.0   ;;  %s3143_s1 = sshll.u32 %s4285_s23, 8 }
  0xc9   : > { %3353 = vmatprep.subr.bf16.mxu0 %v3679_v0  ;;  %v3681_v2 = vld [vmem:[#allocation5 + $0x10] sm:$0xff]   ;;  %v3682_v3 = vld [vmem:[#allocation5 + $0x18] sm:$0xff]   ;;  %v3683_v5 = vld [vmem:[#allocation5 + $0x20] sm:$0xff]   ;;  %v4335_v43 = vrot.slane %v6490_v42, 7  ;;  %v4353_v51 = vrot.slane %v6490_v42, 1  ;;  %s6348_s24 = scalar_lea.vmem [#allocation13], %s3143_s1 }
  0xca   : > { %3354 = vmatpush3.bf16.msra.mxu0 %v3679_v0  ;;  %v3687_v4 = vld [vmem:[%s4289_s9] sm:$0xff]   ;;  %v3684_v6 = vld [vmem:[#allocation5 + $0x28] sm:$0xff]   ;;  %v3686_v8 = vld [vmem:[#allocation5 + $0x38] sm:$0xff]   ;;  %v4325_v35 = vshrl.u32 %v430_v34, 7  ;;  %s3188_s26 = sshll.u32 %s4057_s15, 12  ;;  %s6939_s17 = sld [smem:[#allocation79_spill]] }
  0xcb   : > { %3355 = vmatprep.subr.bf16.mxu0 %v3680_v1  ;;  %3369 = vmatprep.mubr.bf16.mxu0 %v3687_v4  ;;  %v3685_v7 = vld [vmem:[#allocation5 + $0x30] sm:$0xff]   ;;  %v3688_v9 = vld [vmem:[%s4289_s9 + $0x8] sm:$0xff]   ;;  %v3690_v11 = vld [vmem:[%s4289_s9 + $0x18] sm:$0xff]   ;;  %6612 = vst [vmem:[#allocation19_spill] sm:$0xff] %v4335_v43  ;;  %s2994_s29 = scalar_lea.sflag [#allocation4], %s4285_s23  ;;  %p6943_p4 = scmp.ne.s32.totalorder %s6600_s14, 0 }
  0xcc   : > { %v3689_v10 = vld [vmem:[%s4289_s9 + $0x10] sm:$0xff]   ;;  %v3691_v12 = vld [vmem:[%s4289_s9 + $0x20] sm:$0xff]   ;;  %v3692_v13 = vld [vmem:[%s4289_s9 + $0x28] sm:$0xff]   ;;  %v6489_v36 = vsub.s32 0, %v4325_v35  ;;  %v1723_v38 = vsub.s32 1, %v4325_v35  ;;  %v433_v39 = vadd.s32 16, %v4325_v35 }
  0xcd   : > { %v3693_v14 = vld [vmem:[%s4289_s9 + $0x30] sm:$0xff]   ;;  %v3694_v15 = vld [vmem:[%s4289_s9 + $0x38] sm:$0xff]   ;;  %v3695_v16 = vld [vmem:[%s4289_s9 + $0x40] sm:$0xff]   ;;  %v1619_v40 = vsub.s32 4, %v4325_v35  ;;  %v434_v41 = vadd.s32 24, %v4325_v35  ;;  %v1791_v45 = vsub.s32 2, %v4325_v35 }
  0xce   : > { %3356 = vmatpush3.bf16.msra.mxu0 %v3680_v1  ;;  %v3696_v17 = vld [vmem:[%s4289_s9 + $0x48] sm:$0xff]   ;;  %v3697_v18 = vld [vmem:[%s4289_s9 + $0x50] sm:$0xff]   ;;  %v3698_v19 = vld [vmem:[%s4289_s9 + $0x58] sm:$0xff]   ;;  %v4347_v47 = vadd.s32 56, %v4325_v35  ;;  %v469_v48 = vand.u32 15, %v433_v39  ;;  %6613 = vst [vmem:[#allocation20_spill] sm:$0xff] %v4353_v51 }
  0xcf   : > { %3357 = vmatprep.subr.bf16.mxu0 %v3681_v2  ;;  %v3699_v20 = vld [vmem:[%s4289_s9 + $0x60] sm:$0xff]   ;;  %v3700_v21 = vld [vmem:[%s4289_s9 + $0x68] sm:$0xff]   ;;  %v3701_v22 = vld [vmem:[%s4289_s9 + $0x70] sm:$0xff]   ;;  %v470_v50 = vand.u32 15, %v434_v41  ;;  %v4363_v54 = vadd.s32 40, %v4325_v35  ;;  %v4369_v56 = vadd.s32 80, %v4325_v35 }
  0xd0   : > { %v3702_v23 = vld [vmem:[%s4289_s9 + $0x78] sm:$0xff]   ;;  %v3703_v24 = vld [vmem:[%s4289_s9 + $0x80] sm:$0xff]   ;;  %v3704_v25 = vld [vmem:[%s4289_s9 + $0x88] sm:$0xff]   ;;  %v4372_v57 = vadd.s32 64, %v4325_v35  ;;  %v4375_v58 = vadd.s32 88, %v4325_v35  ;;  %v474_v59 = vand.u32 15, %v4347_v47  ;;  %s6407_s22 = scalar_lea.hbm %s6939_s17, %s3188_s26 }
  0xd1   : > { %v3705_v26 = vld [vmem:[#allocation8] sm:$0xff]   ;;  %v3706_v27 = vld [vmem:[#allocation8 + $0x8] sm:$0xff]   ;;  %v3707_v28 = vld [vmem:[#allocation8 + $0x10] sm:$0xff]   ;;  %v4379_v60 = vadd.s32 72, %v4325_v35  ;;  %v4382_v61 = vadd.s32 32, %v4325_v35  ;;  %v437_v62 = vadd.s32 48, %v4325_v35 }
  0xd2   : > { %3358 = vmatpush3.bf16.msra.mxu0 %v3681_v2  ;;  %3405 = vmatprep.subr.bf16.mxu1 %v3705_v26  ;;  %v3708_v29 = vld [vmem:[#allocation8 + $0x18] sm:$0xff]   ;;  %v3709_v30 = vld [vmem:[#allocation8 + $0x20] sm:$0xff]   ;;  %v3710_v31 = vld [vmem:[#allocation8 + $0x28] sm:$0xff]   ;;  %v4386_v63 = vadd.s32 112, %v4325_v35  ;;  %v4389_v0 = vadd.s32 96, %v4325_v35  ;;  %v4392_v1 = vadd.s32 120, %v4325_v35 }
  0xd3   : > { %3359 = vmatprep.subr.bf16.mxu0 %v3682_v3  ;;  %3406 = vmatpush3.bf16.msra.mxu1 %v3705_v26  ;;  %v3711_v32 = vld [vmem:[#allocation8 + $0x30] sm:$0xff]   ;;  %v3712_v33 = vld [vmem:[#allocation8 + $0x38] sm:$0xff]   ;;  %v4395_v2 = vadd.s32 104, %v4325_v35  ;;  %v4399_v4 = vadd.s32 144, %v4325_v35  ;;  %vm4407_vm0 = vcmp.ne.s32.totalorder %v469_v48, 0  ;;  %vm1580_vm1 = vcmp.lt.s32.totalorder %v4325_v35, 1 }
  0xd4   : > { %3407 = vmatprep.subr.bf16.mxu1 %v3706_v27  ;;  %v4328_v37 = vld [vmem:[#allocation7] sm:$0xff]  ;;  %vm1507_vm2 = vcmp.lt.s32.totalorder %v4325_v35, 7  ;;  %vm4431_vm3 = vcmp.ne.s32.totalorder %v470_v50, 15  ;;  %v4451_v34 = vadd.s32 176, %v4325_v35  ;;  %v4460_v41 = vadd.s32 168, %v4325_v35  ;;  %s3983_s18 = smov [#allocation13]  }
  0xd5   : > { %v4340_v44 = vrot.slane %v4328_v37, %v6489_v36  ;;  %v4344_v46 = vrot.slane %v4328_v37, %v1723_v38  ;;  %v4350_v49 = vrot.slane %v4328_v37, %v1619_v40  ;;  %v4366_v55 = vrot.slane %v4328_v37, %v1791_v45  ;;  %s3894_s20 = sshll.u32 %s3983_s18, 4  ;;  %s3895_s20 = int_to_ptr.vmem [resolvable:$false] %s3894_s20 }
  0xd6   : > { %3360 = vmatpush3.bf16.msra.mxu0 %v3682_v3  ;;  %v472_v3 = vand.u32 15, %v4363_v54  ;;  %6618 = vst [vmem:[#allocation21_spill] sm:$0xff] %v4451_v34  ;;  %v4454_v38 = vadd.s32 160, %v4325_v35  ;;  %v4457_v40 = vadd.s32 184, %v4325_v35  ;;  %6621 = vst [vmem:[#allocation24_spill] sm:$0xff] %v4460_v41  ;;  %v4463_v45 = vadd.s32 208, %v4325_v35 }
  0xd7   : > { %3361 = vmatprep.subr.bf16.mxu0 %v3683_v5  ;;  %3408 = vmatpush3.bf16.msra.mxu1 %v3706_v27  ;;  %v4357_v52 = vmul.f32 %v4340_v44, %v4335_v43  ;;  %v4360_v53 = vmul.f32 0.0, %v4344_v46  ;;  %v4466_v48 = vadd.s32 192, %v4325_v35  ;;  %v4482_v27 = vadd.s32 200, %v4325_v35  ;;  %s3896_s13 = scalar_lea.vmem %s3895_s20, 8192 }
  0xd8   : > { %3409 = vmatprep.subr.bf16.mxu1 %v3707_v28  ;;  %6619 = vst [vmem:[#allocation22_spill] sm:$0xff] %v4454_v38  ;;  %6620 = vst [vmem:[#allocation23_spill] sm:$0xff] %v4457_v40  ;;  %vm4505_vm5 = vcmp.ne.s32.totalorder %v474_v59, 15  ;;  %vm4521_vm6 = vcmp.ne.s32.totalorder %v472_v3, 15  ;;  %v6658_v38 = vand.u32 15, %v4389_v0 }
  0xd9   : > { %6622 = vst [vmem:[#allocation25_spill] sm:$0xff] %v4463_v45  ;;  %6623 = vst [vmem:[#allocation26_spill] sm:$0xff] %v4466_v48 }
  0xda   : > { %3362 = vmatpush3.bf16.msra.mxu0 %v3683_v5  ;;  %v4402_v5 = vadd.s32 128, %v4325_v35  ;;  %6628 = vst [vmem:[#allocation31_spill] sm:$0xff] %v4482_v27  ;;  %vm4696_vm12 = vcmp.ne.s32.totalorder %v6658_v38, 0 }
  0xdb   : > { %3363 = vmatprep.subr.bf16.mxu0 %v3684_v6  ;;  %3410 = vmatpush3.bf16.msra.mxu1 %v3707_v28  ;;  %v4442_v28 = vmul.f32 %v4366_v55, %v4353_v51 }
  0xdc   : > { %3411 = vmatprep.subr.bf16.mxu1 %v3708_v29 }
  0xde   : > { %3364 = vmatpush3.bf16.msra.mxu0 %v3684_v6  ;;  %v4405_v6 = vadd.s32 152, %v4325_v35 }
  0xdf   : > { %3365 = vmatprep.subr.bf16.mxu0 %v3685_v7  ;;  %3412 = vmatpush3.bf16.msra.mxu1 %v3708_v29  ;;  %v1995_v29 = vsub.s32 6, %v4325_v35 }
  0xe0   : > { %3413 = vmatprep.subr.bf16.mxu1 %v3709_v30 }
  0xe1   : > { %v4476_v36 = vrot.slane %v4328_v37, %v1995_v29 }
  0xe2   : > { %3366 = vmatpush3.bf16.msra.mxu0 %v3685_v7 }
  0xe3   : > { %3367 = vmatprep.subr.bf16.mxu0 %v3686_v8  ;;  %3414 = vmatpush3.bf16.msra.mxu1 %v3709_v30  ;;  %v2063_v30 = vsub.s32 7, %v4325_v35  ;;  %6626 = vst [vmem:[#allocation29_spill] sm:$0xff] %v4476_v36 }
  0xe4   : > { %3415 = vmatprep.subr.bf16.mxu1 %v3710_v31 }
  0xe5   : > { %v4479_v42 = vrot.slane %v4328_v37, %v2063_v30 }
  0xe6   : > { %3368 = vmatpush3.bf16.msra.mxu0 %v3686_v8 }
  0xe7   : > { %3416 = vmatpush3.bf16.msra.mxu1 %v3710_v31  ;;  %6627 = vst [vmem:[#allocation30_spill] sm:$0xff] %v4479_v42 }
  0xe8   : > { %3417 = vmatprep.subr.bf16.mxu1 %v3711_v32 }
  0xe9   : > { %3370 = vmatmul.mubr.bf16.vlgmr.msra.gmra.mrb[0].mxu0 %v3688_v9 }
  0xea   : > { %3373 = vmatprep.mubr.bf16.mxu0 %v3689_v10 }
  0xeb   : > { %3418 = vmatpush3.bf16.msra.mxu1 %v3711_v32 }
  0xec   : > { %3419 = vmatprep.subr.bf16.mxu1 %v3712_v33 }
  0xef   : > { %3420 = vmatpush3.bf16.msra.mxu1 %v3712_v33 }
  0xf1   : > { %3374 = vmatmul.mubr.bf16.gmra.mrb[4].mxu0 %v3690_v11  ;;  %v4415_v11 = vadd.s32 136, %v4325_v35 }
  0xf2   : > { %3377 = vmatprep.mubr.bf16.mxu0 %v3691_v12 }
  0xf9   : > { %3378 = vmatmul.mubr.bf16.gmra.mrb[8].mxu0 %v3692_v13 }
  0xfa   : > { %3381 = vmatprep.mubr.bf16.mxu0 %v3693_v14  ;;  %v473_v14 = vand.u32 15, %v437_v62 }
  0xfc   : > { %vm4489_vm4 = vcmp.ne.s32.totalorder %v473_v14, 0 }
 0x101   : > { %3382 = vmatmul.mubr.bf16.gmra.mrb[12].mxu0 %v3694_v15  ;;  %v1859_v15 = vsub.s32 3, %v4325_v35 }
 0x102   : > { %3385 = vmatprep.mubr.bf16.mxu0 %v3695_v16  ;;  %v4423_v16 = vld [vmem:[%s6475_s2] ss:$0 sm:$0xff] }
 0x103   : > { %v4448_v33 = vrot.slane %v4328_v37, %v1859_v15 }
 0x109   : > { %3386 = vmatmul.mubr.bf16.gmra.mrb[16].mxu0 %v3696_v17 }
 0x10a   : > { %3389 = vmatprep.mubr.bf16.mxu0 %v3697_v18 }
 0x111   : > { %3390 = vmatmul.mubr.bf16.gmra.mrb[20].mxu0 %v3698_v19 }
 0x112   : > { %3393 = vmatprep.mubr.bf16.mxu0 %v3699_v20 }
 0x119   : > { %3394 = vmatmul.mubr.bf16.gmra.mrb[24].mxu0 %v3700_v21 }
 0x11a   : > { %3397 = vmatprep.mubr.bf16.mxu0 %v3701_v22 }
 0x121   : > { %3398 = vmatmul.mubr.bf16.gmra.mrb[28].mxu0 %v3702_v23 }
 0x122   : > { %3401 = vmatprep.mubr.bf16.mxu0 %v3703_v24 }
 0x129   : > { %3402 = vmatmul.mubr.bf16.gmra.mrb[32].mxu0 %v3704_v25  ;;  %v1927_v25 = vsub.s32 5, %v4325_v35 }
 0x1bc   : > { %v3371_v26 = vpop.f32.mrb[0].mxu0 }
 0x1bd   : > { %v833_v31 = vadd.f32 %v3371_v26, %v4423_v16  ;;  %v824_v32 = vpop.f32.mrb[1].mxu0  ;;  %v4470_v26 = vrot.slane %v4328_v37, %v1927_v25 }
 0x1be   : > { %v3372_v39 = vpop.f32.mrb[2].mxu0  ;;  %v4473_v32 = vadd.s32 216, %v4325_v35 }
 0x1bf   : > { %v969_v50 = vmax.f32 %v833_v31, 0.0  ;;  %v836_v62 = vadd.f32 %v3372_v39, %v4423_v16  ;;  %v827_v15 = vpop.f32.mrb[3].mxu0  ;;  %6624 = vst [vmem:[#allocation27_spill] sm:$0xff] %v4470_v26  ;;  %v4485_v31 = vadd.s32 240, %v4325_v35 }
 0x1c0   : > { %6625 = vst [vmem:[#allocation28_spill] sm:$0xff] %v4473_v32 }
 0x1c1   : > { %6629 = vst [vmem:[#allocation32_spill] sm:$0xff] %v4485_v31  ;;  %v1005_v39 = vmin.f32 %v969_v50, 6.0  ;;  %v970_v15 = vmax.f32 %v836_v62, 0.0 }
 0x1c3   : > { %v1329_v50 = vsel %vm4407_vm0, %v1005_v39, 0.0  ;;  %v1546_v62 = vrot.slane %v1005_v39, 7  ;;  %v1621_v25 = vmul.f32 %v4350_v49, %v1005_v39  ;;  %v4501_v22 = vmin.f32 %v970_v15, 6.0 }
 0x1c4   : > { %v1473_v14 = vrot.slane %v1329_v50, 1  ;;  %v3375_v20 = vpop.f32.mrb[4].mxu0  ;;  %v1727_v15 = vmul.f32 %v4344_v46, %v1005_v39 }
 0x1c5   : > { %v4514_v30 = vsel %vm1580_vm1, %v4335_v43, %v1546_v62  ;;  %v1689_v50 = vadd.f32 %v4357_v52, %v1621_v25  ;;  %v849_v24 = vadd.f32 %v3375_v20, %v4423_v16  ;;  %v840_v47 = vpop.f32.mrb[5].mxu0  ;;  %v1438_v39 = vsel %vm4431_vm3, %v4501_v22, 0.0 }
 0x1c6   : > { %v1541_v7 = vsel %vm1507_vm2, %v4353_v51, %v1473_v14  ;;  %v1659_v13 = vmul.f32 %v4340_v44, %v4514_v30  ;;  %v6494_v20 = vrot.slane %v4501_v22, 1  ;;  %v3376_v25 = vpop.f32.mrb[6].mxu0  ;;  %v4538_v29 = vrot.slane %v1438_v39, 7 }
 0x1c7   : > { %v1757_v54 = vadd.f32 %v4360_v53, %v1689_v50  ;;  %v4536_v3 = vmul.f32 %v4366_v55, %v1541_v7  ;;  %v1622_v19 = vmul.f32 %v4350_v49, %v4501_v22  ;;  %v843_v18 = vpop.f32.mrb[7].mxu0  ;;  %v1728_v17 = vmul.f32 %v4344_v46, %v4501_v22 }
 0x1c8   : > { %v973_v12 = vmax.f32 %v849_v24, 0.0  ;;  %v841_v21 = vadd.f32 %v4423_v16, %v840_v47  ;;  %v852_v10 = vadd.f32 %v3376_v25, %v4423_v16  ;;  %v4549_v50 = vsel %vm1580_vm1, %v1546_v62, %v4538_v29 }
 0x1c9   : > { %v1690_v7 = vadd.f32 %v4357_v52, %v1622_v19  ;;  %v844_v39 = vadd.f32 %v4423_v16, %v843_v18  ;;  %v4557_v9 = vsel %vm1507_vm2, %v1473_v14, %v6494_v20  ;;  %v1660_v24 = vmul.f32 %v4340_v44, %v4549_v50 }
 0x1ca   : > { %6636 = vst [vmem:[#allocation33_spill] sm:$0xff] %v4557_v9  ;;  %v4561_v47 = vmin.f32 %v973_v12, 6.0  ;;  %v971_v25 = vmax.f32 %v841_v21, 0.0  ;;  %v974_v8 = vmax.f32 %v852_v10, 0.0  ;;  %v6637_v62 = vand.u32 15, %v4369_v56 }
 0x1cb   : > { %v4570_v52 = vadd.f32 %v4360_v53, %v1690_v7  ;;  %v972_v18 = vmax.f32 %v844_v39, 0.0  ;;  %v6640_v19 = vand.u32 15, %v4372_v57  ;;  %v4580_v12 = vmul.f32 %v4366_v55, %v4557_v9 }
 0x1cc   : > { %vm4565_vm7 = vcmp.ne.s32.totalorder %v6637_v62, 0  ;;  %v4583_v56 = vadd.f32 %v4442_v28, %v1757_v54  ;;  %v1550_v10 = vrot.slane %v4561_v47, 7  ;;  %v4588_v53 = vmul.f32 %v4350_v49, %v4561_v47  ;;  %v3379_v7 = vpop.f32.mrb[8].mxu0 }
 0x1cd   : > { %vm4574_vm8 = vcmp.ne.s32.totalorder %v6640_v19, 0  ;;  %v4592_v57 = vmul.f32 %v4344_v46, %v4561_v47  ;;  %v4594_v21 = vmin.f32 %v971_v25, 6.0  ;;  %v4596_v39 = vmin.f32 %v974_v8, 6.0  ;;  %v856_v54 = vpop.f32.mrb[9].mxu0 }
 0x1ce   : > { %6643 = vst [vmem:[#allocation34_spill] sm:$0xff] %v4583_v56  ;;  %v4598_v62 = vmin.f32 %v972_v18, 6.0  ;;  %v865_v28 = vadd.f32 %v3379_v7, %v4423_v16  ;;  %v857_v8 = vadd.f32 %v4423_v16, %v856_v54  ;;  %v6645_v18 = vand.u32 15, %v4375_v58  ;;  %v3380_v31 = vpop.f32.mrb[10].mxu0 }
 0x1cf   : > { %6644 = vst [vmem:[#allocation35_spill] sm:$0xff] %v4596_v39  ;;  %v1623_v43 = vmul.f32 %v4350_v49, %v4594_v21  ;;  %v4609_v25 = vmul.f32 %v4344_v46, %v4594_v21  ;;  %v1442_v20 = vsel %vm4505_vm5, %v4596_v39, 0.0  ;;  %v4624_v27 = vmul.f32 %v4350_v49, %v4596_v39  ;;  %v859_v58 = vpop.f32.mrb[11].mxu0 }
 0x1d0   : > { %vm4614_vm9 = vcmp.ne.s32.totalorder %v6645_v18, 15  ;;  %v4628_v54 = vmul.f32 %v4344_v46, %v4596_v39  ;;  %v1551_v32 = vrot.slane %v1442_v20, 7  ;;  %v1440_v48 = vsel %vm4521_vm6, %v4598_v62, 0.0 }
 0x1d1   : > { %v1691_v18 = vadd.f32 %v1659_v13, %v1623_v43  ;;  %v1624_v37 = vmul.f32 %v4350_v49, %v4598_v62  ;;  %v4635_v45 = vrot.slane %v1440_v48, 7  ;;  %v4639_v19 = vmul.f32 %v4344_v46, %v4598_v62 }
 0x1d2   : > { %v977_v41 = vmax.f32 %v865_v28, 0.0  ;;  %v975_v40 = vmax.f32 %v857_v8, 0.0  ;;  %v6648_v39 = vand.u32 15, %v4379_v60  ;;  %v4651_v59 = vsel %vm1580_vm1, %v1550_v10, %v1551_v32 }
 0x1d3   : > { %v4647_v13 = vadd.f32 %v1727_v15, %v1691_v18  ;;  %6651 = vst [vmem:[#allocation36_spill] sm:$0xff] %v4651_v59  ;;  %v1692_v48 = vadd.f32 %v1660_v24, %v1624_v37  ;;  %v868_v20 = vadd.f32 %v3380_v31, %v4423_v16  ;;  %v4657_v28 = vsel %vm1580_vm1, %v4635_v45, %v1550_v10 }
 0x1d4   : > { %vm4643_vm10 = vcmp.ne.s32.totalorder %v6648_v39, 15  ;;  %v4659_v8 = vmin.f32 %v977_v41, 6.0  ;;  %v4661_v60 = vmin.f32 %v975_v40, 6.0  ;;  %v860_v39 = vadd.f32 %v4423_v16, %v859_v58  ;;  %v3383_v41 = vpop.f32.mrb[12].mxu0 }
 0x1d5   : > { %v4664_v15 = vadd.f32 %v1728_v17, %v1692_v48  ;;  %v1663_v18 = vmul.f32 %v4340_v44, %v4657_v28  ;;  %v978_v42 = vmax.f32 %v868_v20, 0.0  ;;  %v1664_v31 = vmul.f32 %v4340_v44, %v4651_v59  ;;  %v872_v48 = vpop.f32.mrb[13].mxu0 }
 0x1d6   : > { %6652 = vst [vmem:[#allocation37_spill] sm:$0xff] %v4659_v8  ;;  %6653 = vst [vmem:[#allocation38_spill] sm:$0xff] %v4661_v60  ;;  %v6654_v24 = vand.u32 15, %v4386_v63  ;;  %v1337_v40 = vsel %vm4565_vm7, %v4659_v8, 0.0  ;;  %v1554_v17 = vrot.slane %v4659_v8, 7  ;;  %v1629_v58 = vmul.f32 %v4350_v49, %v4659_v8 }
 0x1d7   : > { %v4684_v37 = vmul.f32 %v4344_v46, %v4659_v8  ;;  %v4686_v63 = vrot.slane %v1337_v40, 1  ;;  %v1335_v20 = vsel %vm4574_vm8, %v4661_v60, 0.0  ;;  %v1627_v51 = vmul.f32 %v4350_v49, %v4661_v60  ;;  %v3384_v8 = vpop.f32.mrb[14].mxu0 }
 0x1d8   : > { %vm4672_vm11 = vcmp.ne.s32.totalorder %v6654_v24, 0  ;;  %v1552_v24 = vrot.slane %v4661_v60, 7  ;;  %v4700_v34 = vrot.slane %v1335_v20, 1  ;;  %v1733_v40 = vmul.f32 %v4344_v46, %v4661_v60  ;;  %v875_v26 = vpop.f32.mrb[15].mxu0 }
 0x1d9   : > { %6657 = vst [vmem:[#allocation39_spill] sm:$0xff] %v4686_v63  ;;  %v4704_v63 = vmin.f32 %v978_v42, 6.0  ;;  %v976_v14 = vmax.f32 %v860_v39, 0.0  ;;  %v1695_v56 = vadd.f32 %v1663_v18, %v1627_v51  ;;  %v881_v0 = vadd.f32 %v3383_v41, %v4423_v16 }
 0x1da   : > { %6661 = vst [vmem:[#allocation40_spill] sm:$0xff] %v4700_v34  ;;  %v4708_v9 = vsel %vm1580_vm1, %v1551_v32, %v1552_v24  ;;  %v873_v38 = vadd.f32 %v4423_v16, %v872_v48  ;;  %v6665_v51 = vand.u32 15, %v4392_v1  ;;  %v884_v59 = vadd.f32 %v3384_v8, %v4423_v16 }
 0x1db   : > { %6662 = vst [vmem:[#allocation41_spill] sm:$0xff] %v4704_v63  ;;  %6663 = vst [vmem:[#allocation42_spill] sm:$0xff] %v4708_v9  ;;  %v1665_v20 = vmul.f32 %v4340_v44, %v4708_v9  ;;  %v1446_v60 = vsel %vm4614_vm9, %v4704_v63, 0.0  ;;  %v1630_v39 = vmul.f32 %v4350_v49, %v4704_v63  ;;  %v4721_v32 = vadd.f32 %v4592_v57, %v1695_v56 }
 0x1dc   : > { %v1555_v18 = vrot.slane %v1446_v60, 7  ;;  %v4725_v41 = vmul.f32 %v4344_v46, %v4704_v63  ;;  %v4727_v48 = vmin.f32 %v976_v14, 6.0  ;;  %vm4731_vm13 = vcmp.ne.s32.totalorder %v6665_v51, 15  ;;  %v3387_v14 = vpop.f32.mrb[16].mxu0 }
 0x1dd   : > { %6664 = vst [vmem:[#allocation43_spill] sm:$0xff] %v4721_v32  ;;  %v1697_v42 = vadd.f32 %v1665_v20, %v1629_v58  ;;  %v981_v9 = vmax.f32 %v881_v0, 0.0  ;;  %v979_v34 = vmax.f32 %v873_v38, 0.0  ;;  %v6671_v38 = vand.u32 15, %v4395_v2  ;;  %v888_v43 = vpop.f32.mrb[17].mxu0 }
 0x1de   : > { %v4738_v56 = vsel %vm1580_vm1, %v1554_v17, %v1555_v18  ;;  %v1444_v57 = vsel %vm4643_vm10, %v4727_v48, 0.0  ;;  %v1628_v1 = vmul.f32 %v4350_v49, %v4727_v48  ;;  %v1734_v8 = vmul.f32 %v4344_v46, %v4727_v48 }
 0x1df   : > { %6668 = vst [vmem:[#allocation44_spill] sm:$0xff] %v4738_v56  ;;  %v4746_v51 = vadd.f32 %v1733_v40, %v1697_v42  ;;  %v1553_v58 = vrot.slane %v1444_v57, 7  ;;  %v4750_v0 = vmin.f32 %v981_v9, 6.0  ;;  %vm4754_vm14 = vcmp.ne.s32.totalorder %v6671_v38, 15  ;;  %v3388_v42 = vpop.f32.mrb[18].mxu0 }
 0x1e0   : > { %v1696_v60 = vadd.f32 %v1664_v31, %v1628_v1  ;;  %v4758_v63 = vmin.f32 %v979_v34, 6.0  ;;  %v982_v32 = vmax.f32 %v884_v59, 0.0  ;;  %v876_v40 = vadd.f32 %v4423_v16, %v875_v26  ;;  %v891_v34 = vpop.f32.mrb[19].mxu0 }
 0x1e1   : > { %6669 = vst [vmem:[#allocation45_spill] sm:$0xff] %v4746_v51  ;;  %6670 = vst [vmem:[#allocation46_spill] sm:$0xff] %v4750_v0  ;;  %v4763_v57 = vsel %vm1580_vm1, %v1553_v58, %v1554_v17  ;;  %v4767_v9 = vsel %vm1580_vm1, %v1552_v24, %v1553_v58  ;;  %v1341_v2 = vsel %vm4672_vm11, %v4750_v0, 0.0  ;;  %v1558_v31 = vrot.slane %v4750_v0, 7 }
 0x1e2   : > { %6674 = vst [vmem:[#allocation47_spill] sm:$0xff] %v4758_v63  ;;  %6675 = vst [vmem:[#allocation48_spill] sm:$0xff] %v4763_v57  ;;  %v1666_v59 = vmul.f32 %v4340_v44, %v4767_v9  ;;  %v4776_v26 = vadd.f32 %v4628_v54, %v1696_v60  ;;  %v4778_v1 = vrot.slane %v1341_v2, 1  ;;  %v1633_v17 = vmul.f32 %v4350_v49, %v4750_v0 }
 0x1e3   : > { %6676 = vst [vmem:[#allocation49_spill] sm:$0xff] %v4767_v9  ;;  %v6678_v24 = vand.u32 15, %v4399_v4  ;;  %v4790_v10 = vmul.f32 %v4344_v46, %v4750_v0  ;;  %v1339_v54 = vsel %vm4696_vm12, %v4758_v63, 0.0  ;;  %v1556_v60 = vrot.slane %v4758_v63, 7 }
 0x1e4   : > { %6677 = vst [vmem:[#allocation50_spill] sm:$0xff] %v4778_v1  ;;  %v1631_v38 = vmul.f32 %v4350_v49, %v4758_v63  ;;  %v1698_v2 = vadd.f32 %v1666_v59, %v1630_v39  ;;  %v4798_v1 = vrot.slane %v1339_v54, 1  ;;  %v1667_v4 = vmul.f32 %v4340_v44, %v4763_v57 }
 0x1e5   : > { %vm4784_vm15 = vcmp.ne.s32.totalorder %v6678_v24, 0  ;;  %v1737_v24 = vmul.f32 %v4344_v46, %v4758_v63  ;;  %v4806_v0 = vsel %vm1580_vm1, %v1555_v18, %v1556_v60  ;;  %v4808_v36 = vmin.f32 %v982_v32, 6.0 }
 0x1e6   : > { %6681 = vst [vmem:[#allocation51_spill] sm:$0xff] %v4798_v1  ;;  %6682 = vst [vmem:[#allocation52_spill] sm:$0xff] %v4806_v0  ;;  %v980_v9 = vmax.f32 %v876_v40, 0.0  ;;  %v1668_v51 = vmul.f32 %v4340_v44, %v4738_v56  ;;  %v6684_v39 = vand.u32 15, %v4382_v61  ;;  %v4818_v54 = vadd.f32 %v1734_v8, %v1698_v2  ;;  %v4829_v56 = vpop.f32.mrb[20].mxu0 }
 0x1e7   : > { %6683 = vst [vmem:[#allocation53_spill] sm:$0xff] %v4808_v36  ;;  %v1669_v63 = vmul.f32 %v4340_v44, %v4806_v0  ;;  %v1699_v57 = vadd.f32 %v1667_v4, %v1631_v38  ;;  %v897_v18 = vadd.f32 %v3387_v14, %v4423_v16  ;;  %v6688_v32 = vand.u32 15, %v4402_v5  ;;  %v4847_v4 = vpop.f32.mrb[21].mxu0 }
 0x1e8   : > { %vm4814_vm0 = vcmp.ne.s32.totalorder %v6684_v39, 0  ;;  %6687 = vst [vmem:[#allocation54_spill] sm:$0xff] %v4818_v54  ;;  %v1450_v61 = vsel %vm4731_vm13, %v4808_v36, 0.0  ;;  %v1634_v2 = vmul.f32 %v4350_v49, %v4808_v36  ;;  %v4839_v14 = vmul.f32 %v4344_v46, %v4808_v36  ;;  %v4854_v0 = vpop.f32.mrb[22].mxu0 }
 0x1e9   : > { %vm4825_vm3 = vcmp.ne.s32.totalorder %v6688_v32, 0  ;;  %v6691_v5 = vand.u32 15, %v4405_v6  ;;  %v1701_v39 = vadd.f32 %v1669_v63, %v1633_v17  ;;  %v4850_v7 = vadd.f32 %v4684_v37, %v1699_v57  ;;  %v4865_v37 = vpop.f32.mrb[23].mxu0 }
 0x1ea   : > { %v1559_v32 = vrot.slane %v1450_v61, 7  ;;  %v4852_v8 = vmin.f32 %v980_v9, 6.0  ;;  %v985_v1 = vmax.f32 %v897_v18, 0.0  ;;  %v889_v36 = vadd.f32 %v4423_v16, %v888_v43 }
 0x1eb   : > { %vm4843_vm5 = vcmp.ne.s32.totalorder %v6691_v5, 15  ;;  %v900_v6 = vadd.f32 %v3388_v42, %v4423_v16  ;;  %v6695_v5 = vand.u32 15, %v4415_v11  ;;  %v892_v63 = vadd.f32 %v4423_v16, %v891_v34 }
 0x1ec   : > { %6694 = vst [vmem:[#allocation55_spill] sm:$0xff] %v4852_v8  ;;  %v4867_v57 = vadd.f32 %v1737_v24, %v1701_v39  ;;  %v4871_v9 = vsel %vm1580_vm1, %v1558_v31, %v1559_v32  ;;  %v1448_v43 = vsel %vm4754_vm14, %v4852_v8, 0.0  ;;  %v1632_v17 = vmul.f32 %v4350_v49, %v4852_v8 }
 0x1ed   : > { %vm4860_vm6 = vcmp.ne.s32.totalorder %v6695_v5, 15  ;;  %6699 = vst [vmem:[#allocation57_spill] sm:$0xff] %v4871_v9  ;;  %v1557_v42 = vrot.slane %v1448_v43, 7  ;;  %v1738_v34 = vmul.f32 %v4344_v46, %v4852_v8  ;;  %v4881_v18 = vmin.f32 %v985_v1, 6.0 }
 0x1ee   : > { %6698 = vst [vmem:[#allocation56_spill] sm:$0xff] %v4867_v57  ;;  %v983_v24 = vmax.f32 %v889_v36, 0.0  ;;  %v986_v61 = vmax.f32 %v900_v6, 0.0  ;;  %v984_v39 = vmax.f32 %v892_v63, 0.0  ;;  %v1672_v5 = vmul.f32 %v4340_v44, %v4871_v9  ;;  %v4903_v9 = vpop.f32.mrb[24].mxu0 }
 0x1ef   : > { %6700 = vst [vmem:[#allocation58_spill] sm:$0xff] %v4881_v18  ;;  %v4887_v20 = vsel %vm1580_vm1, %v1557_v42, %v1558_v31  ;;  %v4891_v43 = vsel %vm1580_vm1, %v1556_v60, %v1557_v42  ;;  %v1700_v11 = vadd.f32 %v1668_v51, %v1632_v17  ;;  %v1345_v1 = vsel %vm4784_vm15, %v4881_v18, 0.0  ;;  %v4916_v17 = vpop.f32.mrb[25].mxu0 }
 0x1f0   : > { %6701 = vst [vmem:[#allocation59_spill] sm:$0xff] %v4887_v20  ;;  %6702 = vst [vmem:[#allocation60_spill] sm:$0xff] %v4891_v43  ;;  %v1670_v36 = vmul.f32 %v4340_v44, %v4891_v43  ;;  %v4898_v6 = vrot.slane %v1345_v1, 1  ;;  %v1562_v63 = vrot.slane %v4881_v18, 7  ;;  %v1637_v31 = vmul.f32 %v4350_v49, %v4881_v18 }
 0x1f1   : > { %v4906_v60 = vadd.f32 %v4725_v41, %v1700_v11  ;;  %v4910_v51 = vmul.f32 %v4344_v46, %v4881_v18  ;;  %v4912_v58 = vmin.f32 %v983_v24, 6.0  ;;  %v1671_v42 = vmul.f32 %v4340_v44, %v4887_v20  ;;  %v4925_v11 = vpop.f32.mrb[26].mxu0 }
 0x1f2   : > { %6703 = vst [vmem:[#allocation61_spill] sm:$0xff] %v4898_v6  ;;  %v1702_v1 = vadd.f32 %v1670_v36, %v1634_v2  ;;  %v4918_v6 = vmin.f32 %v986_v61, 6.0  ;;  %v4920_v43 = vmin.f32 %v984_v39, 6.0  ;;  %v1331_v41 = vsel %vm4814_vm0, %v4594_v21, 0.0  ;;  %v4935_v61 = vpop.f32.mrb[27].mxu0 }
 0x1f3   : > { %6704 = vst [vmem:[#allocation62_spill] sm:$0xff] %v4906_v60  ;;  %6705 = vst [vmem:[#allocation63_spill] sm:$0xff] %v4912_v58  ;;  %v1343_v24 = vsel %vm4825_vm3, %v4912_v58, 0.0  ;;  %v1560_v18 = vrot.slane %v4912_v58, 7  ;;  %v1635_v20 = vmul.f32 %v4350_v49, %v4912_v58  ;;  %v1741_v2 = vmul.f32 %v4344_v46, %v4912_v58 }
 0x1f4   : > { %6706 = vst [vmem:[#allocation64_spill] sm:$0xff] %v4918_v6  ;;  %6707 = vst [vmem:[#allocation65_spill] sm:$0xff] %v4920_v43  ;;  %v4937_v39 = vadd.f32 %v1738_v34, %v1702_v1  ;;  %v4939_v59 = vrot.slane %v1343_v24, 1  ;;  %v1454_v36 = vsel %vm4843_vm5, %v4918_v6, 0.0  ;;  %v1638_v58 = vmul.f32 %v4350_v49, %v4918_v6 }
 0x1f5   : > { %v4947_v57 = vsel %vm1580_vm1, %v1559_v32, %v1560_v18  ;;  %v1703_v8 = vadd.f32 %v1671_v42, %v1635_v20  ;;  %v4949_v60 = vrot.slane %v1454_v36, 7  ;;  %v4957_v1 = vmul.f32 %v4344_v46, %v4918_v6  ;;  %v4976_v32 = vpop.f32.mrb[28].mxu0 }
 0x1f6   : > { %6708 = vst [vmem:[#allocation66_spill] sm:$0xff] %v4937_v39  ;;  %6709 = vst [vmem:[#allocation67_spill] sm:$0xff] %v4939_v59  ;;  %v1673_v34 = vmul.f32 %v4340_v44, %v4947_v57  ;;  %v1452_v38 = vsel %vm4860_vm6, %v4920_v43, 0.0  ;;  %v1636_v36 = vmul.f32 %v4350_v49, %v4920_v43  ;;  %v1742_v6 = vmul.f32 %v4344_v46, %v4920_v43 }
 0x1f7   : > { %6710 = vst [vmem:[#allocation68_spill] sm:$0xff] %v4947_v57  ;;  %v4964_v20 = vadd.f32 %v4790_v10, %v1703_v8  ;;  %v4969_v42 = vsel %vm1580_vm1, %v1562_v63, %v4949_v60  ;;  %v1561_v24 = vrot.slane %v1452_v38, 7  ;;  %v1475_v54 = vrot.slane %v1331_v41, 1  ;;  %v4992_v41 = vpop.f32.mrb[29].mxu0 }
 0x1f8   : > { %v1705_v40 = vadd.f32 %v1673_v34, %v1637_v31  ;;  %v1476_v57 = vrot.slane %v4598_v62, 1  ;;  %v1704_v38 = vadd.f32 %v1672_v5, %v1636_v36  ;;  %v6713_v31 = vsel %vm4489_vm4, %v4561_v47, 0.0  ;;  %6714 = vst [vmem:[#allocation71_spill] sm:$0xff] %v4992_v41  ;;  %v5004_v23 = vpop.f32.mrb[30].mxu0 }
 0x1f9   : > { %6711 = vst [vmem:[#allocation69_spill] sm:$0xff] %v4964_v20  ;;  %v4980_v10 = vsel %vm1580_vm1, %v1561_v24, %v1562_v63  ;;  %v4984_v8 = vsel %vm1580_vm1, %v1560_v18, %v1561_v24  ;;  %v4990_v34 = vrot.slane %v6713_v31, 1  ;;  %v6716_v18 = vrot.slane %v4501_v22, 1  ;;  %6717 = vst [vmem:[#allocation73_spill] sm:$0xff] %v5004_v23  ;;  %v5022_v31 = vpop.f32.mrb[31].mxu0  ;;  %v6725_v23 = vld [vmem:[#allocation33_spill] sm:$0xff] }
 0x1fa   : > { %6712 = vst [vmem:[#allocation70_spill] sm:$0xff] %v4984_v8  ;;  %v4994_v43 = vadd.f32 %v1741_v2, %v1705_v40  ;;  %v1674_v20 = vmul.f32 %v4340_v44, %v4984_v8  ;;  %v1538_v63 = vsel %vm1507_vm2, %v1475_v54, %v1476_v57  ;;  %v5007_v24 = vadd.f32 %v4839_v14, %v1704_v38 }
 0x1fb   : > { %v1539_v5 = vsel %vm1507_vm2, %v6716_v18, %v1475_v54  ;;  %v1537_v2 = vsel %vm1507_vm2, %v1476_v57, %v4990_v34  ;;  %v6719_v40 = vrot.slane %v4594_v21, 7  ;;  %6721 = vst [vmem:[#allocation75_spill] sm:$0xff] %v5022_v31  ;;  %v1797_v8 = vmul.f32 %v4366_v55, %v1538_v63 }
 0x1fc   : > { %6715 = vst [vmem:[#allocation72_spill] sm:$0xff] %v4994_v43  ;;  %6718 = vst [vmem:[#allocation74_spill] sm:$0xff] %v5007_v24  ;;  %v1706_v14 = vadd.f32 %v1674_v20, %v1638_v58  ;;  %v1796_v57 = vmul.f32 %v4366_v55, %v1539_v5  ;;  %v1798_v43 = vmul.f32 %v4366_v55, %v1537_v2 }
 0x1fd   : > { %v1611_v36 = vsel %vm1580_vm1, %v6719_v40, %v4635_v45  ;;  %v6720_v22 = vmov %v6719_v40  ;;  %v1826_v45 = vadd.f32 %v4536_v3, %v4570_v52  ;;  %v1827_v40 = vadd.f32 %v4580_v12, %v4647_v13 }
 0x1fe   : > { %v1612_v54 = vsel %vm1580_vm1, %v4538_v29, %v6720_v22  ;;  %v1662_v18 = vmul.f32 %v4340_v44, %v1611_v36  ;;  %v5033_v29 = vadd.f32 %v1742_v6, %v1706_v14  ;;  %v1828_v22 = vadd.f32 %v1796_v57, %v4664_v15  ;;  %v3403_v15 = vpop.f32.mrb[32].mxu0  ;;  %v6724_v6 = vld [vmem:[#allocation34_spill] sm:$0xff] }
 0x1ff   : > { %v1661_v38 = vmul.f32 %v4340_v44, %v1612_v54  ;;  %v1861_v24 = vmul.f32 %v4448_v33, %v4514_v30  ;;  %v1862_v59 = vmul.f32 %v4448_v33, %v4549_v50  ;;  %v1863_v31 = vmul.f32 %v4448_v33, %v1612_v54 }
 0x200   : > { %6722 = vst [vmem:[#allocation76_spill] sm:$0xff] %v5033_v29  ;;  %v1694_v20 = vadd.f32 %v1662_v18, %v4624_v27  ;;  %v1864_v3 = vmul.f32 %v4448_v33, %v1611_v36  ;;  %v6723_v27 = vld [vmem:[#allocation36_spill] sm:$0xff]  ;;  %v5051_v18 = vpop.f32.mrb[33].mxu0 }
 0x201   : > { %v1693_v58 = vadd.f32 %v1661_v38, %v4588_v53  ;;  %v1865_v53 = vmul.f32 %v4448_v33, %v4657_v28  ;;  %v1866_v13 = vmul.f32 %v4448_v33, %v6723_v27  ;;  %v1893_v30 = vadd.f32 %v1861_v24, %v6724_v6  ;;  %v3404_v15 = vpop.f32.mrb[34].mxu0  ;;  %v5062_v24 = vld [vmem:[#allocation7 + $0x8] ss:$0 sm:$0xff] }
 0x202   : > { %v1762_v12 = vadd.f32 %v4639_v19, %v1694_v20  ;;  %v1894_v14 = vadd.f32 %v1862_v59, %v1826_v45  ;;  %v1895_v38 = vadd.f32 %v1863_v31, %v1827_v40  ;;  %v1896_v50 = vadd.f32 %v1864_v3, %v1828_v22  ;;  %v6727_v20 = vld [vmem:[#allocation21_spill] sm:$0xff] }
 0x203   : > { %v1761_v52 = vadd.f32 %v4609_v25, %v1693_v58  ;;  %v6726_v25 = vld [vmem:[#allocation27_spill] sm:$0xff]  ;;  %v6728_v41 = vand.u32 15, %v6727_v20 }
 0x204   : > { %v1830_v29 = vadd.f32 %v1798_v43, %v1762_v12  ;;  %v1929_v58 = vmul.f32 %v6726_v25, %v6725_v23  ;;  %v1930_v19 = vmul.f32 %v6726_v25, %v1539_v5  ;;  %v1931_v59 = vmul.f32 %v6726_v25, %v1538_v63  ;;  %v6732_v23 = vld [vmem:[#allocation22_spill] sm:$0xff] }
 0x205   : > { %v1829_v57 = vadd.f32 %v1797_v8, %v1761_v52  ;;  %vm5058_vm4 = vcmp.ne.s32.totalorder %v6728_v41, 0  ;;  %v1932_v31 = vmul.f32 %v6726_v25, %v1537_v2  ;;  %v6731_v8 = vld [vmem:[#allocation29_spill] sm:$0xff]  ;;  %v6733_v40 = vand.u32 15, %v6732_v23  ;;  %v5074_v41 = vpop.f32.mrb[35].mxu0  ;;  %v6738_v23 = vld [vmem:[#allocation23_spill] sm:$0xff] }
 0x206   : > { %v1997_v43 = vmul.f32 %v6731_v8, %v1612_v54  ;;  %v1998_v45 = vmul.f32 %v6731_v8, %v1611_v36  ;;  %6736 = vst [vmem:[#allocation36_spill] sm:$0xff] %v5074_v41  ;;  %v5078_v3 = vadd.f32 %v1866_v13, %v1830_v29  ;;  %v1961_v52 = vadd.f32 %v1929_v58, %v1893_v30  ;;  %v6737_v36 = vld [vmem:[#allocation30_spill] sm:$0xff] }
 0x207   : > { %vm5070_vm7 = vcmp.ne.s32.totalorder %v6733_v40, 0  ;;  %v5076_v22 = vadd.f32 %v1865_v53, %v1829_v57  ;;  %v1962_v12 = vadd.f32 %v1930_v19, %v1894_v14  ;;  %v5080_v6 = vadd.f32 %v1931_v59, %v1895_v38  ;;  %v5117_v19 = vld [vmem:[%s6477_s4] ss:$0 sm:$0xff] }
 0x208   : > { %v5082_v20 = vadd.f32 %v1932_v31, %v1896_v50  ;;  %v2065_v54 = vmul.f32 %v6737_v36, %v4594_v21  ;;  %v2066_v15 = vmul.f32 %v6737_v36, %v4598_v62  ;;  %v6739_v40 = vand.u32 15, %v6738_v23  ;;  %v6742_v50 = vld [vmem:[#allocation24_spill] sm:$0xff] }
 0x209   : > { %v2029_v29 = vadd.f32 %v1997_v43, %v1961_v52  ;;  %v2030_v53 = vadd.f32 %v1998_v45, %v1962_v12  ;;  %v2133_v13 = vmul.f32 %v5062_v24, %v1538_v63  ;;  %v2134_v30 = vmul.f32 %v5062_v24, %v1537_v2  ;;  %v6746_v43 = vld [vmem:[#allocation40_spill] sm:$0xff]  ;;  %v6747_v45 = vld [vmem:[#allocation35_spill] sm:$0xff] }
 0x20a   : > { %vm5090_vm8 = vcmp.ne.s32.totalorder %v6739_v40, 15  ;;  %v913_v14 = vadd.f32 %v4829_v56, %v4423_v16  ;;  %v905_v21 = vadd.f32 %v4423_v16, %v4847_v4  ;;  %v1675_v62 = vmul.f32 %v4340_v44, %v4980_v10 }
 0x20b   : > { %v916_v38 = vadd.f32 %v4854_v0, %v4423_v16  ;;  %v6743_v57 = vand.u32 15, %v6742_v50  ;;  %v2097_v63 = vadd.f32 %v2065_v54, %v2029_v29  ;;  %v2098_v2 = vadd.f32 %v2066_v15, %v2030_v53 }
 0x20c   : > { %v908_v56 = vadd.f32 %v4423_v16, %v4865_v37  ;;  %v1676_v4 = vmul.f32 %v4340_v44, %v4969_v42  ;;  %v989_v0 = vmax.f32 %v913_v14, 0.0  ;;  %v987_v59 = vmax.f32 %v905_v21, 0.0 }
 0x20d   : > { %vm5106_vm9 = vcmp.ne.s32.totalorder %v6743_v57, 15  ;;  %v990_v31 = vmax.f32 %v916_v38, 0.0  ;;  %v6748_v52 = vrot.slane %v6747_v45, 1  ;;  %v2165_v54 = vadd.f32 %v2133_v13, %v2097_v63 }
 0x20e   : > { %v2166_v15 = vadd.f32 %v2134_v30, %v2098_v2  ;;  %v988_v37 = vmax.f32 %v908_v56, 0.0  ;;  %v5129_v29 = vmin.f32 %v989_v0, 6.0  ;;  %v5131_v53 = vmin.f32 %v987_v59, 6.0 }
 0x20f   : > { %v1535_v12 = vsel %vm1507_vm2, %v6748_v52, %v6746_v43  ;;  %v6749_v23 = vmov %v6748_v52  ;;  %v5133_v14 = vmin.f32 %v990_v31, 6.0  ;;  %v2203_v38 = vadd.f32 %v5117_v19, %v2165_v54 }
 0x210   : > { %v1536_v40 = vsel %vm1507_vm2, %v4990_v34, %v6749_v23  ;;  %6750 = vst [vmem:[#allocation34_spill] sm:$0xff] %v5129_v29  ;;  %6751 = vst [vmem:[#allocation33_spill] sm:$0xff] %v5131_v53  ;;  %v2204_v13 = vadd.f32 %v5117_v19, %v2166_v15  ;;  %v5138_v30 = vmin.f32 %v988_v37, 6.0  ;;  %v1800_v50 = vmul.f32 %v4366_v55, %v1535_v12 }
 0x211   : > { %6752 = vst [vmem:[#allocation27_spill] sm:$0xff] %v5133_v14  ;;  %v1799_v21 = vmul.f32 %v4366_v55, %v1536_v40  ;;  %v1349_v34 = vsel %vm5058_vm4, %v5129_v29, 0.0  ;;  %v1566_v57 = vrot.slane %v5129_v29, 7  ;;  %v1641_v63 = vmul.f32 %v4350_v49, %v5129_v29 }
 0x212   : > { %6753 = vst [vmem:[#allocation21_spill] sm:$0xff] %v5138_v30  ;;  %v5149_v2 = vmul.f32 %v4344_v46, %v5129_v29  ;;  %v2235_v56 = vmax.f32 %v2203_v38, 0.0  ;;  %v2236_v0 = vmax.f32 %v2204_v13, 0.0  ;;  %v5151_v59 = vrot.slane %v1349_v34, 1  ;;  %v6756_v13 = vld [vmem:[#allocation43_spill] sm:$0xff] }
 0x213   : > { %v1347_v31 = vsel %vm5070_vm7, %v5131_v53, 0.0  ;;  %v1564_v39 = vrot.slane %v5131_v53, 7  ;;  %v1639_v54 = vmul.f32 %v4350_v49, %v5131_v53  ;;  %v1745_v15 = vmul.f32 %v4344_v46, %v5131_v53 }
 0x214   : > { %6754 = vst [vmem:[#allocation29_spill] sm:$0xff] %v5151_v59  ;;  %v5156_v52 = vrot.slane %v1347_v31, 1  ;;  %v2267_v37 = vmin.f32 %v2235_v56, 6.0  ;;  %v2268_v23 = vmin.f32 %v2236_v0, 6.0  ;;  %v1458_v38 = vsel %vm5090_vm8, %v5133_v14, 0.0 }
 0x215   : > { %v5170_v5 = vsel %vm1580_vm1, %v4949_v60, %v1564_v39  ;;  %v1707_v34 = vadd.f32 %v1675_v62, %v1639_v54  ;;  %v5172_v31 = vrot.slane %v1458_v38, 7  ;;  %v1642_v29 = vmul.f32 %v4350_v49, %v5133_v14  ;;  %v6763_v54 = vld [vmem:[#allocation39_spill] sm:$0xff] }
 0x216   : > { %6755 = vst [vmem:[#allocation22_spill] sm:$0xff] %v5170_v5  ;;  %v2299_v53 = vpack.c.bf16 %v2268_v23, %v2267_v37  ;;  %v1677_v56 = vmul.f32 %v4340_v44, %v5170_v5  ;;  %v5180_v41 = vmul.f32 %v4344_v46, %v5133_v14  ;;  %v1456_v0 = vsel %vm5106_vm9, %v5138_v30, 0.0 }
 0x217   : > { %v5186_v60 = vadd.f32 %v4910_v51, %v1707_v34  ;;  %v5191_v62 = vsel %vm1580_vm1, %v1566_v57, %v5172_v31  ;;  %v1565_v37 = vrot.slane %v1456_v0, 7  ;;  %v1640_v38 = vmul.f32 %v4350_v49, %v5138_v30  ;;  %v6757_v51 = vld [vmem:[#allocation25_spill] sm:$0xff] }
 0x218   : > { %3421 = vmatprep.mubr.bf16.mxu1 %v2299_v53  ;;  %v1709_v23 = vadd.f32 %v1677_v56, %v1641_v63  ;;  %v1746_v58 = vmul.f32 %v4344_v46, %v5138_v30  ;;  %v5199_v14 = vadd.f32 %v1799_v21, %v6756_v13  ;;  %v6758_v34 = vand.u32 15, %v6757_v51 }
 0x219   : > { %v5209_v0 = vsel %vm1580_vm1, %v1565_v37, %v1566_v57  ;;  %v5213_v53 = vsel %vm1580_vm1, %v1564_v39, %v1565_v37  ;;  %v5216_v63 = vadd.f32 %v1800_v50, %v4776_v26  ;;  %v1933_v21 = vmul.f32 %v6726_v25, %v1536_v40 }
 0x21a   : > { %vm5203_vm10 = vcmp.ne.s32.totalorder %v6758_v34, 0  ;;  %6761 = vst [vmem:[#allocation30_spill] sm:$0xff] %v5213_v53  ;;  %v5219_v13 = vadd.f32 %v1745_v15, %v1709_v23  ;;  %v1678_v56 = vmul.f32 %v4340_v44, %v5213_v53  ;;  %v1708_v51 = vadd.f32 %v1676_v4, %v1640_v38 }
 0x21b   : > { %v1934_v34 = vmul.f32 %v6726_v25, %v1535_v12  ;;  %v1999_v57 = vmul.f32 %v6731_v8, %v4657_v28  ;;  %v2000_v39 = vmul.f32 %v6731_v8, %v6723_v27  ;;  %v2067_v26 = vmul.f32 %v6737_v36, %v4561_v47 }
 0x21c   : > { %6762 = vst [vmem:[#allocation23_spill] sm:$0xff] %v5219_v13  ;;  %v2068_v50 = vmul.f32 %v6737_v36, %v6747_v45  ;;  %v1710_v15 = vadd.f32 %v1678_v56, %v1642_v29  ;;  %v5233_v37 = vadd.f32 %v4957_v1, %v1708_v51  ;;  %v2135_v4 = vmul.f32 %v5062_v24, %v1536_v40  ;;  %v6769_v13 = vld [vmem:[#allocation45_spill] sm:$0xff] }
 0x21d   : > { %v2136_v23 = vmul.f32 %v5062_v24, %v1535_v12  ;;  %v2031_v38 = vadd.f32 %v1999_v57, %v5080_v6  ;;  %v2032_v28 = vadd.f32 %v2000_v39, %v5082_v20  ;;  %v929_v27 = vadd.f32 %v4903_v9, %v4423_v16  ;;  %v6767_v57 = vld [vmem:[#allocation54_spill] sm:$0xff] }
 0x21e   : > { %v6764_v47 = vrot.slane %v4727_v48, 1  ;;  %v5246_v29 = vadd.f32 %v1746_v58, %v1710_v15  ;;  %v1965_v15 = vadd.f32 %v1933_v21, %v5076_v22 }
 0x21f   : > { %v2099_v9 = vadd.f32 %v2067_v26, %v2031_v38  ;;  %v2100_v40 = vadd.f32 %v2068_v50, %v2032_v28  ;;  %v993_v56 = vmax.f32 %v929_v27, 0.0  ;;  %v6770_v50 = vld [vmem:[#allocation26_spill] sm:$0xff] }
 0x220   : > { %v1533_v45 = vsel %vm1507_vm2, %v6764_v47, %v6763_v54  ;;  %6765 = vst [vmem:[#allocation24_spill] sm:$0xff] %v5246_v29  ;;  %v6766_v1 = vmov %v6764_v47  ;;  %v6771_v38 = vand.u32 15, %v6770_v50  ;;  %v6774_v27 = vld [vmem:[#allocation42_spill] sm:$0xff] }
 0x221   : > { %v1534_v12 = vsel %vm1507_vm2, %v6746_v43, %v6766_v1  ;;  %v1802_v6 = vmul.f32 %v4366_v55, %v1533_v45  ;;  %v5255_v20 = vmul.f32 %v6726_v25, %v1533_v45  ;;  %v1966_v43 = vadd.f32 %v1934_v34, %v5078_v3  ;;  %v6776_v3 = vld [vmem:[#allocation38_spill] sm:$0xff] }
 0x222   : > { %v1801_v51 = vmul.f32 %v4366_v55, %v1534_v12  ;;  %v5262_v58 = vmul.f32 %v6726_v25, %v1534_v12  ;;  %v2167_v47 = vadd.f32 %v2135_v4, %v2099_v9  ;;  %v2168_v1 = vadd.f32 %v2136_v23, %v2100_v40 }
 0x223   : > { %v5259_v39 = vadd.f32 %v1802_v6, %v6767_v57  ;;  %v5266_v53 = vmin.f32 %v993_v56, 6.0  ;;  %vm5273_vm11 = vcmp.ne.s32.totalorder %v6771_v38, 0  ;;  %v2001_v6 = vmul.f32 %v6731_v8, %v6774_v27  ;;  %v6775_v57 = vld [vmem:[#allocation49_spill] sm:$0xff] }
 0x224   : > { %v5269_v26 = vadd.f32 %v1801_v51, %v6769_v13  ;;  %v2002_v22 = vmul.f32 %v6731_v8, %v6775_v57  ;;  %v2069_v21 = vmul.f32 %v6737_v36, %v6776_v3  ;;  %v2070_v34 = vmul.f32 %v6737_v36, %v4727_v48  ;;  %v6777_v13 = vld [vmem:[#allocation28_spill] sm:$0xff] }
 0x225   : > { %6768 = vst [vmem:[#allocation40_spill] sm:$0xff] %v5266_v53  ;;  %v6778_v4 = vand.u32 15, %v6777_v13  ;;  %v2205_v9 = vadd.f32 %v5117_v19, %v2167_v47  ;;  %v2206_v40 = vadd.f32 %v5117_v19, %v2168_v1  ;;  %v1353_v56 = vsel %vm5203_vm10, %v5266_v53, 0.0 }
 0x226   : > { %v5297_v50 = vrot.slane %v1353_v56, 1  ;;  %v1645_v48 = vmul.f32 %v4350_v49, %v5266_v53  ;;  %v5303_v38 = vmul.f32 %v4344_v46, %v5266_v53  ;;  %v2033_v3 = vadd.f32 %v2001_v6, %v1965_v15  ;;  %v6782_v6 = vld [vmem:[#allocation31_spill] sm:$0xff] }
 0x227   : > { %vm5287_vm12 = vcmp.ne.s32.totalorder %v6778_v4, 15  ;;  %v2237_v13 = vmax.f32 %v2205_v9, 0.0  ;;  %v2238_v47 = vmax.f32 %v2206_v40, 0.0  ;;  %v2034_v4 = vadd.f32 %v2002_v22, %v1966_v43  ;;  %v6798_v43 = vld [vmem:[#allocation32_spill] sm:$0xff] }
 0x228   : > { %6781 = vst [vmem:[#allocation35_spill] sm:$0xff] %v5297_v50  ;;  %v2137_v1 = vmul.f32 %v5062_v24, %v1534_v12  ;;  %v2101_v29 = vadd.f32 %v2069_v21, %v2033_v3  ;;  %v2138_v5 = vmul.f32 %v5062_v24, %v1533_v45  ;;  %v921_v56 = vadd.f32 %v4423_v16, %v4916_v17  ;;  %v6786_v3 = vld [vmem:[#allocation51_spill] sm:$0xff] }
 0x229   : > { %v1679_v51 = vmul.f32 %v4340_v44, %v5209_v0  ;;  %v2269_v50 = vmin.f32 %v2237_v13, 6.0  ;;  %v2270_v30 = vmin.f32 %v2238_v47, 6.0  ;;  %v2102_v59 = vadd.f32 %v2070_v34, %v2034_v4  ;;  %v6787_v13 = vld [vmem:[#allocation41_spill] sm:$0xff] }
 0x22a   : > { %v932_v15 = vadd.f32 %v4925_v11, %v4423_v16  ;;  %v6783_v9 = vand.u32 15, %v6782_v6  ;;  %v2169_v12 = vadd.f32 %v2137_v1, %v2101_v29  ;;  %v991_v45 = vmax.f32 %v921_v56, 0.0 }
 0x22b   : > { %v924_v17 = vadd.f32 %v4423_v16, %v4935_v61  ;;  %v1680_v22 = vmul.f32 %v4340_v44, %v5191_v62  ;;  %v2300_v21 = vpack.c.bf16 %v2270_v30, %v2269_v50  ;;  %v2170_v40 = vadd.f32 %v2138_v5, %v2102_v59 }
 0x22c   : > { %vm5315_vm13 = vcmp.ne.s32.totalorder %v6783_v9, 15  ;;  %v994_v34 = vmax.f32 %v932_v15, 0.0  ;;  %v6788_v11 = vrot.slane %v6787_v13, 1  ;;  %v2207_v4 = vadd.f32 %v5117_v19, %v2169_v12 }
 0x22d   : > { %v5329_v6 = vmin.f32 %v991_v45, 6.0  ;;  %v992_v29 = vmax.f32 %v924_v17, 0.0  ;;  %3422 = vmatmul.mubr.bf16.vlgmr.msra.gmra.mrb[0].mxu1 %v2300_v21  ;;  %v2208_v61 = vadd.f32 %v5117_v19, %v2170_v40 }
 0x22e   : > { %v1531_v47 = vsel %vm1507_vm2, %v6788_v11, %v6786_v3  ;;  %v6790_v1 = vmov %v6788_v11  ;;  %v5337_v30 = vmin.f32 %v994_v34, 6.0  ;;  %v2239_v5 = vmax.f32 %v2207_v4, 0.0 }
 0x22f   : > { %6789 = vst [vmem:[#allocation43_spill] sm:$0xff] %v5329_v6  ;;  %v1532_v16 = vsel %vm1507_vm2, %v6763_v54, %v6790_v1  ;;  %v1804_v50 = vmul.f32 %v4366_v55, %v1531_v47  ;;  %v1351_v56 = vsel %vm5273_vm11, %v5329_v6, 0.0  ;;  %v1568_v15 = vrot.slane %v5329_v6, 7 }
 0x230   : > { %6791 = vst [vmem:[#allocation25_spill] sm:$0xff] %v5337_v30  ;;  %v1803_v59 = vmul.f32 %v4366_v55, %v1532_v16  ;;  %v1643_v9 = vmul.f32 %v4350_v49, %v5329_v6  ;;  %v2240_v54 = vmax.f32 %v2208_v61, 0.0  ;;  %v5347_v12 = vrot.slane %v1351_v56, 1 }
 0x231   : > { %v1749_v45 = vmul.f32 %v4344_v46, %v5329_v6  ;;  %v1462_v17 = vsel %vm5287_vm12, %v5337_v30, 0.0  ;;  %v2271_v21 = vmin.f32 %v2239_v5, 6.0  ;;  %v5357_v28 = vsel %vm1580_vm1, %v5172_v31, %v1568_v15  ;;  %v6806_v6 = vld [vmem:[#allocation37_spill] sm:$0xff] }
 0x232   : > { %6792 = vst [vmem:[#allocation39_spill] sm:$0xff] %v5357_v28  ;;  %v1711_v40 = vadd.f32 %v1679_v51, %v1643_v9  ;;  %v2272_v11 = vmin.f32 %v2240_v54, 6.0  ;;  %v1681_v4 = vmul.f32 %v4340_v44, %v5357_v28  ;;  %v5362_v1 = vrot.slane %v1462_v17, 7 }
 0x233   : > { %v1646_v61 = vmul.f32 %v4350_v49, %v5337_v30  ;;  %v5371_v5 = vmul.f32 %v4344_v46, %v5337_v30  ;;  %v5373_v31 = vmin.f32 %v992_v29, 6.0  ;;  %v5376_v51 = vadd.f32 %v1803_v59, %v4850_v7  ;;  %v6805_v30 = vld [vmem:[#allocation44_spill] sm:$0xff] }
 0x234   : > { %v5367_v23 = vadd.f32 %v5149_v2, %v1711_v40  ;;  %v2301_v56 = vpack.c.bf16 %v2272_v11, %v2271_v21  ;;  %v1713_v9 = vadd.f32 %v1681_v4, %v1645_v48  ;;  %v6794_v54 = vrot.slane %v5266_v53, 7  ;;  %v6796_v2 = vld [vmem:[#allocation62_spill] sm:$0xff] }
 0x235   : > { %6793 = vst [vmem:[#allocation54_spill] sm:$0xff] %v5373_v31  ;;  %v5386_v40 = vadd.f32 %v1804_v50, %v6796_v2  ;;  %v1460_v29 = vsel %vm5315_vm13, %v5373_v31, 0.0  ;;  %v1644_v7 = vmul.f32 %v4350_v49, %v5373_v31  ;;  %v1750_v48 = vmul.f32 %v4344_v46, %v5373_v31 }
 0x236   : > { %v5383_v17 = vsel %vm1580_vm1, %v6794_v54, %v5362_v1  ;;  %3425 = vmatprep.mubr.bf16.mxu1 %v2301_v56  ;;  %v5396_v59 = vadd.f32 %v1749_v45, %v1713_v9  ;;  %v1569_v21 = vrot.slane %v1460_v29, 7  ;;  %v1867_v50 = vmul.f32 %v4448_v33, %v6774_v27  ;;  %v6802_v45 = vld [vmem:[#allocation48_spill] sm:$0xff] }
 0x237   : > { %6795 = vst [vmem:[#allocation45_spill] sm:$0xff] %v5383_v17  ;;  %v1868_v11 = vmul.f32 %v4448_v33, %v6775_v57  ;;  %v6799_v4 = vand.u32 15, %v6798_v43  ;;  %v1712_v2 = vadd.f32 %v1680_v22, %v1644_v7  ;;  %v1937_v34 = vmul.f32 %v6726_v25, %v1532_v16  ;;  %v6815_v54 = vld [vmem:[#allocation52_spill] sm:$0xff] }
 0x238   : > { %6797 = vst [vmem:[#allocation26_spill] sm:$0xff] %v5396_v59  ;;  %v1938_v56 = vmul.f32 %v6726_v25, %v1531_v47  ;;  %v2003_v9 = vmul.f32 %v6731_v8, %v6802_v45  ;;  %v6803_v29 = vrot.slane %v5266_v53, 7  ;;  %v5420_v57 = vsel %vm1580_vm1, %v1568_v15, %v1569_v21 }
 0x239   : > { %vm5404_vm14 = vcmp.ne.s32.totalorder %v6799_v4, 0  ;;  %6804 = vst [vmem:[#allocation42_spill] sm:$0xff] %v5420_v57  ;;  %v1899_v43 = vadd.f32 %v1867_v50, %v5199_v14  ;;  %v1900_v22 = vadd.f32 %v1868_v11, %v5216_v63  ;;  %v1682_v7 = vmul.f32 %v4340_v44, %v5420_v57  ;;  %v6807_v11 = vld [vmem:[#allocation50_spill] sm:$0xff] }
 0x23a   : > { %v5416_v27 = vsel %vm1580_vm1, %v1569_v21, %v6803_v29  ;;  %v5427_v4 = vadd.f32 %v5180_v41, %v1712_v2  ;;  %v2004_v53 = vmul.f32 %v6731_v8, %v6805_v30  ;;  %v2071_v29 = vmul.f32 %v6737_v36, %v6806_v6  ;;  %v5442_v41 = vld [vmem:[%s6475_s2] ss:$0 sm:$0xff] }
 0x23b   : > { %v1967_v28 = vadd.f32 %v5262_v58, %v1899_v43  ;;  %v1968_v15 = vadd.f32 %v5255_v20, %v1900_v22  ;;  %v2072_v14 = vmul.f32 %v6737_v36, %v6787_v13  ;;  %v2139_v63 = vmul.f32 %v5062_v24, %v1532_v16  ;;  %v6808_v58 = vld [vmem:[#allocation55_spill] sm:$0xff] }
 0x23c   : > { %v1714_v21 = vadd.f32 %v1682_v7, %v1646_v61  ;;  %v2140_v50 = vmul.f32 %v5062_v24, %v1531_v47  ;;  %v945_v6 = vadd.f32 %v5442_v41, %v4976_v32  ;;  %v6809_v2 = vrot.slane %v6808_v58, 1 }
 0x23d   : > { %v2035_v13 = vadd.f32 %v2003_v9, %v1967_v28  ;;  %v2036_v43 = vadd.f32 %v2004_v53, %v1968_v15  ;;  %v1869_v57 = vmul.f32 %v4448_v33, %v6802_v45  ;;  %v6812_v28 = vld [vmem:[#allocation66_spill] sm:$0xff]  ;;  %v1870_v9 = vmul.f32 %v4448_v33, %v6805_v30 }
 0x23e   : > { %v1529_v20 = vsel %vm1507_vm2, %v6809_v2, %v6807_v11  ;;  %v6810_v16 = vmov %v6809_v2  ;;  %v5457_v22 = vadd.f32 %v1750_v48, %v1714_v21  ;;  %v997_v7 = vmax.f32 %v945_v6, 0.0 }
 0x23f   : > { %v1530_v47 = vsel %vm1507_vm2, %v6786_v3, %v6810_v16  ;;  %v1806_v61 = vmul.f32 %v4366_v55, %v1529_v20  ;;  %v2103_v59 = vadd.f32 %v2071_v29, %v2035_v13  ;;  %v2104_v2 = vadd.f32 %v2072_v14, %v2036_v43  ;;  %v6813_v3 = vld [vmem:[#allocation56_spill] sm:$0xff] }
 0x240   : > { %6811 = vst [vmem:[#allocation49_spill] sm:$0xff] %v5457_v22  ;;  %v1805_v32 = vmul.f32 %v4366_v55, %v1530_v47  ;;  %v5467_v15 = vmin.f32 %v997_v7, 6.0  ;;  %v1901_v48 = vadd.f32 %v1869_v57, %v5269_v26  ;;  %v5474_v21 = vmul.f32 %v6726_v25, %v1530_v47  ;;  %v6816_v7 = vld [vmem:[#allocation60_spill] sm:$0xff] }
 0x241   : > { %v5463_v53 = vadd.f32 %v1806_v61, %v6812_v28  ;;  %v2171_v6 = vadd.f32 %v2139_v63, %v2103_v59  ;;  %v2172_v45 = vadd.f32 %v2140_v50, %v2104_v2  ;;  %v1902_v29 = vadd.f32 %v1870_v9, %v5259_v39  ;;  %v6817_v2 = vld [vmem:[#allocation47_spill] sm:$0xff] }
 0x242   : > { %v5470_v16 = vadd.f32 %v1805_v32, %v6813_v3  ;;  %v5478_v14 = vmul.f32 %v6726_v25, %v1529_v20  ;;  %v1357_v30 = vsel %vm5404_vm14, %v5467_v15, 0.0  ;;  %v5486_v43 = vmul.f32 %v4350_v49, %v5467_v15 }
 0x243   : > { %v5490_v26 = vmul.f32 %v4344_v46, %v5467_v15  ;;  %v2209_v59 = vadd.f32 %v5117_v19, %v2171_v6  ;;  %v2210_v39 = vadd.f32 %v5117_v19, %v2172_v45  ;;  %v5494_v57 = vrot.slane %v1357_v30, 1 }
 0x244   : > { %v1969_v63 = vadd.f32 %v1937_v34, %v1901_v48  ;;  %v1970_v50 = vadd.f32 %v1938_v56, %v1902_v29  ;;  %v2005_v61 = vmul.f32 %v6731_v8, %v6815_v54  ;;  %v2006_v32 = vmul.f32 %v6731_v8, %v6816_v7 }
 0x245   : > { %6814 = vst [vmem:[#allocation38_spill] sm:$0xff] %v5494_v57  ;;  %v2073_v28 = vmul.f32 %v6737_v36, %v6817_v2  ;;  %v2241_v9 = vmax.f32 %v2209_v59, 0.0  ;;  %v2242_v3 = vmax.f32 %v2210_v39, 0.0  ;;  %v2074_v6 = vmul.f32 %v6737_v36, %v6808_v58  ;;  %v6818_v57 = vld [vmem:[#allocation71_spill] sm:$0xff] }
 0x246   : > { %v2141_v45 = vmul.f32 %v5062_v24, %v1530_v47  ;;  %v2037_v30 = vadd.f32 %v2005_v61, %v1969_v63  ;;  %v2038_v13 = vadd.f32 %v2006_v32, %v1970_v50  ;;  %v2142_v34 = vmul.f32 %v5062_v24, %v1529_v20  ;;  %v6819_v50 = vld [vmem:[#allocation73_spill] sm:$0xff] }
 0x247   : > { %v459_v56 = vadd.s32 224, %v4325_v35  ;;  %v2273_v48 = vmin.f32 %v2241_v9, 6.0  ;;  %v2274_v29 = vmin.f32 %v2242_v3, 6.0  ;;  %v937_v22 = vadd.f32 %v5442_v41, %v6818_v57 }
 0x248   : > { %v1683_v59 = vmul.f32 %v4340_v44, %v5416_v27  ;;  %v2105_v39 = vadd.f32 %v2073_v28, %v2037_v30  ;;  %v2106_v2 = vadd.f32 %v2074_v6, %v2038_v13  ;;  %v462_v58 = vadd.s32 248, %v4325_v35  ;;  %v6823_v30 = vld [vmem:[#allocation75_spill] sm:$0xff] }
 0x249   : > { %v495_v31 = vand.u32 15, %v459_v56  ;;  %v2302_v47 = vpack.c.bf16 %v2274_v29, %v2273_v48  ;;  %v995_v63 = vmax.f32 %v937_v22, 0.0  ;;  %v948_v20 = vadd.f32 %v5442_v41, %v6819_v50 }
 0x24a   : > { %v460_v61 = vadd.s32 232, %v4325_v35  ;;  %v2173_v32 = vadd.f32 %v2141_v45, %v2105_v39  ;;  %v2174_v9 = vadd.f32 %v2142_v34, %v2106_v2  ;;  %v498_v57 = vand.u32 15, %v462_v58  ;;  %v6831_v45 = vld [vmem:[#allocation67_spill] sm:$0xff] }
 0x24b   : > { %vm5515_vm15 = vcmp.ne.s32.totalorder %v495_v31, 0  ;;  %3426 = vmatmul.mubr.bf16.gmra.mrb[4].mxu1 %v2302_v47  ;;  %v5519_v28 = vmin.f32 %v995_v63, 6.0  ;;  %v998_v13 = vmax.f32 %v948_v20, 0.0  ;;  %v940_v22 = vadd.f32 %v5442_v41, %v6823_v30 }
 0x24c   : > { %v496_v6 = vand.u32 15, %v460_v61  ;;  %v2211_v56 = vadd.f32 %v5117_v19, %v2173_v32  ;;  %v2212_v48 = vadd.f32 %v5117_v19, %v2174_v9  ;;  %vm5525_vm0 = vcmp.ne.s32.totalorder %v498_v57, 15 }
 0x24d   : > { %6822 = vst [vmem:[#allocation28_spill] sm:$0xff] %v5519_v28  ;;  %v1684_v31 = vmul.f32 %v4340_v44, %v5383_v17  ;;  %v1355_v34 = vsel %vm5515_vm15, %v5519_v28, 0.0  ;;  %v1572_v29 = vrot.slane %v5519_v28, 7  ;;  %v1647_v39 = vmul.f32 %v4350_v49, %v5519_v28  ;;  %v6851_v17 = vld [vmem:[#allocation63_spill] sm:$0xff] }
 0x24e   : > { %v1753_v2 = vmul.f32 %v4344_v46, %v5519_v28  ;;  %v2243_v58 = vmax.f32 %v2211_v56, 0.0  ;;  %v2244_v47 = vmax.f32 %v2212_v48, 0.0  ;;  %v5539_v63 = vrot.slane %v1355_v34, 1 }
 0x24f   : > { %v5541_v50 = vmin.f32 %v998_v13, 6.0  ;;  %v5546_v20 = vsel %vm1580_vm1, %v5362_v1, %v1572_v29  ;;  %v1715_v61 = vadd.f32 %v1683_v59, %v1647_v39  ;;  %vm5548_vm3 = vcmp.ne.s32.totalorder %v496_v6, 15 }
 0x250   : > { %6827 = vst [vmem:[#allocation51_spill] sm:$0xff] %v5546_v20  ;;  %v996_v9 = vmax.f32 %v940_v22, 0.0  ;;  %v2275_v3 = vmin.f32 %v2243_v58, 6.0  ;;  %v2276_v57 = vmin.f32 %v2244_v47, 6.0  ;;  %v1685_v30 = vmul.f32 %v4340_v44, %v5546_v20  ;;  %v6832_v58 = vld [vmem:[#allocation53_spill] sm:$0xff] }
 0x251   : > { %6826 = vst [vmem:[#allocation31_spill] sm:$0xff] %v5541_v50  ;;  %v1466_v13 = vsel %vm5525_vm0, %v5541_v50, 0.0  ;;  %v5558_v56 = vadd.f32 %v5303_v38, %v1715_v61  ;;  %v1650_v6 = vmul.f32 %v4350_v49, %v5541_v50  ;;  %v5568_v34 = vmul.f32 %v4344_v46, %v5541_v50  ;;  %v6838_v50 = vld [vmem:[#allocation74_spill] sm:$0xff] }
 0x252   : > { %v5561_v59 = vrot.slane %v1466_v13, 7  ;;  %v2303_v22 = vpack.c.bf16 %v2276_v57, %v2275_v3  ;;  %v1717_v48 = vadd.f32 %v1685_v30, %v5486_v43  ;;  %v5570_v39 = vmin.f32 %v996_v9, 6.0  ;;  %v6837_v13 = vld [vmem:[#allocation69_spill] sm:$0xff] }
 0x253   : > { %v6833_v38 = vrot.slane %v6832_v58, 1  ;;  %v1871_v43 = vmul.f32 %v4448_v33, %v6815_v54  ;;  %v1872_v57 = vmul.f32 %v4448_v33, %v6816_v7 }
 0x254   : > { %6830 = vst [vmem:[#allocation41_spill] sm:$0xff] %v5570_v39  ;;  %3429 = vmatprep.mubr.bf16.mxu1 %v2303_v22  ;;  %v5586_v9 = vadd.f32 %v1753_v2, %v1717_v48  ;;  %v1464_v30 = vsel %vm5548_vm3, %v5570_v39, 0.0 }
 0x255   : > { %v1527_v47 = vsel %vm1507_vm2, %v6833_v38, %v6831_v45  ;;  %v6834_v61 = vmov %v6833_v38  ;;  %v1648_v38 = vmul.f32 %v4350_v49, %v5570_v39  ;;  %v1573_v1 = vrot.slane %v1464_v30, 7 }
 0x256   : > { %v1528_v3 = vsel %vm1507_vm2, %v6807_v11, %v6834_v61  ;;  %6835 = vst [vmem:[#allocation62_spill] sm:$0xff] %v5586_v9  ;;  %v1754_v11 = vmul.f32 %v4344_v46, %v5570_v39  ;;  %v1808_v7 = vmul.f32 %v4366_v55, %v1527_v47  ;;  %v1903_v2 = vadd.f32 %v1871_v43, %v5376_v51 }
 0x257   : > { %v1807_v54 = vmul.f32 %v4366_v55, %v1528_v3  ;;  %v1716_v22 = vadd.f32 %v1684_v31, %v1648_v38  ;;  %v1904_v48 = vadd.f32 %v1872_v57, %v5386_v40  ;;  %v1941_v32 = vmul.f32 %v6726_v25, %v1528_v3 }
 0x258   : > { %v5603_v61 = vsel %vm1580_vm1, %v1572_v29, %v1573_v1  ;;  %v5609_v46 = vadd.f32 %v1808_v7, %v6838_v50  ;;  %v1942_v28 = vmul.f32 %v6726_v25, %v1527_v47  ;;  %v1971_v40 = vadd.f32 %v5474_v21, %v1903_v2  ;;  %v6839_v29 = vld [vmem:[#allocation59_spill] sm:$0xff]  ;;  %v6841_v50 = vld [vmem:[#allocation46_spill] sm:$0xff]  ;;  %v6842_v21 = vld [vmem:[#allocation61_spill] sm:$0xff] }
 0x259   : > { %6836 = vst [vmem:[#allocation32_spill] sm:$0xff] %v5603_v61  ;;  %v5606_v30 = vadd.f32 %v1807_v54, %v6837_v13  ;;  %v1686_v31 = vmul.f32 %v4340_v44, %v5603_v61  ;;  %v5615_v51 = vadd.f32 %v5371_v5, %v1716_v22  ;;  %v1972_v43 = vadd.f32 %v5478_v14, %v1904_v48  ;;  %v6840_v13 = vld [vmem:[#allocation57_spill] sm:$0xff] }
 0x25a   : > { %v2007_v57 = vmul.f32 %v6731_v8, %v6839_v29  ;;  %v2008_v38 = vmul.f32 %v6731_v8, %v6840_v13  ;;  %v2075_v54 = vmul.f32 %v6737_v36, %v6841_v50  ;;  %v2076_v7 = vmul.f32 %v6737_v36, %v6832_v58  ;;  %v6843_v2 = vld [vmem:[#allocation65_spill] sm:$0xff] }
 0x25b   : > { %v1718_v61 = vadd.f32 %v1686_v31, %v1650_v6  ;;  %v2143_v5 = vmul.f32 %v5062_v24, %v1528_v3  ;;  %v2144_v22 = vmul.f32 %v5062_v24, %v1527_v47  ;;  %v6844_v14 = vrot.slane %v6843_v2, 1 }
 0x25c   : > { %v2039_v20 = vadd.f32 %v2007_v57, %v1971_v40  ;;  %v2040_v9 = vadd.f32 %v2008_v38, %v1972_v43  ;;  %v1873_v3 = vmul.f32 %v4448_v33, %v6839_v29  ;;  %v1874_v31 = vmul.f32 %v4448_v33, %v6840_v13  ;;  %v6847_v57 = vld [vmem:[#allocation76_spill] sm:$0xff] }
 0x25d   : > { %v1525_v48 = vsel %vm1507_vm2, %v6844_v14, %v6842_v21  ;;  %v6845_v39 = vmov %v6844_v14  ;;  %v5640_v58 = vadd.f32 %v1754_v11, %v1718_v61 }
 0x25e   : > { %v1526_v50 = vsel %vm1507_vm2, %v6831_v45, %v6845_v39  ;;  %v1810_v6 = vmul.f32 %v4366_v55, %v1525_v48  ;;  %v2107_v40 = vadd.f32 %v2075_v54, %v2039_v20  ;;  %v2108_v43 = vadd.f32 %v2076_v7, %v2040_v9  ;;  %v6848_v39 = vld [vmem:[#allocation72_spill] sm:$0xff]  ;;  %v6850_v54 = vld [vmem:[#allocation70_spill] sm:$0xff] }
 0x25f   : > { %6846 = vst [vmem:[#allocation48_spill] sm:$0xff] %v5640_v58  ;;  %v1809_v47 = vmul.f32 %v4366_v55, %v1526_v50  ;;  %v5651_v14 = vmul.f32 %v6726_v25, %v1526_v50  ;;  %v1905_v11 = vadd.f32 %v1873_v3, %v5470_v16  ;;  %v1906_v61 = vadd.f32 %v1874_v31, %v5463_v53  ;;  %v6849_v20 = vld [vmem:[#allocation68_spill] sm:$0xff] }
 0x260   : > { %v5648_v38 = vadd.f32 %v1810_v6, %v6847_v57  ;;  %v5659_v29 = vmul.f32 %v6726_v25, %v1525_v48  ;;  %v2175_v58 = vadd.f32 %v2143_v5, %v2107_v40  ;;  %v2176_v13 = vadd.f32 %v2144_v22, %v2108_v43 }
 0x261   : > { %v5654_v45 = vadd.f32 %v1809_v47, %v6848_v39  ;;  %v2009_v9 = vmul.f32 %v6731_v8, %v6849_v20  ;;  %v2010_v7 = vmul.f32 %v6731_v8, %v6850_v54  ;;  %v1973_v6 = vadd.f32 %v1941_v32, %v1905_v11 }
 0x262   : > { %v1974_v57 = vadd.f32 %v1942_v28, %v1906_v61  ;;  %v2077_v47 = vmul.f32 %v6737_v36, %v6851_v17  ;;  %v2078_v16 = vmul.f32 %v6737_v36, %v6843_v2  ;;  %v2213_v53 = vadd.f32 %v5117_v19, %v2175_v58 }
 0x263   : > { %v2214_v3 = vadd.f32 %v5117_v19, %v2176_v13  ;;  %v2145_v5 = vmul.f32 %v5062_v24, %v1526_v50  ;;  %v2146_v22 = vmul.f32 %v5062_v24, %v1525_v48  ;;  %v2041_v31 = vadd.f32 %v2009_v9, %v1973_v6 }
 0x264   : > { %v2042_v40 = vadd.f32 %v2010_v7, %v1974_v57  ;;  %v463_v43 = vadd.s32 256, %v4325_v35  ;;  %v953_v28 = vadd.f32 %v5442_v41, %v5051_v18  ;;  %v2245_v32 = vmax.f32 %v2213_v53, 0.0 }
 0x265   : > { %v2246_v17 = vmax.f32 %v2214_v3, 0.0  ;;  %v6852_v39 = vrot.slane %v5467_v15, 7  ;;  %v464_v58 = vadd.s32 264, %v4325_v35  ;;  %v2109_v50 = vadd.f32 %v2077_v47, %v2041_v31 }
 0x266   : > { %v2110_v11 = vadd.f32 %v2078_v16, %v2042_v40  ;;  %v499_v48 = vand.u32 15, %v463_v43  ;;  %v999_v61 = vmax.f32 %v953_v28, 0.0  ;;  %v2277_v13 = vmin.f32 %v2245_v32, 6.0 }
 0x267   : > { %v5680_v2 = vsel %vm1580_vm1, %v1573_v1, %v6852_v39  ;;  %v2278_v9 = vmin.f32 %v2246_v17, 6.0  ;;  %v2177_v6 = vadd.f32 %v2145_v5, %v2109_v50  ;;  %v500_v3 = vand.u32 15, %v464_v58  ;;  %v6853_v39 = vld [vmem:[#allocation36_spill] sm:$0xff] }
 0x268   : > { %v1687_v7 = vmul.f32 %v4340_v44, %v5680_v2  ;;  %v5687_v18 = vmul.f32 %v4448_v33, %v5680_v2  ;;  %v2178_v57 = vadd.f32 %v2146_v22, %v2110_v11  ;;  %vm535_vm5 = vcmp.ne.s32.totalorder %v499_v48, 0 }
 0x269   : > { %v1035_v1 = vmin.f32 %v999_v61, 6.0  ;;  %v2304_v53 = vpack.c.bf16 %v2278_v9, %v2277_v13  ;;  %v956_v47 = vadd.f32 %v5442_v41, %v6853_v39  ;;  %v6854_v16 = vrot.slane %v5467_v15, 7 }
 0x26a   : > { %v2215_v40 = vadd.f32 %v5117_v19, %v2177_v6  ;;  %v2216_v43 = vadd.f32 %v5117_v19, %v2178_v57  ;;  %vm5706_vm6 = vcmp.ne.s32.totalorder %v500_v3, 15  ;;  %v1876_v17 = vmul.f32 %v4448_v33, %v6850_v54 }
 0x26b   : > { %v5696_v31 = vsel %vm1580_vm1, %v6854_v16, %v5561_v59  ;;  %v1359_v5 = vsel %vm535_vm5, %v1035_v1, 0.0  ;;  %v1576_v22 = vrot.slane %v1035_v1, 7  ;;  %3430 = vmatmul.mubr.bf16.gmra.mrb[8].mxu1 %v2304_v53  ;;  %v1651_v32 = vmul.f32 %v4350_v49, %v1035_v1 }
 0x26c   : > { %v5700_v28 = vrot.slane %v1359_v5, 1  ;;  %v5704_v41 = vmul.f32 %v6737_v36, %v1035_v1  ;;  %v2247_v58 = vmax.f32 %v2215_v40, 0.0  ;;  %v2248_v50 = vmax.f32 %v2216_v43, 0.0 }
 0x26d   : > { %v5713_v11 = vsel %vm1580_vm1, %v5561_v59, %v1576_v22  ;;  %v1000_v48 = vmax.f32 %v956_v47, 0.0  ;;  %v1719_v61 = vadd.f32 %v1687_v7, %v1651_v32  ;;  %v1688_v9 = vmul.f32 %v4340_v44, %v5696_v31  ;;  %v6858_v59 = vld [vmem:[#allocation64_spill] sm:$0xff] }
 0x26e   : > { %6855 = vst [vmem:[#allocation44_spill] sm:$0xff] %v5704_v41  ;;  %v5717_v13 = vmul.f32 %v4448_v33, %v5713_v11  ;;  %v5723_v6 = vmul.f32 %v4448_v33, %v5696_v31  ;;  %v2279_v57 = vmin.f32 %v2247_v58, 6.0  ;;  %v2280_v1 = vmin.f32 %v2248_v50, 6.0 }
 0x26f   : > { %v5725_v53 = vmin.f32 %v1000_v48, 6.0  ;;  %v6859_v3 = vrot.slane %v6858_v59, 1  ;;  %v5733_v39 = vadd.f32 %v5490_v26, %v1719_v61  ;;  %v1875_v40 = vmul.f32 %v4448_v33, %v6849_v20 }
 0x270   : > { %v2305_v43 = vpack.c.bf16 %v2280_v1, %v2279_v57  ;;  %v1908_v54 = vadd.f32 %v1876_v17, %v5609_v46 }
 0x271   : > { %v1523_v7 = vsel %vm1507_vm2, %v6859_v3, %v5156_v52  ;;  %v6860_v47 = vmov %v6859_v3  ;;  %v1468_v5 = vsel %vm5706_vm6, %v5725_v53, 0.0  ;;  %v1652_v26 = vmul.f32 %v4350_v49, %v5725_v53  ;;  %v6862_v49 = vld [vmem:[#allocation19_spill] sm:$0xff] }
 0x272   : > { %v1524_v44 = vsel %vm1507_vm2, %v6842_v21, %v6860_v47  ;;  %v1812_v16 = vmul.f32 %v4366_v55, %v1523_v7  ;;  %v1577_v58 = vrot.slane %v1468_v5, 7  ;;  %v5751_v50 = vmul.f32 %v6737_v36, %v5725_v53  ;;  %3433 = vmatprep.mubr.bf16.mxu1 %v2305_v43 }
 0x273   : > { %v1811_v21 = vmul.f32 %v4366_v55, %v1524_v44  ;;  %v1720_v20 = vadd.f32 %v1688_v9, %v1652_v26  ;;  %v1907_v61 = vadd.f32 %v1875_v40, %v5606_v30  ;;  %v1945_v57 = vmul.f32 %v6726_v25, %v1524_v44 }
 0x274   : > { %6861 = vst [vmem:[#allocation37_spill] sm:$0xff] %v5751_v50  ;;  %v5755_v48 = vadd.f32 %v1812_v16, %v5233_v37  ;;  %v5764_v1 = vsel %vm1580_vm1, %v1577_v58, %v6862_v49  ;;  %v5768_v3 = vsel %vm1580_vm1, %v1576_v22, %v1577_v58  ;;  %v1946_v9 = vmul.f32 %v6726_v25, %v1523_v7  ;;  %v6866_v58 = vld [vmem:[#allocation29_spill] sm:$0xff]  ;;  %v6871_v49 = vld [vmem:[#allocation23_spill] sm:$0xff] }
 0x275   : > { %6863 = vst [vmem:[#allocation50_spill] sm:$0xff] %v5764_v1  ;;  %v1843_v37 = vadd.f32 %v1811_v21, %v5186_v60  ;;  %v5773_v47 = vadd.f32 %v5568_v34, %v1720_v20  ;;  %v5777_v30 = vmul.f32 %v4448_v33, %v5768_v3  ;;  %v1975_v16 = vadd.f32 %v5651_v14, %v1907_v61  ;;  %v6865_v60 = vld [vmem:[#allocation58_spill] sm:$0xff]  ;;  %v6867_v14 = vld [vmem:[#allocation21_spill] sm:$0xff] }
 0x276   : > { %v2011_v40 = vmul.f32 %v6731_v8, %v4980_v10  ;;  %v2012_v22 = vmul.f32 %v6731_v8, %v4969_v42  ;;  %v2079_v43 = vmul.f32 %v6737_v36, %v6865_v60  ;;  %v2080_v34 = vmul.f32 %v6737_v36, %v6858_v59 }
 0x277   : > { %6864 = vst [vmem:[#allocation55_spill] sm:$0xff] %v5777_v30  ;;  %v1976_v5 = vadd.f32 %v5659_v29, %v1908_v54  ;;  %v2147_v26 = vmul.f32 %v5062_v24, %v1524_v44  ;;  %v2148_v46 = vmul.f32 %v5062_v24, %v1523_v7  ;;  %v6868_v21 = vrot.slane %v6867_v14, 1  ;;  %v6873_v30 = vld [vmem:[#allocation30_spill] sm:$0xff] }
 0x278   : > { %v2043_v17 = vadd.f32 %v2011_v40, %v1975_v16  ;;  %v1877_v29 = vmul.f32 %v4448_v33, %v4980_v10  ;;  %v1878_v54 = vmul.f32 %v4448_v33, %v4969_v42  ;;  %v6870_v40 = vld [vmem:[#allocation24_spill] sm:$0xff]  ;;  %vm3982_vm1 = vmmov 0  }
 0x279   : > { %v1521_v20 = vsel %vm1507_vm2, %v6868_v21, %v6866_v58  ;;  %v6869_v61 = vmov %v6868_v21  ;;  %v2044_v44 = vadd.f32 %v2012_v22, %v1976_v5  ;;  %v6872_v22 = vld [vmem:[#allocation22_spill] sm:$0xff] }
 0x27a   : > { %v1522_v60 = vsel %vm1507_vm2, %v5156_v52, %v6869_v61  ;;  %v1814_v59 = vmul.f32 %v4366_v55, %v1521_v20  ;;  %v2111_v16 = vadd.f32 %v2079_v43, %v2043_v17  ;;  %v1909_v50 = vadd.f32 %v1877_v29, %v5654_v45  ;;  %v6874_v17 = vld [vmem:[#allocation33_spill] sm:$0xff] }
 0x27b   : > { %v1813_v7 = vmul.f32 %v4366_v55, %v1522_v60  ;;  %v1947_v21 = vmul.f32 %v6726_v25, %v1522_v60  ;;  %v1948_v52 = vmul.f32 %v6726_v25, %v1521_v20  ;;  %v2112_v61 = vadd.f32 %v2080_v34, %v2044_v44 }
 0x27c   : > { %v5810_v32 = vadd.f32 %v1814_v59, %v6870_v40  ;;  %v1910_v10 = vadd.f32 %v1878_v54, %v5648_v38  ;;  %v2013_v5 = vmul.f32 %v6731_v8, %v6872_v22  ;;  %v2179_v42 = vadd.f32 %v2147_v26, %v2111_v16 }
 0x27d   : > { %v5815_v1 = vadd.f32 %v1813_v7, %v6871_v49  ;;  %v1977_v41 = vadd.f32 %v1945_v57, %v1909_v50  ;;  %v2014_v43 = vmul.f32 %v6731_v8, %v6873_v30  ;;  %v2081_v59 = vmul.f32 %v6737_v36, %v6874_v17  ;;  %v6875_v50 = vld [vmem:[#allocation27_spill] sm:$0xff] }
 0x27e   : > { %v2180_v45 = vadd.f32 %v2148_v46, %v2112_v61  ;;  %v1978_v29 = vadd.f32 %v1946_v9, %v1910_v10  ;;  %v2082_v34 = vmul.f32 %v6737_v36, %v6867_v14  ;;  %v2149_v49 = vmul.f32 %v5062_v24, %v1522_v60 }
 0x27f   : > { %v2217_v38 = vadd.f32 %v5117_v19, %v2179_v42  ;;  %v2045_v44 = vadd.f32 %v2013_v5, %v1977_v41  ;;  %v2150_v7 = vmul.f32 %v5062_v24, %v1521_v20  ;;  %v6876_v57 = vrot.slane %v6875_v50, 1 }
 0x280   : > { %v2218_v54 = vadd.f32 %v5117_v19, %v2180_v45  ;;  %v2046_v46 = vadd.f32 %v2014_v43, %v1978_v29  ;;  %v1879_v40 = vmul.f32 %v4448_v33, %v6872_v22  ;;  %v1880_v42 = vmul.f32 %v4448_v33, %v6873_v30 }
 0x281   : > { %v1519_v26 = vsel %vm1507_vm2, %v6876_v57, %v5347_v12  ;;  %v6877_v9 = vmov %v6876_v57  ;;  %v2249_v41 = vmax.f32 %v2217_v38, 0.0  ;;  %v2113_v16 = vadd.f32 %v2081_v59, %v2045_v44 }
 0x282   : > { %v1520_v14 = vsel %vm1507_vm2, %v6866_v58, %v6877_v9  ;;  %v1816_v60 = vmul.f32 %v4366_v55, %v1519_v26  ;;  %v2250_v61 = vmax.f32 %v2218_v54, 0.0  ;;  %v2114_v10 = vadd.f32 %v2082_v34, %v2046_v46 }
 0x283   : > { %v1815_v20 = vmul.f32 %v4366_v55, %v1520_v14  ;;  %v2281_v43 = vmin.f32 %v2249_v41, 6.0  ;;  %v2181_v17 = vadd.f32 %v2149_v49, %v2113_v16  ;;  %v1911_v45 = vadd.f32 %v1879_v40, %v1843_v37  ;;  %v6879_v40 = vld [vmem:[#allocation35_spill] sm:$0xff] }
 0x284   : > { %v5845_v5 = vadd.f32 %v1816_v60, %v5427_v4  ;;  %v2282_v59 = vmin.f32 %v2250_v61, 6.0  ;;  %v2182_v29 = vadd.f32 %v2150_v7, %v2114_v10  ;;  %v1912_v38 = vadd.f32 %v1880_v42, %v5755_v48  ;;  %v6878_v48 = vld [vmem:[#allocation34_spill] sm:$0xff] }
 0x285   : > { %v5850_v58 = vadd.f32 %v1815_v20, %v5367_v23  ;;  %v1949_v22 = vmul.f32 %v6726_v25, %v1520_v14  ;;  %v2219_v34 = vadd.f32 %v5117_v19, %v2181_v17  ;;  %v1950_v4 = vmul.f32 %v6726_v25, %v1519_v26  ;;  %v6880_v61 = vld [vmem:[#allocation54_spill] sm:$0xff] }
 0x286   : > { %v1979_v44 = vadd.f32 %v1947_v21, %v1911_v45  ;;  %v2015_v30 = vmul.f32 %v6731_v8, %v5209_v0  ;;  %v2306_v57 = vpack.c.bf16 %v2282_v59, %v2281_v43  ;;  %v2220_v49 = vadd.f32 %v5117_v19, %v2182_v29 }
 0x287   : > { %v1980_v23 = vadd.f32 %v1948_v52, %v1912_v38  ;;  %v2016_v37 = vmul.f32 %v6731_v8, %v5191_v62  ;;  %v2251_v7 = vmax.f32 %v2219_v34, 0.0  ;;  %v2083_v46 = vmul.f32 %v6737_v36, %v6878_v48 }
 0x288   : > { %v2047_v54 = vadd.f32 %v2015_v30, %v1979_v44  ;;  %v2084_v9 = vmul.f32 %v6737_v36, %v6875_v50  ;;  %3434 = vmatmul.mubr.bf16.gmra.mrb[12].mxu1 %v2306_v57  ;;  %v2252_v21 = vmax.f32 %v2220_v49, 0.0  ;;  %v2151_v41 = vmul.f32 %v5062_v24, %v1520_v14  ;;  %v6883_v30 = vld [vmem:[#allocation26_spill] sm:$0xff] }
 0x289   : > { %v2048_v60 = vadd.f32 %v2016_v37, %v1980_v23  ;;  %v2152_v16 = vmul.f32 %v5062_v24, %v1519_v26  ;;  %v2283_v20 = vmin.f32 %v2251_v7, 6.0  ;;  %v6881_v10 = vrot.slane %v6880_v61, 1 }
 0x28a   : > { %v2115_v52 = vadd.f32 %v2083_v46, %v2047_v54  ;;  %v2284_v17 = vmin.f32 %v2252_v21, 6.0  ;;  %v1881_v59 = vmul.f32 %v4448_v33, %v5209_v0  ;;  %v1882_v29 = vmul.f32 %v4448_v33, %v5191_v62  ;;  %v6885_v54 = vld [vmem:[#allocation39_spill] sm:$0xff]  ;;  %v6886_v46 = vld [vmem:[#allocation42_spill] sm:$0xff] }
 0x28b   : > { %v1517_v42 = vsel %vm1507_vm2, %v6881_v10, %v6879_v40  ;;  %v6882_v43 = vmov %v6881_v10  ;;  %v2116_v45 = vadd.f32 %v2084_v9, %v2048_v60  ;;  %v2017_v48 = vmul.f32 %v6731_v8, %v6885_v54  ;;  %v6887_v21 = vld [vmem:[#allocation43_spill] sm:$0xff] }
 0x28c   : > { %v1518_v50 = vsel %vm1507_vm2, %v5347_v12, %v6882_v43  ;;  %v1818_v24 = vmul.f32 %v4366_v55, %v1517_v42  ;;  %v2183_v26 = vadd.f32 %v2151_v41, %v2115_v52  ;;  %v2307_v34 = vpack.c.bf16 %v2284_v17, %v2283_v20  ;;  %v6884_v12 = vld [vmem:[#allocation49_spill] sm:$0xff]  ;;  %v5903_v52 = vld [vmem:[#allocation7 + $0x8] ss:$0 sm:$0xff] }
 0x28d   : > { %v1817_v14 = vmul.f32 %v4366_v55, %v1518_v50  ;;  %v1951_v38 = vmul.f32 %v6726_v25, %v1518_v50  ;;  %v2184_v44 = vadd.f32 %v2152_v16, %v2116_v45  ;;  %v1913_v37 = vadd.f32 %v1881_v59, %v5815_v1  ;;  %v6888_v43 = vld [vmem:[#allocation25_spill] sm:$0xff] }
 0x28e   : > { %v5888_v49 = vadd.f32 %v1818_v24, %v6884_v12  ;;  %v2221_v23 = vadd.f32 %v5117_v19, %v2183_v26  ;;  %v1914_v7 = vadd.f32 %v1882_v29, %v5810_v32  ;;  %v1952_v0 = vmul.f32 %v6726_v25, %v1517_v42  ;;  %3437 = vmatprep.mubr.bf16.mxu1 %v2307_v34 }
 0x28f   : > { %v5885_v57 = vadd.f32 %v1817_v14, %v6883_v30  ;;  %v2222_v62 = vadd.f32 %v5117_v19, %v2184_v44  ;;  %v2018_v9 = vmul.f32 %v6731_v8, %v6886_v46  ;;  %v2085_v60 = vmul.f32 %v6737_v36, %v6887_v21  ;;  %v6891_v21 = vld [vmem:[#allocation45_spill] sm:$0xff] }
 0x290   : > { %v2253_v41 = vmax.f32 %v2221_v23, 0.0  ;;  %v1981_v16 = vadd.f32 %v1949_v22, %v1913_v37  ;;  %v1982_v20 = vadd.f32 %v1950_v4, %v1914_v7  ;;  %v2086_v32 = vmul.f32 %v6737_v36, %v6880_v61 }
 0x291   : > { %v2254_v1 = vmax.f32 %v2222_v62, 0.0  ;;  %v2153_v19 = vmul.f32 %v5903_v52, %v1518_v50  ;;  %v2154_v10 = vmul.f32 %v5903_v52, %v1517_v42  ;;  %v6889_v17 = vrot.slane %v6888_v43, 1 }
 0x292   : > { %v2285_v14 = vmin.f32 %v2253_v41, 6.0  ;;  %v2049_v24 = vadd.f32 %v2017_v48, %v1981_v16  ;;  %v2050_v22 = vadd.f32 %v2018_v9, %v1982_v20  ;;  %v1883_v59 = vmul.f32 %v4448_v33, %v6885_v54 }
 0x293   : > { %v1515_v45 = vsel %vm1507_vm2, %v6889_v17, %v5539_v63  ;;  %v6890_v4 = vmov %v6889_v17  ;;  %v2286_v26 = vmin.f32 %v2254_v1, 6.0  ;;  %v1884_v44 = vmul.f32 %v4448_v33, %v6886_v46 }
 0x294   : > { %v1516_v61 = vsel %vm1507_vm2, %v6879_v40, %v6890_v4  ;;  %v1820_v42 = vmul.f32 %v4366_v55, %v1515_v45  ;;  %v2117_v29 = vadd.f32 %v2085_v60, %v2049_v24  ;;  %v2118_v34 = vadd.f32 %v2086_v32, %v2050_v22  ;;  %v6892_v60 = vld [vmem:[#allocation40_spill] sm:$0xff] }
 0x295   : > { %v1819_v50 = vmul.f32 %v4366_v55, %v1516_v61  ;;  %v1953_v30 = vmul.f32 %v6726_v25, %v1516_v61  ;;  %v2308_v12 = vpack.c.bf16 %v2286_v26, %v2285_v14  ;;  %v1915_v37 = vadd.f32 %v1883_v59, %v5850_v58  ;;  %v5942_v58 = vld [vmem:[%s6477_s4] ss:$0 sm:$0xff] }
 0x296   : > { %v5928_v40 = vadd.f32 %v1820_v42, %v5615_v51  ;;  %v2185_v7 = vadd.f32 %v2153_v19, %v2117_v29  ;;  %v2186_v62 = vadd.f32 %v2154_v10, %v2118_v34  ;;  %v1916_v54 = vadd.f32 %v1884_v44, %v5845_v5  ;;  %v6893_v19 = vld [vmem:[#allocation38_spill] sm:$0xff]  ;;  %v6894_v10 = vld [vmem:[#allocation41_spill] sm:$0xff] }
 0x297   : > { %v5925_v23 = vadd.f32 %v1819_v50, %v5558_v56  ;;  %v1954_v48 = vmul.f32 %v6726_v25, %v1515_v45  ;;  %3438 = vmatmul.mubr.bf16.gmra.mrb[16].mxu1 %v2308_v12  ;;  %v1983_v9 = vadd.f32 %v1951_v38, %v1915_v37  ;;  %v2019_v46 = vmul.f32 %v6731_v8, %v5416_v27  ;;  %v6897_v12 = vld [vmem:[#allocation62_spill] sm:$0xff] }
 0x298   : > { %v2020_v56 = vmul.f32 %v6731_v8, %v6891_v21  ;;  %v2087_v51 = vmul.f32 %v6737_v36, %v6892_v60  ;;  %v2223_v5 = vadd.f32 %v5942_v58, %v2185_v7  ;;  %v2224_v41 = vadd.f32 %v5942_v58, %v2186_v62  ;;  %v6898_v7 = vld [vmem:[#allocation48_spill] sm:$0xff] }
 0x299   : > { %v1984_v16 = vadd.f32 %v1952_v0, %v1916_v54  ;;  %v2088_v38 = vmul.f32 %v6737_v36, %v6888_v43  ;;  %v2051_v20 = vadd.f32 %v2019_v46, %v1983_v9  ;;  %v2155_v32 = vmul.f32 %v5903_v52, %v1516_v61 }
 0x29a   : > { %v2156_v1 = vmul.f32 %v5903_v52, %v1515_v45  ;;  %v6895_v17 = vrot.slane %v6894_v10, 1  ;;  %v2255_v24 = vmax.f32 %v2223_v5, 0.0  ;;  %v2256_v22 = vmax.f32 %v2224_v41, 0.0  ;;  %v6899_v5 = vld [vmem:[#allocation51_spill] sm:$0xff] }
 0x29b   : > { %v2052_v4 = vadd.f32 %v2020_v56, %v1984_v16  ;;  %v2119_v43 = vadd.f32 %v2087_v51, %v2051_v20  ;;  %v1885_v50 = vmul.f32 %v4448_v33, %v5416_v27  ;;  %v1886_v34 = vmul.f32 %v4448_v33, %v6891_v21  ;;  %v6901_v20 = vld [vmem:[#allocation28_spill] sm:$0xff] }
 0x29c   : > { %v1513_v14 = vsel %vm1507_vm2, %v6895_v17, %v6893_v19  ;;  %v6896_v26 = vmov %v6895_v17  ;;  %v2287_v42 = vmin.f32 %v2255_v24, 6.0  ;;  %v2288_v59 = vmin.f32 %v2256_v22, 6.0 }
 0x29d   : > { %v1514_v0 = vsel %vm1507_vm2, %v5539_v63, %v6896_v26  ;;  %v1822_v45 = vmul.f32 %v4366_v55, %v1513_v14  ;;  %v2120_v29 = vadd.f32 %v2088_v38, %v2052_v4  ;;  %v2187_v44 = vadd.f32 %v2155_v32, %v2119_v43  ;;  %v6900_v38 = vld [vmem:[#allocation32_spill] sm:$0xff]  ;;  %v6902_v26 = vld [vmem:[#allocation31_spill] sm:$0xff] }
 0x29e   : > { %v1821_v61 = vmul.f32 %v4366_v55, %v1514_v0  ;;  %v1917_v63 = vadd.f32 %v1885_v50, %v5885_v57  ;;  %v2309_v54 = vpack.c.bf16 %v2288_v59, %v2287_v42  ;;  %v1918_v46 = vadd.f32 %v1886_v34, %v5888_v49 }
 0x29f   : > { %v1854_v62 = vadd.f32 %v1822_v45, %v6898_v7  ;;  %v2188_v9 = vadd.f32 %v2156_v1, %v2120_v29  ;;  %v1955_v56 = vmul.f32 %v6726_v25, %v1514_v0  ;;  %v2225_v27 = vadd.f32 %v5942_v58, %v2187_v44 }
 0x2a0   : > { %v1853_v37 = vadd.f32 %v1821_v61, %v6897_v12  ;;  %v1956_v60 = vmul.f32 %v6726_v25, %v1513_v14  ;;  %v1985_v51 = vadd.f32 %v1953_v30, %v1917_v63  ;;  %v2021_v21 = vmul.f32 %v6731_v8, %v6899_v5  ;;  %3441 = vmatprep.mubr.bf16.mxu1 %v2309_v54 }
 0x2a1   : > { %v2226_v41 = vadd.f32 %v5942_v58, %v2188_v9  ;;  %v1986_v16 = vadd.f32 %v1954_v48, %v1918_v46  ;;  %v2022_v57 = vmul.f32 %v6731_v8, %v6900_v38  ;;  %v2089_v49 = vmul.f32 %v6737_v36, %v6901_v20 }
 0x2a2   : > { %v2257_v32 = vmax.f32 %v2225_v27, 0.0  ;;  %v2053_v1 = vadd.f32 %v2021_v21, %v1985_v51  ;;  %v2090_v17 = vmul.f32 %v6737_v36, %v6894_v10  ;;  %v2157_v30 = vmul.f32 %v5903_v52, %v1514_v0 }
 0x2a3   : > { %v2258_v24 = vmax.f32 %v2226_v41, 0.0  ;;  %v2054_v22 = vadd.f32 %v2022_v57, %v1986_v16  ;;  %v2158_v4 = vmul.f32 %v5903_v52, %v1513_v14  ;;  %v6903_v48 = vrot.slane %v6902_v26, 1  ;;  %v6905_v57 = vld [vmem:[#allocation20_spill] sm:$0xff] }
 0x2a4   : > { %v2289_v61 = vmin.f32 %v2257_v32, 6.0  ;;  %v2121_v45 = vadd.f32 %v2089_v49, %v2053_v1  ;;  %v1887_v29 = vmul.f32 %v4448_v33, %v6899_v5  ;;  %v1888_v12 = vmul.f32 %v4448_v33, %v6900_v38 }
 0x2a5   : > { %v1511_v43 = vsel %vm1507_vm2, %v6903_v48, %v5700_v28  ;;  %v6904_v50 = vmov %v6903_v48  ;;  %v2290_v42 = vmin.f32 %v2258_v24, 6.0  ;;  %v2122_v59 = vadd.f32 %v2090_v17, %v2054_v22 }
 0x2a6   : > { %v1512_v10 = vsel %vm1507_vm2, %v6893_v19, %v6904_v50  ;;  %v1824_v0 = vmul.f32 %v4366_v55, %v1511_v43  ;;  %v2189_v34 = vadd.f32 %v2157_v30, %v2121_v45  ;;  %v1919_v9 = vadd.f32 %v1887_v29, %v5925_v23  ;;  %v6911_v29 = vld [vmem:[#allocation19_spill] sm:$0xff] }
 0x2a7   : > { %v1823_v14 = vmul.f32 %v4366_v55, %v1512_v10  ;;  %v1957_v7 = vmul.f32 %v6726_v25, %v1512_v10  ;;  %v2310_v63 = vpack.c.bf16 %v2290_v42, %v2289_v61  ;;  %v2190_v54 = vadd.f32 %v2158_v4, %v2122_v59  ;;  %v6909_v42 = vld [vmem:[#allocation44_spill] sm:$0xff] }
 0x2a8   : > { %v1856_v44 = vadd.f32 %v1824_v0, %v5773_v47  ;;  %v2227_v46 = vadd.f32 %v5942_v58, %v2189_v34  ;;  %v1920_v55 = vadd.f32 %v1888_v12, %v5928_v40  ;;  %v1958_v27 = vmul.f32 %v6726_v25, %v1511_v43 }
 0x2a9   : > { %v1855_v19 = vadd.f32 %v1823_v14, %v5733_v39  ;;  %v2023_v47 = vmul.f32 %v6731_v8, %v5680_v2  ;;  %3442 = vmatmul.mubr.bf16.gmra.mrb[20].mxu1 %v2310_v63  ;;  %v2228_v33 = vadd.f32 %v5942_v58, %v2190_v54  ;;  %v1987_v51 = vadd.f32 %v1955_v56, %v1919_v9  ;;  %v6910_v14 = vld [vmem:[#allocation50_spill] sm:$0xff] }
 0x2aa   : > { %v2024_v5 = vmul.f32 %v6731_v8, %v5696_v31  ;;  %v2091_v39 = vmul.f32 %v6737_v36, %v5467_v15  ;;  %v2259_v23 = vmax.f32 %v2227_v46, 0.0  ;;  %v1988_v21 = vadd.f32 %v1956_v60, %v1920_v55 }
 0x2ab   : > { %v2092_v40 = vmul.f32 %v6737_v36, %v6902_v26  ;;  %v2159_v41 = vmul.f32 %v5903_v52, %v1512_v10  ;;  %v2260_v16 = vmax.f32 %v2228_v33, 0.0  ;;  %v2055_v38 = vadd.f32 %v2023_v47, %v1987_v51  ;;  %v6908_v10 = vld [vmem:[#allocation55_spill] sm:$0xff] }
 0x2ac   : > { %v2160_v2 = vmul.f32 %v5903_v52, %v1511_v43  ;;  %v6906_v56 = vrot.slane %v5725_v53, 1  ;;  %v2291_v20 = vmin.f32 %v2259_v23, 6.0  ;;  %v2056_v49 = vadd.f32 %v2024_v5, %v1988_v21 }
 0x2ad   : > { %v1921_v32 = vadd.f32 %v5687_v18, %v1853_v37  ;;  %v2292_v1 = vmin.f32 %v2260_v16, 6.0  ;;  %v2123_v17 = vadd.f32 %v2091_v39, %v2055_v38  ;;  %v1922_v30 = vadd.f32 %v5723_v6, %v1854_v62 }
 0x2ae   : > { %v1509_v31 = vsel %vm1507_vm2, %v6906_v56, %v6905_v57  ;;  %v6907_v15 = vmov %v6906_v56  ;;  %v2124_v22 = vadd.f32 %v2092_v40, %v2056_v49  ;;  %v2025_v48 = vmul.f32 %v6731_v8, %v5713_v11 }
 0x2af   : > { %v1510_v60 = vsel %vm1507_vm2, %v5700_v28, %v6907_v15  ;;  %v1960_v4 = vmul.f32 %v6726_v25, %v1509_v31  ;;  %v1989_v26 = vadd.f32 %v1957_v7, %v1921_v32  ;;  %v2311_v53 = vpack.c.bf16 %v2292_v1, %v2291_v20  ;;  %v6912_v7 = vld [vmem:[#allocation37_spill] sm:$0xff]  ;;  %v2618_v32 = vld [vmem:[#allocation10] sm:$0xff]  ;;  %v2619_v1 = vld [vmem:[#allocation10 + $0x8] sm:$0xff] }
 0x2b0   : > { %v1959_v24 = vmul.f32 %v6726_v25, %v1510_v60  ;;  %v2191_v43 = vadd.f32 %v2159_v41, %v2123_v17  ;;  %v1990_v61 = vadd.f32 %v1958_v27, %v1922_v30  ;;  %v2026_v28 = vmul.f32 %v6731_v8, %v5768_v3 }
 0x2b1   : > { %v2192_v18 = vadd.f32 %v2160_v2, %v2124_v22  ;;  %v2057_v37 = vadd.f32 %v2025_v48, %v1989_v26  ;;  %v2161_v45 = vmul.f32 %v5903_v52, %v1510_v60  ;;  %v2162_v6 = vmul.f32 %v5903_v52, %v1509_v31  ;;  %3445 = vmatprep.mubr.bf16.mxu1 %v2311_v53  ;;  %v2623_v26 = vld [vmem:[#allocation10 + $0x28] sm:$0xff]  ;;  %v2624_v53 = vld [vmem:[#allocation10 + $0x30] sm:$0xff] }
 0x2b2   : > { %v2229_v62 = vadd.f32 %v5942_v58, %v2191_v43  ;;  %v2058_v25 = vadd.f32 %v2026_v28, %v1990_v61  ;;  %v1923_v50 = vadd.f32 %v5717_v13, %v1855_v19  ;;  %v1924_v11 = vadd.f32 %v6908_v10, %v1856_v44  ;;  %v2625_v43 = vld [vmem:[#allocation10 + $0x38] sm:$0xff] }
 0x2b3   : > { %v2230_v0 = vadd.f32 %v5942_v58, %v2192_v18  ;;  %v2125_v59 = vadd.f32 %v6909_v42, %v2057_v37  ;;  %v2027_v3 = vmul.f32 %v6731_v8, %v6910_v14  ;;  %v2028_v34 = vmul.f32 %v6731_v8, %v6911_v29  ;;  %v2629_v10 = vld [vmem:[#allocation10 + $0x58] sm:$0xff]  ;;  %v2631_v29 = vld [vmem:[#allocation10 + $0x68] sm:$0xff] }
 0x2b4   : > { %v2261_v12 = vmax.f32 %v2229_v62, 0.0  ;;  %v2126_v63 = vadd.f32 %v6912_v7, %v2058_v25  ;;  %v1991_v54 = vadd.f32 %v1959_v24, %v1923_v50  ;;  %v1992_v9 = vadd.f32 %v1960_v4, %v1924_v11  ;;  %v2621_v24 = vld [vmem:[#allocation10 + $0x18] sm:$0xff]  ;;  %v2622_v4 = vld [vmem:[#allocation10 + $0x20] sm:$0xff]  ;;  %v2627_v62 = vld [vmem:[#allocation10 + $0x48] sm:$0xff] }
 0x2b5   : > { %v2262_v46 = vmax.f32 %v2230_v0, 0.0  ;;  %v2193_v55 = vadd.f32 %v2161_v45, %v2125_v59  ;;  %v2095_v13 = vmul.f32 0.0, %v6737_v36  ;;  %v2163_v47 = vmul.f32 %v5903_v52, %v6905_v57  ;;  %v2628_v50 = vld [vmem:[#allocation10 + $0x50] sm:$0xff]  ;;  %v2633_v7 = vld [vmem:[#allocation10 + $0x78] sm:$0xff] }
 0x2b6   : > { %v2194_v44 = vadd.f32 %v2162_v6, %v2126_v63  ;;  %v2059_v19 = vadd.f32 %v2027_v3, %v1991_v54  ;;  %v2060_v27 = vadd.f32 %v2028_v34, %v1992_v9  ;;  %v2293_v33 = vmin.f32 %v2261_v12, 6.0  ;;  %v2626_v6 = vld [vmem:[#allocation10 + $0x40] sm:$0xff]  ;;  %v2632_v34 = vld [vmem:[#allocation10 + $0x70] sm:$0xff] }
 0x2b7   : > { %v2294_v51 = vmin.f32 %v2262_v46, 6.0  ;;  %v2231_v5 = vadd.f32 %v5942_v58, %v2193_v55  ;;  %v3981_v17 = vmov 0.0|0.0   ;;  %v3524_v30 = vpack.c.bf16 %v2619_v1, %v2618_v32  ;;  %v2630_v3 = vld [vmem:[#allocation10 + $0x60] sm:$0xff]  ;;  %v6071_v9 = vld [vmem:[%s6479_s6] ss:$0 sm:$0xff]  ;;  %v2706_v55 = vld [vmem:[#allocation11 + $0x8] sm:$0xff] }
 0x2b8   : > { %v2232_v8 = vadd.f32 %v5942_v58, %v2194_v44  ;;  %v2127_v39 = vadd.f32 %v2095_v13, %v2059_v19  ;;  %v2128_v23 = vadd.f32 %v2095_v13, %v2060_v27  ;;  %3523 = vmatprep.subr.bf16.mxu1 %v3981_v17  ;;  %3547 = vmatprep.subr.bf16.mxu0 %v3981_v17  ;;  %v6913_v63 = vmov 0.0   ;;  %v2705_v46 = vld [vmem:[#allocation11] sm:$0xff]  ;;  %v2707_v13 = vld [vmem:[#allocation11 + $0x10] sm:$0xff]  ;;  %v2708_v27 = vld [vmem:[#allocation11 + $0x18] sm:$0xff] }
 0x2b9   : > { %v2312_v21 = vpack.c.bf16 %v2294_v51, %v2293_v33  ;;  %v2263_v40 = vmax.f32 %v2231_v5, 0.0  ;;  %3525 = vmatpush3.bf16.msra.mxu1 %v3524_v30  ;;  %v3530_v48 = vpack.c.bf16 %v2623_v26, %v2622_v4  ;;  %v3533_v61 = vpack.c.bf16 %v2625_v43, %v2624_v53  ;;  %3520 = vmatprep.mubr.msk.f32.mxu0 %vm3982_vm1, %v6913_v63  ;;  %v2709_v51 = vld [vmem:[#allocation11 + $0x20] sm:$0xff]  ;;  %v2710_v5 = vld [vmem:[#allocation11 + $0x28] sm:$0xff]  ;;  %v2719_v53 = vld [vmem:[#allocation11 + $0x70] sm:$0xff] }
 0x2ba   : > { %v2264_v41 = vmax.f32 %v2232_v8, 0.0  ;;  %v2195_v16 = vadd.f32 %v2163_v47, %v2127_v39  ;;  %v2196_v38 = vadd.f32 %v2163_v47, %v2128_v23  ;;  %3526 = vmatprep.subr.bf16.mxu1 %v3981_v17  ;;  %v3536_v25 = vpack.c.bf16 %v2627_v62, %v2626_v6  ;;  %v2720_v43 = vld [vmem:[#allocation11 + $0x78] sm:$0xff] }
 0x2bb   : > { %3446 = vmatmul.mubr.bf16.gmra.mrb[24].mxu1 %v2312_v21  ;;  %v2295_v36 = vmin.f32 %v2263_v40, 6.0  ;;  %v3539_v11 = vpack.c.bf16 %v2629_v10, %v2628_v50  ;;  %v3542_v12 = vpack.c.bf16 %v2631_v29, %v2630_v3  ;;  %v3545_v54 = vpack.c.bf16 %v2633_v7, %v2632_v34  ;;  %v2711_v21 = vld [vmem:[#allocation11 + $0x30] sm:$0xff]  ;;  %v2712_v40 = vld [vmem:[#allocation11 + $0x38] sm:$0xff] }
 0x2bc   : > { %v2296_v2 = vmin.f32 %v2264_v41, 6.0  ;;  %v2233_v56 = vadd.f32 %v5942_v58, %v2195_v16  ;;  %v2234_v52 = vadd.f32 %v5942_v58, %v2196_v38  ;;  %v2620_v58 = vld [vmem:[#allocation10 + $0x10] sm:$0xff]  ;;  %v3548_v19 = vpack.c.bf16 %v2706_v55, %v2705_v46 }
 0x2bd   : > { %v3527_v22 = vpack.c.bf16 %v2621_v24, %v2620_v58  ;;  %v3551_v33 = vpack.c.bf16 %v2708_v27, %v2707_v13  ;;  %v3554_v23 = vpack.c.bf16 %v2710_v5, %v2709_v51  ;;  %v3557_v38 = vpack.c.bf16 %v2712_v40, %v2711_v21  ;;  %v2717_v58 = vld [vmem:[#allocation11 + $0x60] sm:$0xff]  ;;  %v2718_v24 = vld [vmem:[#allocation11 + $0x68] sm:$0xff] }
 0x2be   : > { %v2313_v57 = vpack.c.bf16 %v2296_v2, %v2295_v36  ;;  %v2265_v31 = vmax.f32 %v2233_v56, 0.0  ;;  %v2266_v20 = vmax.f32 %v2234_v52, 0.0  ;;  %3549 = vmatpush3.bf16.msra.mxu0 %v3548_v19  ;;  %v2713_v36 = vld [vmem:[#allocation11 + $0x40] sm:$0xff]  ;;  %v2714_v2 = vld [vmem:[#allocation11 + $0x48] sm:$0xff] }
 0x2bf   : > { %3528 = vmatpush3.bf16.msra.mxu1 %v3527_v22  ;;  %3550 = vmatprep.subr.bf16.mxu0 %v3981_v17 }
 0x2c0   : > { %3449 = vmatprep.mubr.bf16.mxu1 %v2313_v57  ;;  %v2297_v49 = vmin.f32 %v2265_v31, 6.0  ;;  %v2298_v15 = vmin.f32 %v2266_v20, 6.0  ;;  %3529 = vmatprep.subr.bf16.mxu1 %v3981_v17  ;;  %v3560_v57 = vpack.c.bf16 %v2714_v2, %v2713_v36  ;;  %v2715_v31 = vld [vmem:[#allocation11 + $0x50] sm:$0xff]  ;;  %v2716_v20 = vld [vmem:[#allocation11 + $0x58] sm:$0xff] }
 0x2c1   : > { %v3563_v1 = vpack.c.bf16 %v2716_v20, %v2715_v31 }
 0x2c2   : > { %v2314_v60 = vpack.c.bf16 %v2298_v15, %v2297_v49  ;;  %3552 = vmatpush3.bf16.msra.mxu0 %v3551_v33 }
 0x2c3   : > { %3531 = vmatpush3.bf16.msra.mxu1 %v3530_v48  ;;  %3553 = vmatprep.subr.bf16.mxu0 %v3981_v17  ;;  %v3566_v48 = vpack.c.bf16 %v2718_v24, %v2717_v58 }
 0x2c4   : > { %3450 = vmatmul.mubr.bf16.gmra.mrb[28].mxu1 %v2314_v60  ;;  %3532 = vmatprep.subr.bf16.mxu1 %v3981_v17 }
 0x2c5   : > { %3485 = vmatprep.mubr.msk.f32.mxu1 %vm3982_vm1, %v6913_v63 }
 0x2c6   : > { %3555 = vmatpush3.bf16.msra.mxu0 %v3554_v23 }
 0x2c7   : > { %3534 = vmatpush3.bf16.msra.mxu1 %v3533_v61  ;;  %3556 = vmatprep.subr.bf16.mxu0 %v3981_v17 }
 0x2c8   : > { %3535 = vmatprep.subr.bf16.mxu1 %v3981_v17 }
 0x2ca   : > { %3558 = vmatpush3.bf16.msra.mxu0 %v3557_v38 }
 0x2cb   : > { %3537 = vmatpush3.bf16.msra.mxu1 %v3536_v25  ;;  %3559 = vmatprep.subr.bf16.mxu0 %v3981_v17 }
 0x2cc   : > { %3538 = vmatprep.subr.bf16.mxu1 %v3981_v17 }
 0x2ce   : > { %3561 = vmatpush3.bf16.msra.mxu0 %v3560_v57 }
 0x2cf   : > { %3540 = vmatpush3.bf16.msra.mxu1 %v3539_v11  ;;  %3562 = vmatprep.subr.bf16.mxu0 %v3981_v17 }
 0x2d0   : > { %3541 = vmatprep.subr.bf16.mxu1 %v3981_v17 }
 0x2d2   : > { %3564 = vmatpush3.bf16.msra.mxu0 %v3563_v1 }
 0x2d3   : > { %3543 = vmatpush3.bf16.msra.mxu1 %v3542_v12  ;;  %3565 = vmatprep.subr.bf16.mxu0 %v3981_v17 }
 0x2d4   : > { %3544 = vmatprep.subr.bf16.mxu1 %v3981_v17 }
 0x2d6   : > { %3567 = vmatpush3.bf16.msra.mxu0 %v3566_v48 }
 0x2d7   : > { %3546 = vmatpush3.bf16.msra.mxu1 %v3545_v54  ;;  %3568 = vmatprep.subr.bf16.mxu0 %v3981_v17 }
 0x300   : > { %v3423_v28 = vpop.f32.mrb[0].mxu1 }
 0x301   : > { %v2420_v18 = vpop.f32.mrb[1].mxu1  ;;  %v6083_v39 = vadd.f32 %v3423_v28, %v6071_v9 }
 0x302   : > { %v3424_v37 = vpop.f32.mrb[2].mxu1  ;;  %v6077_v47 = vadd.f32 %v6071_v9, %v2420_v18  ;;  %v3569_v18 = vpack.c.bf16 %v2720_v43, %v2719_v53 }
 0x303   : > { %v2423_v45 = vpop.f32.mrb[3].mxu1  ;;  %v6088_v16 = vadd.f32 %v3424_v37, %v6071_v9 }
 0x304   : > { %v6074_v44 = vadd.f32 %v6071_v9, %v2423_v45  ;;  %3570 = vmatpush3.bf16.msra.mxu0 %v3569_v18 }
 0x306   : > { %v2579_v8 = vadd.f32 %v6074_v44, %v6077_v47 }
 0x308   : > { %v2580_v41 = vadd.f32 %v2579_v8, %v6083_v39 }
 0x30a   : > { %v2581_v52 = vadd.f32 %v2580_v41, %v6088_v16 }
 0x31e   : > { %v3427_v0 = vpop.f32.mrb[4].mxu1 }
 0x31f   : > { %v2436_v42 = vpop.f32.mrb[5].mxu1  ;;  %v6103_v26 = vadd.f32 %v3427_v0, %v6071_v9 }
 0x320   : > { %v6063_v59 = vpop.f32.mrb[6].mxu1  ;;  %v6092_v56 = vadd.f32 %v6071_v9, %v2436_v42 }
 0x321   : > { %v2439_v14 = vpop.f32.mrb[7].mxu1  ;;  %v6109_v28 = vadd.f32 %v6063_v59, %v6071_v9 }
 0x322   : > { %v2582_v49 = vadd.f32 %v2581_v52, %v6092_v56  ;;  %v6098_v15 = vadd.f32 %v6071_v9, %v2439_v14 }
 0x324   : > { %v2583_v22 = vadd.f32 %v2582_v49, %v6098_v15 }
 0x326   : > { %v2584_v61 = vadd.f32 %v2583_v22, %v6103_v26 }
 0x328   : > { %v2585_v45 = vadd.f32 %v2584_v61, %v6109_v28 }
 0x33e   : > { %v3431_v60 = vpop.f32.mrb[8].mxu1 }
 0x33f   : > { %v2452_v32 = vpop.f32.mrb[9].mxu1  ;;  %v6122_v50 = vadd.f32 %v3431_v60, %v6071_v9 }
 0x340   : > { %v3432_v30 = vpop.f32.mrb[10].mxu1  ;;  %v6113_v37 = vadd.f32 %v6071_v9, %v2452_v32 }
 0x341   : > { %v2455_v4 = vpop.f32.mrb[11].mxu1  ;;  %v6126_v17 = vadd.f32 %v3432_v30, %v6071_v9 }
 0x342   : > { %v2586_v6 = vadd.f32 %v2585_v45, %v6113_v37  ;;  %v6118_v62 = vadd.f32 %v6071_v9, %v2455_v4 }
 0x344   : > { %v2587_v25 = vadd.f32 %v2586_v6, %v6118_v62 }
 0x346   : > { %v2588_v10 = vadd.f32 %v2587_v25, %v6122_v50 }
 0x348   : > { %v2589_v0 = vadd.f32 %v2588_v10, %v6126_v17 }
 0x35b   : > { %v3435_v11 = vpop.f32.mrb[12].mxu1 }
 0x35c   : > { %v2468_v42 = vpop.f32.mrb[13].mxu1  ;;  %v6138_v7 = vadd.f32 %v3435_v11, %v6071_v9 }
 0x35d   : > { %v6130_v59 = vadd.f32 %v6071_v9, %v2468_v42  ;;  %v3436_v14 = vpop.f32.mrb[14].mxu1 }
 0x35e   : > { %v2471_v3 = vpop.f32.mrb[15].mxu1  ;;  %v6142_v54 = vadd.f32 %v3436_v14, %v6071_v9 }
 0x35f   : > { %v2590_v29 = vadd.f32 %v2589_v0, %v6130_v59  ;;  %v6134_v34 = vadd.f32 %v6071_v9, %v2471_v3 }
 0x361   : > { %v2591_v12 = vadd.f32 %v2590_v29, %v6134_v34 }
 0x363   : > { %v2592_v63 = vadd.f32 %v2591_v12, %v6138_v7 }
 0x365   : > { %v2593_v19 = vadd.f32 %v2592_v63, %v6142_v54 }
 0x36a   : > { %v3439_v46 = vpop.f32.mrb[16].mxu1 }
 0x36b   : > { %v2484_v55 = vpop.f32.mrb[17].mxu1  ;;  %v6154_v23 = vadd.f32 %v3439_v46, %v6071_v9 }
 0x36c   : > { %v6145_v13 = vadd.f32 %v6071_v9, %v2484_v55  ;;  %v3440_v27 = vpop.f32.mrb[18].mxu1 }
 0x36d   : > { %v2487_v33 = vpop.f32.mrb[19].mxu1  ;;  %v6158_v40 = vadd.f32 %v3440_v27, %v6071_v9 }
 0x36e   : > { %v2594_v51 = vadd.f32 %v2593_v19, %v6145_v13  ;;  %v6150_v5 = vadd.f32 %v6071_v9, %v2487_v33 }
 0x370   : > { %v2595_v8 = vadd.f32 %v2594_v51, %v6150_v5 }
 0x372   : > { %v2596_v21 = vadd.f32 %v2595_v8, %v6154_v23 }
 0x374   : > { %v2597_v36 = vadd.f32 %v2596_v21, %v6158_v40 }
 0x37c   : > { %v3443_v41 = vpop.f32.mrb[20].mxu1 }
 0x37d   : > { %v2500_v38 = vpop.f32.mrb[21].mxu1  ;;  %v6170_v60 = vadd.f32 %v3443_v41, %v6071_v9 }
 0x37e   : > { %v6162_v2 = vadd.f32 %v6071_v9, %v2500_v38  ;;  %v3444_v52 = vpop.f32.mrb[22].mxu1 }
 0x37f   : > { %v2503_v57 = vpop.f32.mrb[23].mxu1  ;;  %v6174_v1 = vadd.f32 %v3444_v52, %v6071_v9 }
 0x380   : > { %v2598_v31 = vadd.f32 %v2597_v36, %v6162_v2  ;;  %v6166_v20 = vadd.f32 %v6071_v9, %v2503_v57 }
 0x382   : > { %v2599_v49 = vadd.f32 %v2598_v31, %v6166_v20 }
 0x384   : > { %v2600_v32 = vadd.f32 %v2599_v49, %v6170_v60 }
 0x386   : > { %v2601_v58 = vadd.f32 %v2600_v32, %v6174_v1 }
 0x38e   : > { %v3447_v30 = vpop.f32.mrb[24].mxu1 }
 0x38f   : > { %v2516_v24 = vpop.f32.mrb[25].mxu1  ;;  %v6185_v61 = vadd.f32 %v3447_v30, %v6071_v9 }
 0x390   : > { %v6178_v22 = vadd.f32 %v6071_v9, %v2516_v24  ;;  %v3448_v4 = vpop.f32.mrb[26].mxu1  ;;  %v6210_v24 = vld [vmem:[%s4289_s9 + $0x10] sm:$0xff]  }
 0x391   : > { %v2519_v48 = vpop.f32.mrb[27].mxu1  ;;  %v6189_v45 = vadd.f32 %v3448_v4, %v6071_v9  ;;  %v6213_v4 = vld [vmem:[%s4289_s9 + $0x8] sm:$0xff]  }
 0x392   : > { %v2602_v53 = vadd.f32 %v2601_v58, %v6178_v22  ;;  %v6182_v43 = vadd.f32 %v6071_v9, %v2519_v48  ;;  %v6216_v48 = vld [vmem:[%s4289_s9 + $0x20] sm:$0xff]  }
 0x394   : > { %v2603_v18 = vadd.f32 %v2602_v53, %v6182_v43  ;;  %v6219_v53 = vld [vmem:[%s4289_s9 + $0x18] sm:$0xff]  }
 0x396   : > { %v2604_v6 = vadd.f32 %v2603_v18, %v6185_v61  ;;  %v6222_v18 = vld [vmem:[%s4289_s9 + $0x30] sm:$0xff]  }
 0x397   : > { %v3451_v25 = vpop.f32.mrb[28].mxu1 }
 0x398   : > { %v2532_v10 = vpop.f32.mrb[29].mxu1  ;;  %v2605_v11 = vadd.f32 %v2604_v6, %v6189_v45  ;;  %v6201_v12 = vadd.f32 %v3451_v25, %v6071_v9  ;;  %v3195_v6 = vunpack.c.l.bf16 %v6210_v24  ;;  %v6226_v25 = vld [vmem:[%s4289_s9 + $0x28] sm:$0xff]  }
 0x399   : > { %v6194_v0 = vadd.f32 %v6071_v9, %v2532_v10  ;;  %v3452_v42 = vpop.f32.mrb[30].mxu1  ;;  %v6229_v10 = vld [vmem:[%s4289_s9 + $0x40] sm:$0xff]  }
 0x39a   : > { %v2535_v14 = vpop.f32.mrb[31].mxu1  ;;  %v6205_v46 = vadd.f32 %v3452_v42, %v6071_v9 }
 0x39b   : > { %v2606_v3 = vadd.f32 %v2605_v11, %v6194_v0  ;;  %v6198_v29 = vadd.f32 %v6071_v9, %v2535_v14  ;;  %v3191_v11 = vunpack.c.l.bf16 %v6213_v4  ;;  %v3192_v14 = vunpack.c.h.bf16 %v6213_v4 }
 0x39c   : > { %v6920_v4 = vunpack.c.l.bf16 %v6226_v25 }
 0x39d   : > { %v2607_v63 = vadd.f32 %v2606_v3, %v6198_v29 }
 0x39f   : > { %v2608_v55 = vadd.f32 %v2607_v63, %v6201_v12  ;;  %v6236_v63 = vld [vmem:[%s4289_s9 + $0x38] sm:$0xff]  }
 0x3a1   : > { %v2609_v19 = vadd.f32 %v2608_v55, %v6205_v46  ;;  %v6239_v55 = vld [vmem:[%s4289_s9 + $0x50] sm:$0xff]  }
 0x3a3   : > { %v2610_v27 = vrot.slane %v2609_v19, 4 }
 0x3a5   : > { %v2611_v33 = vadd.f32 %v2610_v27, %v2609_v19  ;;  %v6276_v27 = vld [vmem:[%s4289_s9 + $0x78] sm:$0xff]  }
 0x3a6   : > { %v3247_v42 = vunpack.c.l.bf16 %v6276_v27 }
 0x3a7   : > { %v2612_v51 = vrot.slane %v2611_v33, 2 }
 0x3a9   : > { %v2613_v8 = vadd.f32 %v2612_v51, %v2611_v33 }
 0x3ab   : > { %v2614_v21 = vrot.slane %v2613_v8, 1 }
 0x3ad   : > { %v2615_v41 = vadd.f32 %v2614_v21, %v2613_v8  ;;  %v6246_v8 = vld [vmem:[%s4289_s9 + $0x48] sm:$0xff]   ;;  %v6249_v21 = vld [vmem:[%s4289_s9 + $0x60] sm:$0xff]  }
 0x3af   : > { %v2617_v38 = vmul.f32 0.00390625, %v2615_v41  ;;  %v6273_v41 = vld [vmem:[%s4289_s9 + $0x80] sm:$0xff]  }
 0x3b1   : > { %3486 = vmatmul.mubr.f32.vlgmr.msra.gmra.mrb[32].mxu1 %v2617_v38 }
 0x484   : > { %v2700_v36 = vpop.f32.mrb[32].mxu1 }
 0x485   : > { %v2704_v9 = vmax.f32 %v2700_v36, 0.0  ;;  %v3487_v52 = vpop.f32.mrb[33].mxu1  ;;  %v6914_v36 = vsub.s32 0, %v4325_v35 }
 0x486   : > { %v6256_v52 = vld [vmem:[%s4289_s9 + $0x58] sm:$0xff]  }
 0x487   : > { %3521 = vmatmul.mubr.f32.vlgmr.msra.gmra.mrb[36].mxu0 %v2704_v9 }
 0x55a   : > { %v2787_v57 = vpop.f32.mrb[36].mxu0 }
 0x55b   : > { %v2791_v31 = vsub.f32 0.0, %v2787_v57  ;;  %v3522_v49 = vpop.f32.mrb[37].mxu0  ;;  %v6259_v57 = vld [vmem:[%s4289_s9 + $0x70] sm:$0xff]  }
 0x55d   : > { %v2792_v32 = vmul.f32 1.442695, %v2791_v31 }
 0x55f   : > { %3713 = vpow2.f32 %v2792_v32 }
 0x569   : > { %v3714_v30 = vpop.eup %3713 }
 0x56a   : > { %v2794_v58 = vadd.f32 1.0, %v3714_v30 }
 0x56c   : > { %3715 = vrcp.f32 %v2794_v58  ;;  %v6266_v58 = vld [vmem:[%s4289_s9 + $0x68] sm:$0xff]   ;;  %s3007_s9 = sshll.u32 %s6348_s24, 4  ;;  %s6409_s9 = int_to_ptr.vmem [resolvable:$true] %s3007_s9 }
 0x56d   : > { %v3239_v38 = vunpack.c.l.bf16 %v6266_v58  ;;  %s3890_s25 = scalar_lea.vmem %s6409_s9, 4096  ;;  %p3897_p13 = scmp.lt.s32.totalorder %s6409_s9, %s3895_s20 }
 0x56e   : > { %p3891_p7 = scmp.ne.s32.totalorder %s6409_s9, %s3890_s25  ;;  %p3898_p0 = scmp.lt.s32.totalorder %s3896_s13, %s3890_s25 }
 0x570   : > { %p3892_p12 = pnand %p3891_p7, %p6943_p4  ;;  %p3899_p2 = por %p3898_p0, %p3897_p13 }
 0x572   : > { %p3893_p1 = pneg %p3892_p12 }
 0x574   : > { %p3900_p8 = pnand %p3899_p2, %p3893_p1 }
 0x576   : > { %v3716_v31 = vpop.eup %3715 }
 0x577   : > { %v2896_v33 = vrot.slane %v3716_v31, %v6914_v36 }
 0x579   : > { %v2897_v30 = vmul.f32 %v2896_v33, %v6077_v47  ;;  %v2898_v3 = vmul.f32 %v2896_v33, %v6074_v44  ;;  %v2899_v51 = vmul.f32 %v2896_v33, %v6083_v39  ;;  %v2900_v9 = vmul.f32 %v2896_v33, %v6088_v16 }
 0x57a   : > { %v2901_v35 = vmul.f32 %v2896_v33, %v6092_v56  ;;  %v2902_v36 = vmul.f32 %v2896_v33, %v6098_v15  ;;  %v2903_v31 = vmul.f32 %v2896_v33, %v6103_v26  ;;  %v2904_v19 = vmul.f32 %v2896_v33, %v6109_v28 }
 0x57b   : > { %v2905_v49 = vmul.f32 %v2896_v33, %v6113_v37  ;;  %v2906_v32 = vmul.f32 %v2896_v33, %v6118_v62  ;;  %v2907_v47 = vmul.f32 %v2896_v33, %v6122_v50  ;;  %v2908_v44 = vmul.f32 %v2896_v33, %v6126_v17 }
 0x57c   : > { %v2909_v39 = vmul.f32 %v2896_v33, %v6130_v59  ;;  %v2910_v16 = vmul.f32 %v2896_v33, %v6134_v34  ;;  %v2911_v56 = vmul.f32 %v2896_v33, %v6138_v7  ;;  %v2912_v15 = vmul.f32 %v2896_v33, %v6142_v54 }
 0x57d   : > { %v2913_v26 = vmul.f32 %v2896_v33, %v6145_v13  ;;  %v2914_v28 = vmul.f32 %v2896_v33, %v6150_v5  ;;  %v2915_v37 = vmul.f32 %v2896_v33, %v6154_v23  ;;  %v2916_v62 = vmul.f32 %v2896_v33, %v6158_v40 }
 0x57e   : > { %v2917_v50 = vmul.f32 %v2896_v33, %v6162_v2  ;;  %v2918_v17 = vmul.f32 %v2896_v33, %v6166_v20  ;;  %v2919_v59 = vmul.f32 %v2896_v33, %v6170_v60  ;;  %v2920_v34 = vmul.f32 %v2896_v33, %v6174_v1 }
 0x57f   : > { %v2921_v7 = vmul.f32 %v2896_v33, %v6178_v22  ;;  %v2922_v54 = vmul.f32 %v2896_v33, %v6182_v43  ;;  %v2923_v13 = vmul.f32 %v2896_v33, %v6185_v61  ;;  %v2924_v5 = vmul.f32 %v2896_v33, %v6189_v45 }
 0x580   : > { %v2925_v23 = vmul.f32 %v2896_v33, %v6194_v0  ;;  %v2926_v40 = vmul.f32 %v2896_v33, %v6198_v29  ;;  %v2927_v2 = vmul.f32 %v2896_v33, %v6201_v12  ;;  %v2928_v20 = vmul.f32 %v2896_v33, %v6205_v46 }
 0x581   : > { %v2929_v60 = vadd.f32 %v3191_v11, %v2897_v30  ;;  %v2930_v1 = vadd.f32 %v3192_v14, %v2898_v3  ;;  %v2931_v22 = vadd.f32 %v3195_v6, %v2899_v51  ;;  %v6915_v43 = vunpack.c.h.bf16 %v6210_v24 }
 0x582   : > { %v6916_v45 = vunpack.c.l.bf16 %v6219_v53  ;;  %v6917_v29 = vunpack.c.h.bf16 %v6219_v53  ;;  %v6918_v46 = vunpack.c.l.bf16 %v6216_v48  ;;  %v6919_v11 = vunpack.c.h.bf16 %v6216_v48 }
 0x583   : > { %v2932_v61 = vadd.f32 %v6915_v43, %v2900_v9  ;;  %v2937_v14 = vadd.f32 %v6920_v4, %v2905_v49  ;;  %v6921_v6 = vunpack.c.h.bf16 %v6226_v25  ;;  %v6922_v24 = vunpack.c.l.bf16 %v6222_v18  ;;  %2961 = vst [vmem:[%s6348_s24] sm:$0xff] %v2929_v60  ;;  %2962 = vst [vmem:[%s6348_s24 + $0x8] sm:$0xff] %v2930_v1 }
 0x584   : > { %v2933_v0 = vadd.f32 %v6916_v45, %v2901_v35  ;;  %v2934_v12 = vadd.f32 %v6917_v29, %v2902_v36  ;;  %v2935_v33 = vadd.f32 %v6918_v46, %v2903_v31  ;;  %v2936_v30 = vadd.f32 %v6919_v11, %v2904_v19  ;;  %2963 = vst [vmem:[%s6348_s24 + $0x10] sm:$0xff] %v2931_v22 }
 0x585   : > { %v2938_v3 = vadd.f32 %v6921_v6, %v2906_v32  ;;  %v2939_v51 = vadd.f32 %v6922_v24, %v2907_v47  ;;  %v6923_v9 = vunpack.c.h.bf16 %v6222_v18  ;;  %2964 = vst [vmem:[%s6348_s24 + $0x18] sm:$0xff] %v2932_v61  ;;  %v6924_v48 = vunpack.c.l.bf16 %v6236_v63  ;;  %2969 = vst [vmem:[%s6348_s24 + $0x40] sm:$0xff] %v2937_v14 }
 0x586   : > { %v6925_v25 = vunpack.c.h.bf16 %v6236_v63  ;;  %v6926_v49 = vunpack.c.l.bf16 %v6229_v10  ;;  %v6927_v35 = vunpack.c.h.bf16 %v6229_v10  ;;  %2965 = vst [vmem:[%s6348_s24 + $0x20] sm:$0xff] %v2933_v0  ;;  %2966 = vst [vmem:[%s6348_s24 + $0x28] sm:$0xff] %v2934_v12  ;;  %v6928_v63 = vunpack.c.l.bf16 %v6246_v8 }
 0x587   : > { %v2940_v53 = vadd.f32 %v6923_v9, %v2908_v44  ;;  %v2941_v18 = vadd.f32 %v6924_v48, %v2909_v39  ;;  %2967 = vst [vmem:[%s6348_s24 + $0x30] sm:$0xff] %v2935_v33  ;;  %2968 = vst [vmem:[%s6348_s24 + $0x38] sm:$0xff] %v2936_v30  ;;  %v6929_v47 = vunpack.c.h.bf16 %v6246_v8  ;;  %v6930_v39 = vunpack.c.l.bf16 %v6239_v55 }
 0x588   : > { %v2942_v19 = vadd.f32 %v6925_v25, %v2910_v16  ;;  %v2943_v32 = vadd.f32 %v6926_v49, %v2911_v56  ;;  %v2944_v36 = vadd.f32 %v6927_v35, %v2912_v15  ;;  %v2945_v31 = vadd.f32 %v6928_v63, %v2913_v26  ;;  %2970 = vst [vmem:[%s6348_s24 + $0x48] sm:$0xff] %v2938_v3 }
 0x589   : > { %v2946_v44 = vadd.f32 %v6929_v47, %v2914_v28  ;;  %v2947_v10 = vadd.f32 %v6930_v39, %v2915_v37  ;;  %v6931_v16 = vunpack.c.h.bf16 %v6239_v55  ;;  %2971 = vst [vmem:[%s6348_s24 + $0x50] sm:$0xff] %v2939_v51  ;;  %2972 = vst [vmem:[%s6348_s24 + $0x58] sm:$0xff] %v2940_v53  ;;  %v6932_v15 = vunpack.c.l.bf16 %v6256_v52 }
 0x58a   : > { %v6933_v8 = vunpack.c.h.bf16 %v6256_v52  ;;  %v6934_v60 = vunpack.c.l.bf16 %v6249_v21  ;;  %v6935_v55 = vunpack.c.h.bf16 %v6249_v21  ;;  %2973 = vst [vmem:[%s6348_s24 + $0x60] sm:$0xff] %v2941_v18  ;;  %2974 = vst [vmem:[%s6348_s24 + $0x68] sm:$0xff] %v2942_v19  ;;  %v2953_v1 = vadd.f32 %v3239_v38, %v2921_v7 }
 0x58b   : > { %v2948_v56 = vadd.f32 %v6931_v16, %v2916_v62  ;;  %v2949_v26 = vadd.f32 %v6932_v15, %v2917_v50  ;;  %2975 = vst [vmem:[%s6348_s24 + $0x70] sm:$0xff] %v2943_v32  ;;  %2976 = vst [vmem:[%s6348_s24 + $0x78] sm:$0xff] %v2944_v36  ;;  %v6936_v50 = vunpack.c.h.bf16 %v6266_v58  ;;  %v6938_v21 = vunpack.c.h.bf16 %v6259_v57 }
 0x58c   : > { %v2950_v28 = vadd.f32 %v6933_v8, %v2918_v17  ;;  %v2951_v37 = vadd.f32 %v6934_v60, %v2919_v59  ;;  %v2952_v62 = vadd.f32 %v6935_v55, %v2920_v34  ;;  %v6937_v17 = vunpack.c.l.bf16 %v6259_v57  ;;  %2977 = vst [vmem:[%s6348_s24 + $0x80] sm:$0xff] %v2945_v31  ;;  %2978 = vst [vmem:[%s6348_s24 + $0x88] sm:$0xff] %v2946_v44 }
 0x58d   : > { %v2954_v52 = vadd.f32 %v6936_v50, %v2922_v54  ;;  %v2956_v34 = vadd.f32 %v6938_v21, %v2924_v5  ;;  %2979 = vst [vmem:[%s6348_s24 + $0x90] sm:$0xff] %v2947_v10  ;;  %2980 = vst [vmem:[%s6348_s24 + $0x98] sm:$0xff] %v2948_v56  ;;  %v2957_v38 = vadd.f32 %v3247_v42, %v2925_v23  ;;  %v6940_v57 = vunpack.c.h.bf16 %v6276_v27 }
 0x58e   : > { %v2955_v59 = vadd.f32 %v6937_v17, %v2923_v13  ;;  %v6941_v7 = vunpack.c.l.bf16 %v6273_v41  ;;  %v6942_v13 = vunpack.c.h.bf16 %v6273_v41  ;;  %2981 = vst [vmem:[%s6348_s24 + $0xa0] sm:$0xff] %v2949_v26  ;;  %2982 = vst [vmem:[%s6348_s24 + $0xa8] sm:$0xff] %v2950_v28 }
 0x58f   : > { %v2958_v58 = vadd.f32 %v6940_v57, %v2926_v40  ;;  %2983 = vst [vmem:[%s6348_s24 + $0xb0] sm:$0xff] %v2951_v37  ;;  %2984 = vst [vmem:[%s6348_s24 + $0xb8] sm:$0xff] %v2952_v62 }
 0x590   : > { %v2959_v54 = vadd.f32 %v6941_v7, %v2927_v2  ;;  %v2960_v5 = vadd.f32 %v6942_v13, %v2928_v20  ;;  %2985 = vst [vmem:[%s6348_s24 + $0xc0] sm:$0xff] %v2953_v1  ;;  %2986 = vst [vmem:[%s6348_s24 + $0xc8] sm:$0xff] %v2954_v52 }
 0x591   : > { %2987 = vst [vmem:[%s6348_s24 + $0xd0] sm:$0xff] %v2955_v59  ;;  %2988 = vst [vmem:[%s6348_s24 + $0xd8] sm:$0xff] %v2956_v34 }
 0x592   : > { %2989 = vst [vmem:[%s6348_s24 + $0xe0] sm:$0xff] %v2957_v38  ;;  %2990 = vst [vmem:[%s6348_s24 + $0xe8] sm:$0xff] %v2958_v58 }
 0x593   : > { %2991 = vst [vmem:[%s6348_s24 + $0xf0] sm:$0xff] %v2959_v54  ;;  %2992 = vst [vmem:[%s6348_s24 + $0xf8] sm:$0xff] %v2960_v5 }
 0x594   : > { %3903 = shalt.err (!%p3900_p8)
}
 0x595   : > { %s3904_s21 = scalar_lea.hbm %s6407_s22, 4096  ;;  %s3908_s24 = scalar_lea.hbm %s6939_s17, 8192 }
 0x596   : > { %p3905_p6 = scmp.ne.s32.totalorder %s6407_s22, %s3904_s21  ;;  %p3909_p3 = scmp.lt.u32.totalorder %s6407_s22, %s6939_s17 }
 0x597   : > { %p3910_p5 = scmp.lt.u32.totalorder %s3908_s24, %s3904_s21  ;;  %p3912_p7 = scmp.lt.u32.totalorder %s3904_s21, %s6407_s22 }
 0x598   : > { %p3906_p10 = pnand %p3905_p6, %p6943_p4 }
 0x599   : > { %p3911_p9 = por %p3910_p5, %p3909_p3 }
 0x59a   : > { %p3907_p11 = pneg %p3906_p10 }
 0x59b   : > { %p3913_p12 = por %p3912_p7, %p3911_p9 }
 0x59d   : > { %p3914_p1 = pnand %p3913_p12, %p3907_p11 }
 0x59f   : > { %3917 = shalt.err (!%p3914_p1)
}
 0x5a0   : > { %s3984_s16 = smov 128   ;;  %s3985_s25 = smov 8  }
 0x5a1   : > { %3595 = dma.vmem_to_hbm [thread:$0]  (%p6943_p4), %s6409_s9, 4096, %s6407_s22, %s2994_s29, %s3984_s16, %s3984_s16, %s3985_s25  }
 0x5a2 PF: > { %s3022_s18 = sand.u32 1, %s3956_s30   ;;  %p6944_p13 = scmp.ne.s32.totalorder %s6601_s28, 0 }
 0x5a3   : > { %p6945_p0 = scmp.ge.s32.totalorder %s3968_s12, 2  ;;  %s3023_s20 = scalar_lea.sflag [#allocation4], %s3022_s18 }
 0x5a5   : > { %p3618_p2 = pnand %p6945_p0, %p6944_p13 }
 0x5a7   : > { %3951 = dma.done.wait (!%p3618_p2), %s3023_s20, 4096  }
 0x5a8   : > { %3953 = vsyncadd (!%p3618_p2), %s3023_s20, 4294963200  ;;  %p25_p8 = scmp.ge.s32.totalorder %s4209_s27, 4   ;;  %s6946_s30 = smov %s3960_s10 }
 0x5a9   : > { %s6947_s10 = smov %s3964_s11  ;;  %s6948_s11 = smov %s4221_s5 }
 0x5aa   : > { %s6949_s12 = smov %s4209_s27  ;;  %27 = sbr.rel (!%p25_p8) target bundleno = 12 (0xc), region = 121 }
 0x5b1   :  { %3028 = vsyncpa [#allocation3], 1 }
 0x5b2   :  { %3030 = vsyncpa [#allocation3 + $0x1], 1 }
 0x5b3   :  { %3031 = vsyncpa [#allocation6], 1 }
 0x5b4   :  { %3032 = vsyncpa [#allocation9], 1 }
 0x5b5   :  { %3033 = vsyncpa [#allocation12], 1 }
 0x5b6   :  { %3034 = vsyncpa [#allocation4], 1 }
 0x5b7   :  { %3036 = vsyncpa [#allocation4 + $0x1], 1 }

</bundles_post_ra>
